<compile_context>
chip_gen: v6e
topology: v6e:2x2x1
jax: 0.10.0
libtpu: 0.0.40
codegen_flags: <defaults>
</compile_context>

<pallas_src>
import functools

import jax
import jax.numpy as jnp
from jax import lax
from jax.experimental import pallas as pl
from jax.experimental.pallas import tpu as pltpu


# --------------------------------------------------------------------------
# Pallas kernel: whole AttentionBlock for Bb batch elements per grid step.
# --------------------------------------------------------------------------
def attention_block_kernel(x_ref, gamma_ref, beta_ref, gmat_ref, gmat_t_ref,
                           wqkv_ref, bqkv_ref, wout_ref, bout_ref, o_ref,
                           *, num_heads, norm_groups, eps, operand_dtype):
    x = x_ref[...].astype(jnp.float32)               # (Bb, T, C)
    Bb, T, C = x.shape
    cd = operand_dtype
    ch = C // num_heads
    cg = C // norm_groups
    inv_n = 1.0 / float(T * cg)

    gmat = gmat_ref[...]                              # (C, G) one-hot group membership
    gmat_t = gmat_t_ref[...]                          # (G, C) precomputed transpose

    # ---- GroupNorm: two-pass (centered) stats over (group channels x T) ----
    s1 = jnp.dot(jnp.sum(x, axis=1), gmat,
                 preferred_element_type=jnp.float32)                  # (Bb, G)
    mean_c = jnp.dot(s1 * inv_n, gmat_t,
                     preferred_element_type=jnp.float32)              # (Bb, C)
    xc = x - mean_c[:, None, :]
    s2 = jnp.dot(jnp.sum(xc * xc, axis=1), gmat,
                 preferred_element_type=jnp.float32)                  # (Bb, G)
    inv_c = jnp.dot(lax.rsqrt(s2 * inv_n + eps), gmat_t,
                    preferred_element_type=jnp.float32)               # (Bb, C)
    # Fused affine tail: h = x*a + b, a = inv_std*gamma, b = beta - mean*a.
    a = inv_c * gamma_ref[...]                        # (Bb, C)
    b = beta_ref[...] - mean_c * a                    # (Bb, C)
    h = x * a[:, None, :] + b[:, None, :]             # (Bb, T, C)

    # ---- fused QKV projection: one full-lane-width MXU matmul ----
    h2 = h.reshape(Bb * T, C).astype(cd)
    qkv = (jnp.dot(h2, wqkv_ref[...], preferred_element_type=jnp.float32)
           + bqkv_ref[...]).reshape(Bb, T, 3 * C)     # q/k scale folded into W/b

    # ---- per-head attention (static lane slices of the small qkv result) ----
    # TODO(synk): for T >= ~1024 (v7x) / ~2048 (v5e/v6e) tile K/V with an online
    # softmax (flash pattern) instead of materializing the (T, T) score tile.
    head_outs = []
    for hd in range(num_heads):
        qo, ko, vo = hd * ch, C + hd * ch, 2 * C + hd * ch
        q = qkv[:, :, qo:qo + ch].astype(cd)
        k = qkv[:, :, ko:ko + ch].astype(cd)
        v = qkv[:, :, vo:vo + ch].astype(cd)

        # Scores: batched over Bb, contracting the head dim (no k transpose).
        s = lax.dot_general(q, k, (((2,), (2,)), ((0,), (0,))),
                            preferred_element_type=jnp.float32)       # (Bb, T, T)
        e = jnp.exp(s - jnp.max(s, axis=-1, keepdims=True))
        o_un = lax.dot_general(e.astype(cd), v, (((2,), (1,)), ((0,), (0,))),
                               preferred_element_type=jnp.float32)    # (Bb, T, ch)
        # Normalize AFTER the PV matmul (scale on (T, ch), not (T, T); EUP slot).
        head_outs.append(
            o_un * pl.reciprocal(jnp.sum(e, axis=-1, keepdims=True), approx=True))

    o_all = jnp.concatenate(head_outs, axis=-1)       # (Bb, T, C), PyTorch head order

    # ---- fused output projection (K = C, single MXU weight load) + residual ----
    out = (jnp.dot(o_all.reshape(Bb * T, C).astype(cd), wout_ref[...],
                   preferred_element_type=jnp.float32)
           + bout_ref[...]).reshape(Bb, T, C)
    o_ref[...] = (out + x).astype(o_ref.dtype)


# --------------------------------------------------------------------------
# Generation-aware VMEM / tiling heuristics.
# --------------------------------------------------------------------------
def _tpu_vmem_capacity_bytes():
    try:
        info = pltpu.get_tpu_info()
        return int(getattr(info, "vmem_capacity_bytes", 128 * 1024 * 1024))
    except Exception:
        return 128 * 1024 * 1024


def _vmem_limit_bytes(vmem_cap):
    # ~75% of physical VMEM: ~96 MiB on 128 MiB chips (v5e/v6e), ~48 MiB on v7x.
    return int(min(110 << 20, max(32 << 20, (vmem_cap * 3) // 4)))


def _pick_block_batch(batch, T, C, norm_groups, io_bytes, op_bytes,
                      vmem_limit, min_grid_steps):
    """Largest divisor of `batch` fitting the VMEM budget."""
    # Resident weights (single-buffered): W_qkv + W_out in operand dtype,
    # gmat / gmat^T / bias-vectors in f32.
    weight_bytes = (4 * C * C) * op_bytes + 4 * (2 * C * norm_groups + 6 * C)
    # Per batch element: double-buffered in/out blocks plus rough live f32
    # intermediates (x, h, qkv, score + exp tiles, concatenated head outputs).
    per_b = 4 * T * C * io_bytes + 4 * (7 * T * C + 2 * T * T)
    budget = max(per_b, vmem_limit - weight_bytes - (4 << 20))
    cap_vmem = max(1, budget // per_b)
    cap_grid = max(1, batch // max(1, min_grid_steps))
    bb = int(max(1, min(batch, cap_vmem, cap_grid)))
    while batch % bb:
        bb -= 1
    return bb


def _const_spec(shape):
    n = len(shape)
    imap = lambda b, _n=n: (0,) * _n
    if hasattr(pl, "Buffered"):
        try:   # single-buffer constant weights (halves their resident VMEM)
            return pl.BlockSpec(shape, imap, pipeline_mode=pl.Buffered(1))
        except TypeError:
            pass
    return pl.BlockSpec(shape, imap)


# --------------------------------------------------------------------------
# Wrappers: layout plumbing, constant-weight transforms, pallas_call.
# --------------------------------------------------------------------------
def attention_block_btc(x_btc, params, *, num_heads, norm_groups, eps=1e-5,
                        operand_dtype=jnp.bfloat16, io_dtype=None,
                        block_batch=None):
    """AttentionBlock on a (B, T, C) activation (T = flattened spatial)."""
    B, T, C = x_btc.shape
    assert C % num_heads == 0 and C % norm_groups == 0, (C, num_heads, norm_groups)
    ch = C // num_heads
    cg = C // norm_groups
    io_dtype = x_btc.dtype if io_dtype is None else io_dtype
    x = x_btc.astype(io_dtype)

    # Fold the ch**-0.25 q/k scale into the projection weights/bias (zero runtime cost).
    scale = jnp.float32(ch) ** jnp.float32(-0.25)
    col_scale = jnp.concatenate([jnp.full((2 * C,), scale, jnp.float32),
                                 jnp.ones((C,), jnp.float32)])
    wqkv = (params["wqkv"].astype(jnp.float32) * col_scale[None, :]).astype(operand_dtype)
    bqkv = (params["bqkv"].astype(jnp.float32) * col_scale).reshape(1, 3 * C)
    wout = params["wout"].astype(operand_dtype)
    bout = params["bout"].reshape(1, C).astype(jnp.float32)
    gamma = params["gamma"].reshape(1, C).astype(jnp.float32)
    beta = params["beta"].reshape(1, C).astype(jnp.float32)

    # One-hot group-membership matrix and its transpose (no in-kernel transposes).
    gmat = (jnp.arange(C)[:, None] // cg ==
            jnp.arange(norm_groups)[None, :]).astype(jnp.float32)          # (C, G)
    gmat_t = gmat.T                                                        # (G, C)

    vmem_cap = _tpu_vmem_capacity_bytes()
    vmem_limit = _vmem_limit_bytes(vmem_cap)
    # v7x-class chips (64 MiB VMEM / TC) have 2 TensorCores: keep >= 2 parallel
    # grid steps there; single-TC v5e/v6e just take the largest fitting block.
    min_grid_steps = 2 if (vmem_cap <= (64 << 20) and B >= 2) else 1
    # TODO(synk): when B // bb < 2 on v7x (e.g. B=1 sampling), add a second
    # "parallel" grid axis over heads / query tiles so both TensorCores get work.
    if block_batch is None:
        block_batch = _pick_block_batch(
            B, T, C, norm_groups, jnp.dtype(io_dtype).itemsize,
            jnp.dtype(operand_dtype).itemsize, vmem_limit, min_grid_steps)
    bb = block_batch
    assert B % bb == 0, (B, bb)

    kern = functools.partial(attention_block_kernel, num_heads=num_heads,
                             norm_groups=norm_groups, eps=float(eps),
                             operand_dtype=operand_dtype)

    out = pl.pallas_call(
        kern,
        out_shape=jax.ShapeDtypeStruct((B, T, C), io_dtype),
        grid_spec=pltpu.PrefetchScalarGridSpec(
            num_scalar_prefetch=0,
            grid=(B // bb,),
            in_specs=[
                pl.BlockSpec((bb, T, C), lambda b: (b, 0, 0)),   # x
                _const_spec((1, C)),                             # gamma
                _const_spec((1, C)),                             # beta
                _const_spec((C, norm_groups)),                   # gmat
                _const_spec((norm_groups, C)),                   # gmat^T
                _const_spec((C, 3 * C)),                         # W_qkv (scale folded)
                _const_spec((1, 3 * C)),                         # b_qkv (scale folded)
                _const_spec((C, C)),                             # W_out (zero-init)
                _const_spec((1, C)),                             # b_out
            ],
            out_specs=pl.BlockSpec((bb, T, C), lambda b: (b, 0, 0)),
        ),
        compiler_params=pltpu.CompilerParams(
            dimension_semantics=("parallel",),
            vmem_limit_bytes=vmem_limit),
    )(x, gamma, beta, gmat, gmat_t, wqkv, bqkv, wout, bout)
    return out


def attention_block(x_nchw, params, *, num_heads, norm_groups, eps=1e-5,
                    operand_dtype=jnp.bfloat16, io_dtype=None, block_batch=None):
    """NCHW adapter. Prefer calling attention_block_btc directly from graphs
    that keep activations channels-last (avoids two full HBM transposes)."""
    B, C, H, W = x_nchw.shape
    T = H * W
    x = x_nchw.reshape(B, C, T).transpose(0, 2, 1)
    out = attention_block_btc(x, params, num_heads=num_heads,
                              norm_groups=norm_groups, eps=eps,
                              operand_dtype=operand_dtype, io_dtype=io_dtype,
                              block_batch=block_batch)
    return out.transpose(0, 2, 1).reshape(B, C, H, W).astype(x_nchw.dtype)


# --------------------------------------------------------------------------
# Pure-JAX reference (mirrors the PyTorch forward exactly).
# --------------------------------------------------------------------------
def attention_block_ref(x_nchw, params, *, num_heads, norm_groups, eps=1e-5):
    B, C, H, W = x_nchw.shape
    T = H * W
    x = x_nchw.reshape(B, C, T).astype(jnp.float32)
    cg = C // norm_groups

    xg = x.reshape(B, norm_groups, cg, T)
    mean = xg.mean(axis=(2, 3), keepdims=True)
    var = xg.var(axis=(2, 3), keepdims=True)
    xn = ((xg - mean) / jnp.sqrt(var + eps)).reshape(B, C, T)
    h = xn * params["gamma"][None, :, None] + params["beta"][None, :, None]

    qkv = jnp.einsum("co,bct->bot", params["wqkv"], h) + params["bqkv"][None, :, None]

    ch = C // num_heads
    scale = ch ** (-1 / 4)
    q, k, v = jnp.split(qkv, 3, axis=1)
    q = (q * scale).reshape(B * num_heads, ch, T)
    k = (k * scale).reshape(B * num_heads, ch, T)
    v = v.reshape(B * num_heads, ch, T)
    w = jax.nn.softmax(jnp.einsum("bct,bcs->bts", q, k), axis=-1)
    o = jnp.einsum("bts,bcs->bct", w, v).reshape(B, C, T)

    out = jnp.einsum("co,bct->bot", params["wout"], o) + params["bout"][None, :, None]
    return (out + x).reshape(B, C, H, W)


# --------------------------------------------------------------------------
# Deterministic parameter init matching AttentionBlock.__init__ shapes.
# --------------------------------------------------------------------------
def make_params(key, n_channels):
    C = n_channels
    k1, k2, k3, k4 = jax.random.split(key, 4)
    return {
        "gamma": 1.0 + 0.1 * jax.random.normal(k1, (C,), jnp.float32),    # GroupNorm weight
        "beta": 0.1 * jax.random.normal(k2, (C,), jnp.float32),           # GroupNorm bias
        "wqkv": 0.05 * jax.random.normal(k3, (C, 3 * C), jnp.float32),    # conv1 weight^T
        "bqkv": 0.05 * jax.random.normal(k4, (3 * C,), jnp.float32),      # conv1 bias
        "wout": jnp.zeros((C, C), jnp.float32),                           # zero_init conv weight^T
        "bout": jnp.zeros((C,), jnp.float32),                             # zero_init conv bias
    }


if __name__ == "__main__":
    B, C, H, W = 2, 32, 8, 8
    n_heads, norm_groups = 4, 8

    key = jax.random.PRNGKey(0)
    kx, kp, kw = jax.random.split(key, 3)
    x = jax.random.normal(kx, (B, C, H, W), jnp.float32)
    params = make_params(kp, C)

    ref = attention_block_ref(x, params, num_heads=n_heads, norm_groups=norm_groups)

    # Faithful run (zero-initialized output conv, as in the module); bf16 MXU default.
    out = jax.block_until_ready(
        attention_block(x, params, num_heads=n_heads, norm_groups=norm_groups))
    assert jnp.allclose(out, ref, atol=1e-3, rtol=1e-3), "mismatch (zero-init conv)"

    # Non-zero output conv so the attention path is exercised.
    params_nz = dict(params)
    params_nz["wout"] = 0.05 * jax.random.normal(kw, (C, C), jnp.float32)
    ref_nz = attention_block_ref(x, params_nz, num_heads=n_heads, norm_groups=norm_groups)

    # Full-f32 MXU operands: tight tolerance.
    out_f32 = jax.block_until_ready(
        attention_block(x, params_nz, num_heads=n_heads, norm_groups=norm_groups,
                        operand_dtype=jnp.float32))
    assert jnp.allclose(out_f32, ref_nz, atol=1e-3, rtol=1e-3), "mismatch (f32 operands)"

    # Default bf16 MXU operands (f32 stats / softmax / accumulation).
    out_bf16 = jax.block_until_ready(
        attention_block(x, params_nz, num_heads=n_heads, norm_groups=norm_groups))
    assert jnp.allclose(out_bf16, ref_nz, atol=5e-2, rtol=5e-2), "mismatch (bf16 operands)"

    # Explicit multi-step grid (block_batch=1) exercises the pipelined path.
    out_bb1 = jax.block_until_ready(
        attention_block(x, params_nz, num_heads=n_heads, norm_groups=norm_groups,
                        operand_dtype=jnp.float32, block_batch=1))
    assert jnp.allclose(out_bb1, ref_nz, atol=1e-3, rtol=1e-3), "mismatch (block_batch=1)"

    # bf16 kernel I/O (halves HBM DMA bytes; helps v5e bandwidth / v7x VMEM).
    out_io = jax.block_until_ready(
        attention_block(x, params_nz, num_heads=n_heads, norm_groups=norm_groups,
                        io_dtype=jnp.bfloat16))
    assert jnp.allclose(out_io, ref_nz, atol=6e-2, rtol=6e-2), "mismatch (bf16 I/O)"

    print("KERNEL_OK")
</pallas_src>

<mosaic_0001>
module attributes {stable_mosaic.version = 11 : i64} {
  func.func @attention_block_kernel(%arg0: i32, %arg1: memref<2x64x32xf32, #tpu.memory_space<vmem>>, %arg2: memref<1x32xf32, #tpu.memory_space<vmem>>, %arg3: memref<1x32xf32, #tpu.memory_space<vmem>>, %arg4: memref<32x8xf32, #tpu.memory_space<vmem>>, %arg5: memref<8x32xf32, #tpu.memory_space<vmem>>, %arg6: memref<32x96xbf16, #tpu.memory_space<vmem>>, %arg7: memref<1x96xf32, #tpu.memory_space<vmem>>, %arg8: memref<32x32xbf16, #tpu.memory_space<vmem>>, %arg9: memref<1x32xf32, #tpu.memory_space<vmem>>, %arg10: memref<2x64x32xf32, #tpu.memory_space<vmem>>) attributes {dimension_semantics = [#tpu.dimension_semantics<parallel>], iteration_bounds = array<i64: 1>, scalar_prefetch = 0 : i64, scratch_operands = 0 : i64, tpu.core_type = #tpu.core_type<tc>, window_params = [{transform_indices = @transform_0, window_bounds = array<i64: 2, 64, 32>}, {pipeline_mode = #tpu.pipeline_mode<synchronous>, transform_indices = @transform_1, window_bounds = array<i64: 1, 32>}, {pipeline_mode = #tpu.pipeline_mode<synchronous>, transform_indices = @transform_2, window_bounds = array<i64: 1, 32>}, {pipeline_mode = #tpu.pipeline_mode<synchronous>, transform_indices = @transform_3, window_bounds = array<i64: 32, 8>}, {pipeline_mode = #tpu.pipeline_mode<synchronous>, transform_indices = @transform_4, window_bounds = array<i64: 8, 32>}, {pipeline_mode = #tpu.pipeline_mode<synchronous>, transform_indices = @transform_5, window_bounds = array<i64: 32, 96>}, {pipeline_mode = #tpu.pipeline_mode<synchronous>, transform_indices = @transform_6, window_bounds = array<i64: 1, 96>}, {pipeline_mode = #tpu.pipeline_mode<synchronous>, transform_indices = @transform_7, window_bounds = array<i64: 32, 32>}, {pipeline_mode = #tpu.pipeline_mode<synchronous>, transform_indices = @transform_8, window_bounds = array<i64: 1, 32>}, {transform_indices = @transform_9, window_bounds = array<i64: 2, 64, 32>}]} {
    %c0 = arith.constant 0 : index
    %c0_0 = arith.constant 0 : index
    %c0_1 = arith.constant 0 : index
    %0 = vector.load %arg1[%c0, %c0_0, %c0_1] : memref<2x64x32xf32, #tpu.memory_space<vmem>>, vector<2x64x32xf32>
    %c0_2 = arith.constant 0 : index
    %c0_3 = arith.constant 0 : index
    %1 = vector.load %arg4[%c0_2, %c0_3] : memref<32x8xf32, #tpu.memory_space<vmem>>, vector<32x8xf32>
    %c0_4 = arith.constant 0 : index
    %c0_5 = arith.constant 0 : index
    %2 = vector.load %arg5[%c0_4, %c0_5] : memref<8x32xf32, #tpu.memory_space<vmem>>, vector<8x32xf32>
    %cst = arith.constant dense<0.000000e+00> : vector<2x32xf32>
    %3 = vector.multi_reduction <add>, %0, %cst [1] : vector<2x64x32xf32> to vector<2x32xf32>
    %cst_6 = arith.constant dense<0.000000e+00> : vector<2x8xf32>
    %4 = tpu.matmul %3, %1, %cst_6 {dimension_numbers = #tpu.dot_dimension_numbers<[1], [0], [0], [1], [0, 0, 1, 1], [], []>} : vector<2x32xf32>, vector<32x8xf32>, vector<2x8xf32> -> vector<2x8xf32>
    %cst_7 = arith.constant 3.906250e-03 : f32
    %5 = vector.broadcast %cst_7 : f32 to vector<2x8xf32>
    %6 = arith.mulf %4, %5 : vector<2x8xf32>
    %cst_8 = arith.constant dense<0.000000e+00> : vector<2x32xf32>
    %7 = tpu.matmul %6, %2, %cst_8 {dimension_numbers = #tpu.dot_dimension_numbers<[1], [0], [0], [1], [0, 0, 1, 1], [], []>} : vector<2x8xf32>, vector<8x32xf32>, vector<2x32xf32> -> vector<2x32xf32>
    %8 = vector.shape_cast %7 : vector<2x32xf32> to vector<2x1x32xf32>
    %9 = vector.broadcast %8 : vector<2x1x32xf32> to vector<2x64x32xf32>
    %10 = arith.subf %0, %9 : vector<2x64x32xf32>
    %11 = arith.mulf %10, %10 : vector<2x64x32xf32>
    %cst_9 = arith.constant dense<0.000000e+00> : vector<2x32xf32>
    %12 = vector.multi_reduction <add>, %11, %cst_9 [1] : vector<2x64x32xf32> to vector<2x32xf32>
    %cst_10 = arith.constant dense<0.000000e+00> : vector<2x8xf32>
    %13 = tpu.matmul %12, %1, %cst_10 {dimension_numbers = #tpu.dot_dimension_numbers<[1], [0], [0], [1], [0, 0, 1, 1], [], []>} : vector<2x32xf32>, vector<32x8xf32>, vector<2x8xf32> -> vector<2x8xf32>
    %cst_11 = arith.constant 3.906250e-03 : f32
    %14 = vector.broadcast %cst_11 : f32 to vector<2x8xf32>
    %15 = arith.mulf %13, %14 : vector<2x8xf32>
    %cst_12 = arith.constant 9.99999974E-6 : f32
    %16 = vector.broadcast %cst_12 : f32 to vector<2x8xf32>
    %17 = arith.addf %15, %16 : vector<2x8xf32>
    %18 = math.rsqrt %17 : vector<2x8xf32>
    %cst_13 = arith.constant dense<0.000000e+00> : vector<2x32xf32>
    %19 = tpu.matmul %18, %2, %cst_13 {dimension_numbers = #tpu.dot_dimension_numbers<[1], [0], [0], [1], [0, 0, 1, 1], [], []>} : vector<2x8xf32>, vector<8x32xf32>, vector<2x32xf32> -> vector<2x32xf32>
    %c0_14 = arith.constant 0 : index
    %c0_15 = arith.constant 0 : index
    %20 = vector.load %arg2[%c0_14, %c0_15] : memref<1x32xf32, #tpu.memory_space<vmem>>, vector<1x32xf32>
    %21 = vector.broadcast %20 : vector<1x32xf32> to vector<2x32xf32>
    %22 = arith.mulf %19, %21 : vector<2x32xf32>
    %c0_16 = arith.constant 0 : index
    %c0_17 = arith.constant 0 : index
    %23 = vector.load %arg3[%c0_16, %c0_17] : memref<1x32xf32, #tpu.memory_space<vmem>>, vector<1x32xf32>
    %24 = arith.mulf %7, %22 : vector<2x32xf32>
    %25 = vector.broadcast %23 : vector<1x32xf32> to vector<2x32xf32>
    %26 = arith.subf %25, %24 : vector<2x32xf32>
    %27 = vector.shape_cast %22 : vector<2x32xf32> to vector<2x1x32xf32>
    %28 = vector.broadcast %27 : vector<2x1x32xf32> to vector<2x64x32xf32>
    %29 = arith.mulf %0, %28 : vector<2x64x32xf32>
    %30 = vector.shape_cast %26 : vector<2x32xf32> to vector<2x1x32xf32>
    %31 = vector.broadcast %30 : vector<2x1x32xf32> to vector<2x64x32xf32>
    %32 = arith.addf %29, %31 : vector<2x64x32xf32>
    %33 = vector.shape_cast %32 : vector<2x64x32xf32> to vector<128x32xf32>
    %34 = arith.truncf %33 : vector<128x32xf32> to vector<128x32xbf16>
    %c0_18 = arith.constant 0 : index
    %c0_19 = arith.constant 0 : index
    %35 = vector.load %arg6[%c0_18, %c0_19] : memref<32x96xbf16, #tpu.memory_space<vmem>>, vector<32x96xbf16>
    %cst_20 = arith.constant dense<0.000000e+00> : vector<128x96xf32>
    %36 = tpu.matmul %34, %35, %cst_20 {dimension_numbers = #tpu.dot_dimension_numbers<[1], [0], [0], [1], [0, 0, 1, 1], [], []>} : vector<128x32xbf16>, vector<32x96xbf16>, vector<128x96xf32> -> vector<128x96xf32>
    %c0_21 = arith.constant 0 : index
    %c0_22 = arith.constant 0 : index
    %37 = vector.load %arg7[%c0_21, %c0_22] : memref<1x96xf32, #tpu.memory_space<vmem>>, vector<1x96xf32>
    %38 = vector.broadcast %37 : vector<1x96xf32> to vector<128x96xf32>
    %39 = arith.addf %36, %38 : vector<128x96xf32>
    %40 = vector.shape_cast %39 : vector<128x96xf32> to vector<2x64x96xf32>
    %41 = vector.extract_strided_slice %40 {offsets = [0, 0, 0], sizes = [2, 64, 8], strides = [1, 1, 1]} : vector<2x64x96xf32> to vector<2x64x8xf32>
    %42 = arith.truncf %41 : vector<2x64x8xf32> to vector<2x64x8xbf16>
    %43 = vector.extract_strided_slice %40 {offsets = [0, 0, 32], sizes = [2, 64, 8], strides = [1, 1, 1]} : vector<2x64x96xf32> to vector<2x64x8xf32>
    %44 = arith.truncf %43 : vector<2x64x8xf32> to vector<2x64x8xbf16>
    %45 = vector.extract_strided_slice %40 {offsets = [0, 0, 64], sizes = [2, 64, 8], strides = [1, 1, 1]} : vector<2x64x96xf32> to vector<2x64x8xf32>
    %46 = arith.truncf %45 : vector<2x64x8xf32> to vector<2x64x8xbf16>
    %cst_23 = arith.constant dense<0.000000e+00> : vector<2x64x64xf32>
    %47 = tpu.matmul %42, %44, %cst_23 {dimension_numbers = #tpu.dot_dimension_numbers<[2], [2], [1], [1], [0, 0, 0, 1, 1, 1], [0], [0]>} : vector<2x64x8xbf16>, vector<2x64x8xbf16>, vector<2x64x64xf32> -> vector<2x64x64xf32>
    %cst_24 = arith.constant dense<0xFF800000> : vector<2x64xf32>
    %48 = vector.multi_reduction <maximumf>, %47, %cst_24 [2] : vector<2x64x64xf32> to vector<2x64xf32>
    %49 = vector.shape_cast %48 : vector<2x64xf32> to vector<2x64x1xf32>
    %50 = vector.broadcast %49 : vector<2x64x1xf32> to vector<2x64x64xf32>
    %51 = arith.subf %47, %50 : vector<2x64x64xf32>
    %52 = math.exp %51 : vector<2x64x64xf32>
    %53 = arith.truncf %52 : vector<2x64x64xf32> to vector<2x64x64xbf16>
    %cst_25 = arith.constant dense<0.000000e+00> : vector<2x64x8xf32>
    %54 = tpu.matmul %53, %46, %cst_25 {dimension_numbers = #tpu.dot_dimension_numbers<[2], [1], [1], [2], [0, 0, 0, 1, 1, 2], [0], [0]>} : vector<2x64x64xbf16>, vector<2x64x8xbf16>, vector<2x64x8xf32> -> vector<2x64x8xf32>
    %cst_26 = arith.constant dense<0.000000e+00> : vector<2x64xf32>
    %55 = vector.multi_reduction <add>, %52, %cst_26 [2] : vector<2x64x64xf32> to vector<2x64xf32>
    %56 = vector.shape_cast %55 : vector<2x64xf32> to vector<2x64x1xf32>
    %57 = tpu.reciprocal %56 {approx = true} : vector<2x64x1xf32> -> vector<2x64x1xf32>
    %58 = vector.broadcast %57 : vector<2x64x1xf32> to vector<2x64x8xf32>
    %59 = arith.mulf %54, %58 : vector<2x64x8xf32>
    %60 = vector.extract_strided_slice %40 {offsets = [0, 0, 8], sizes = [2, 64, 8], strides = [1, 1, 1]} : vector<2x64x96xf32> to vector<2x64x8xf32>
    %61 = arith.truncf %60 : vector<2x64x8xf32> to vector<2x64x8xbf16>
    %62 = vector.extract_strided_slice %40 {offsets = [0, 0, 40], sizes = [2, 64, 8], strides = [1, 1, 1]} : vector<2x64x96xf32> to vector<2x64x8xf32>
    %63 = arith.truncf %62 : vector<2x64x8xf32> to vector<2x64x8xbf16>
    %64 = vector.extract_strided_slice %40 {offsets = [0, 0, 72], sizes = [2, 64, 8], strides = [1, 1, 1]} : vector<2x64x96xf32> to vector<2x64x8xf32>
    %65 = arith.truncf %64 : vector<2x64x8xf32> to vector<2x64x8xbf16>
    %cst_27 = arith.constant dense<0.000000e+00> : vector<2x64x64xf32>
    %66 = tpu.matmul %61, %63, %cst_27 {dimension_numbers = #tpu.dot_dimension_numbers<[2], [2], [1], [1], [0, 0, 0, 1, 1, 1], [0], [0]>} : vector<2x64x8xbf16>, vector<2x64x8xbf16>, vector<2x64x64xf32> -> vector<2x64x64xf32>
    %cst_28 = arith.constant dense<0xFF800000> : vector<2x64xf32>
    %67 = vector.multi_reduction <maximumf>, %66, %cst_28 [2] : vector<2x64x64xf32> to vector<2x64xf32>
    %68 = vector.shape_cast %67 : vector<2x64xf32> to vector<2x64x1xf32>
    %69 = vector.broadcast %68 : vector<2x64x1xf32> to vector<2x64x64xf32>
    %70 = arith.subf %66, %69 : vector<2x64x64xf32>
    %71 = math.exp %70 : vector<2x64x64xf32>
    %72 = arith.truncf %71 : vector<2x64x64xf32> to vector<2x64x64xbf16>
    %cst_29 = arith.constant dense<0.000000e+00> : vector<2x64x8xf32>
    %73 = tpu.matmul %72, %65, %cst_29 {dimension_numbers = #tpu.dot_dimension_numbers<[2], [1], [1], [2], [0, 0, 0, 1, 1, 2], [0], [0]>} : vector<2x64x64xbf16>, vector<2x64x8xbf16>, vector<2x64x8xf32> -> vector<2x64x8xf32>
    %cst_30 = arith.constant dense<0.000000e+00> : vector<2x64xf32>
    %74 = vector.multi_reduction <add>, %71, %cst_30 [2] : vector<2x64x64xf32> to vector<2x64xf32>
    %75 = vector.shape_cast %74 : vector<2x64xf32> to vector<2x64x1xf32>
    %76 = tpu.reciprocal %75 {approx = true} : vector<2x64x1xf32> -> vector<2x64x1xf32>
    %77 = vector.broadcast %76 : vector<2x64x1xf32> to vector<2x64x8xf32>
    %78 = arith.mulf %73, %77 : vector<2x64x8xf32>
    %79 = vector.extract_strided_slice %40 {offsets = [0, 0, 16], sizes = [2, 64, 8], strides = [1, 1, 1]} : vector<2x64x96xf32> to vector<2x64x8xf32>
    %80 = arith.truncf %79 : vector<2x64x8xf32> to vector<2x64x8xbf16>
    %81 = vector.extract_strided_slice %40 {offsets = [0, 0, 48], sizes = [2, 64, 8], strides = [1, 1, 1]} : vector<2x64x96xf32> to vector<2x64x8xf32>
    %82 = arith.truncf %81 : vector<2x64x8xf32> to vector<2x64x8xbf16>
    %83 = vector.extract_strided_slice %40 {offsets = [0, 0, 80], sizes = [2, 64, 8], strides = [1, 1, 1]} : vector<2x64x96xf32> to vector<2x64x8xf32>
    %84 = arith.truncf %83 : vector<2x64x8xf32> to vector<2x64x8xbf16>
    %cst_31 = arith.constant dense<0.000000e+00> : vector<2x64x64xf32>
    %85 = tpu.matmul %80, %82, %cst_31 {dimension_numbers = #tpu.dot_dimension_numbers<[2], [2], [1], [1], [0, 0, 0, 1, 1, 1], [0], [0]>} : vector<2x64x8xbf16>, vector<2x64x8xbf16>, vector<2x64x64xf32> -> vector<2x64x64xf32>
    %cst_32 = arith.constant dense<0xFF800000> : vector<2x64xf32>
    %86 = vector.multi_reduction <maximumf>, %85, %cst_32 [2] : vector<2x64x64xf32> to vector<2x64xf32>
    %87 = vector.shape_cast %86 : vector<2x64xf32> to vector<2x64x1xf32>
    %88 = vector.broadcast %87 : vector<2x64x1xf32> to vector<2x64x64xf32>
    %89 = arith.subf %85, %88 : vector<2x64x64xf32>
    %90 = math.exp %89 : vector<2x64x64xf32>
    %91 = arith.truncf %90 : vector<2x64x64xf32> to vector<2x64x64xbf16>
    %cst_33 = arith.constant dense<0.000000e+00> : vector<2x64x8xf32>
    %92 = tpu.matmul %91, %84, %cst_33 {dimension_numbers = #tpu.dot_dimension_numbers<[2], [1], [1], [2], [0, 0, 0, 1, 1, 2], [0], [0]>} : vector<2x64x64xbf16>, vector<2x64x8xbf16>, vector<2x64x8xf32> -> vector<2x64x8xf32>
    %cst_34 = arith.constant dense<0.000000e+00> : vector<2x64xf32>
    %93 = vector.multi_reduction <add>, %90, %cst_34 [2] : vector<2x64x64xf32> to vector<2x64xf32>
    %94 = vector.shape_cast %93 : vector<2x64xf32> to vector<2x64x1xf32>
    %95 = tpu.reciprocal %94 {approx = true} : vector<2x64x1xf32> -> vector<2x64x1xf32>
    %96 = vector.broadcast %95 : vector<2x64x1xf32> to vector<2x64x8xf32>
    %97 = arith.mulf %92, %96 : vector<2x64x8xf32>
    %98 = vector.extract_strided_slice %40 {offsets = [0, 0, 24], sizes = [2, 64, 8], strides = [1, 1, 1]} : vector<2x64x96xf32> to vector<2x64x8xf32>
    %99 = arith.truncf %98 : vector<2x64x8xf32> to vector<2x64x8xbf16>
    %100 = vector.extract_strided_slice %40 {offsets = [0, 0, 56], sizes = [2, 64, 8], strides = [1, 1, 1]} : vector<2x64x96xf32> to vector<2x64x8xf32>
    %101 = arith.truncf %100 : vector<2x64x8xf32> to vector<2x64x8xbf16>
    %102 = vector.extract_strided_slice %40 {offsets = [0, 0, 88], sizes = [2, 64, 8], strides = [1, 1, 1]} : vector<2x64x96xf32> to vector<2x64x8xf32>
    %103 = arith.truncf %102 : vector<2x64x8xf32> to vector<2x64x8xbf16>
    %cst_35 = arith.constant dense<0.000000e+00> : vector<2x64x64xf32>
    %104 = tpu.matmul %99, %101, %cst_35 {dimension_numbers = #tpu.dot_dimension_numbers<[2], [2], [1], [1], [0, 0, 0, 1, 1, 1], [0], [0]>} : vector<2x64x8xbf16>, vector<2x64x8xbf16>, vector<2x64x64xf32> -> vector<2x64x64xf32>
    %cst_36 = arith.constant dense<0xFF800000> : vector<2x64xf32>
    %105 = vector.multi_reduction <maximumf>, %104, %cst_36 [2] : vector<2x64x64xf32> to vector<2x64xf32>
    %106 = vector.shape_cast %105 : vector<2x64xf32> to vector<2x64x1xf32>
    %107 = vector.broadcast %106 : vector<2x64x1xf32> to vector<2x64x64xf32>
    %108 = arith.subf %104, %107 : vector<2x64x64xf32>
    %109 = math.exp %108 : vector<2x64x64xf32>
    %110 = arith.truncf %109 : vector<2x64x64xf32> to vector<2x64x64xbf16>
    %cst_37 = arith.constant dense<0.000000e+00> : vector<2x64x8xf32>
    %111 = tpu.matmul %110, %103, %cst_37 {dimension_numbers = #tpu.dot_dimension_numbers<[2], [1], [1], [2], [0, 0, 0, 1, 1, 2], [0], [0]>} : vector<2x64x64xbf16>, vector<2x64x8xbf16>, vector<2x64x8xf32> -> vector<2x64x8xf32>
    %cst_38 = arith.constant dense<0.000000e+00> : vector<2x64xf32>
    %112 = vector.multi_reduction <add>, %109, %cst_38 [2] : vector<2x64x64xf32> to vector<2x64xf32>
    %113 = vector.shape_cast %112 : vector<2x64xf32> to vector<2x64x1xf32>
    %114 = tpu.reciprocal %113 {approx = true} : vector<2x64x1xf32> -> vector<2x64x1xf32>
    %115 = vector.broadcast %114 : vector<2x64x1xf32> to vector<2x64x8xf32>
    %116 = arith.mulf %111, %115 : vector<2x64x8xf32>
    %117 = tpu.concatenate %59, %78, %97, %116 in 2 : vector<2x64x8xf32>, vector<2x64x8xf32>, vector<2x64x8xf32>, vector<2x64x8xf32> -> vector<2x64x32xf32>
    %118 = vector.shape_cast %117 : vector<2x64x32xf32> to vector<128x32xf32>
    %119 = arith.truncf %118 : vector<128x32xf32> to vector<128x32xbf16>
    %c0_39 = arith.constant 0 : index
    %c0_40 = arith.constant 0 : index
    %120 = vector.load %arg8[%c0_39, %c0_40] : memref<32x32xbf16, #tpu.memory_space<vmem>>, vector<32x32xbf16>
    %cst_41 = arith.constant dense<0.000000e+00> : vector<128x32xf32>
    %121 = tpu.matmul %119, %120, %cst_41 {dimension_numbers = #tpu.dot_dimension_numbers<[1], [0], [0], [1], [0, 0, 1, 1], [], []>} : vector<128x32xbf16>, vector<32x32xbf16>, vector<128x32xf32> -> vector<128x32xf32>
    %c0_42 = arith.constant 0 : index
    %c0_43 = arith.constant 0 : index
    %122 = vector.load %arg9[%c0_42, %c0_43] : memref<1x32xf32, #tpu.memory_space<vmem>>, vector<1x32xf32>
    %123 = vector.broadcast %122 : vector<1x32xf32> to vector<128x32xf32>
    %124 = arith.addf %121, %123 : vector<128x32xf32>
    %125 = vector.shape_cast %124 : vector<128x32xf32> to vector<2x64x32xf32>
    %126 = arith.addf %125, %0 : vector<2x64x32xf32>
    %c0_44 = arith.constant 0 : index
    %c0_45 = arith.constant 0 : index
    %c0_46 = arith.constant 0 : index
    %127 = vector.load %arg10[%c0_44, %c0_45, %c0_46] : memref<2x64x32xf32, #tpu.memory_space<vmem>>, vector<2x64x32xf32>
    tpu.vector_store %arg10[%c0_44, %c0_45, %c0_46], %126 {strides = array<i32>} : memref<2x64x32xf32, #tpu.memory_space<vmem>>, vector<2x64x32xf32>,
    return
  }
  func.func @transform_0(%arg0: i32) -> (i32, i32, i32) {
    %c0_i32 = arith.constant 0 : i32
    %c0_i32_0 = arith.constant 0 : i32
    %c0_i32_1 = arith.constant 0 : i32
    return %arg0, %c0_i32, %c0_i32_0 : i32, i32, i32
  }
  func.func @transform_1(%arg0: i32) -> (i32, i32) {
    %c0_i32 = arith.constant 0 : i32
    %c0_i32_0 = arith.constant 0 : i32
    %c0_i32_1 = arith.constant 0 : i32
    return %c0_i32, %c0_i32_0 : i32, i32
  }
  func.func @transform_2(%arg0: i32) -> (i32, i32) {
    %c0_i32 = arith.constant 0 : i32
    %c0_i32_0 = arith.constant 0 : i32
    %c0_i32_1 = arith.constant 0 : i32
    return %c0_i32, %c0_i32_0 : i32, i32
  }
  func.func @transform_3(%arg0: i32) -> (i32, i32) {
    %c0_i32 = arith.constant 0 : i32
    %c0_i32_0 = arith.constant 0 : i32
    %c0_i32_1 = arith.constant 0 : i32
    return %c0_i32, %c0_i32_0 : i32, i32
  }
  func.func @transform_4(%arg0: i32) -> (i32, i32) {
    %c0_i32 = arith.constant 0 : i32
    %c0_i32_0 = arith.constant 0 : i32
    %c0_i32_1 = arith.constant 0 : i32
    return %c0_i32, %c0_i32_0 : i32, i32
  }
  func.func @transform_5(%arg0: i32) -> (i32, i32) {
    %c0_i32 = arith.constant 0 : i32
    %c0_i32_0 = arith.constant 0 : i32
    %c0_i32_1 = arith.constant 0 : i32
    return %c0_i32, %c0_i32_0 : i32, i32
  }
  func.func @transform_6(%arg0: i32) -> (i32, i32) {
    %c0_i32 = arith.constant 0 : i32
    %c0_i32_0 = arith.constant 0 : i32
    %c0_i32_1 = arith.constant 0 : i32
    return %c0_i32, %c0_i32_0 : i32, i32
  }
  func.func @transform_7(%arg0: i32) -> (i32, i32) {
    %c0_i32 = arith.constant 0 : i32
    %c0_i32_0 = arith.constant 0 : i32
    %c0_i32_1 = arith.constant 0 : i32
    return %c0_i32, %c0_i32_0 : i32, i32
  }
  func.func @transform_8(%arg0: i32) -> (i32, i32) {
    %c0_i32 = arith.constant 0 : i32
    %c0_i32_0 = arith.constant 0 : i32
    %c0_i32_1 = arith.constant 0 : i32
    return %c0_i32, %c0_i32_0 : i32, i32
  }
  func.func @transform_9(%arg0: i32) -> (i32, i32, i32) {
    %c0_i32 = arith.constant 0 : i32
    %c0_i32_0 = arith.constant 0 : i32
    %c0_i32_1 = arith.constant 0 : i32
    return %arg0, %c0_i32, %c0_i32_0 : i32, i32, i32
  }
}

</mosaic_0001>

<bundles_post_ra>
// kernel: tpu_custom_call.1
= control target key start
LH: loop header
LB: loop body
LE: loop exit
PB: predicated region body
PF: predicated region fallthrough
CT: control target
= control target key end

     0   :  { %vm54_vm0 = vcmask 261120   ;;  %v4521_v0 = vmov 0.0   ;;  %vm4522_vm1 = vmmov 0   ;;  %vm99_vm2 = vcmask 1041409   ;;  %s4526_s14 = smov 88   ;;  %s4527_s15 = smov 120   ;;  %s6305_s3 = inlined_call_operand.vmem [shape: f32[32,8], index: 3, kind: input, shape index: {}]   ;;  %s6306_s0 = inlined_call_operand.vmem [shape: f32[2,64,32], index: 0, kind: input, shape index: {}]   ;;  %s6307_s4 = inlined_call_operand.vmem [shape: f32[8,32], index: 4, kind: input, shape index: {}]   ;;  %s6308_s5 = inlined_call_operand.vmem [shape: bf16[32,96], index: 5, kind: input, shape index: {}]   ;;  %s6309_s1 = inlined_call_operand.vmem [shape: f32[1,32], index: 1, kind: input, shape index: {}]   ;;  %s6310_s2 = inlined_call_operand.vmem [shape: f32[1,32], index: 2, kind: input, shape index: {}]   ;;  %s6311_s6 = inlined_call_operand.vmem [shape: f32[1,96], index: 6, kind: input, shape index: {}]   ;;  %s6312_s7 = inlined_call_operand.vmem [shape: bf16[32,32], index: 7, kind: input, shape index: {}]   ;;  %s6313_s8 = inlined_call_operand.vmem [shape: f32[1,32], index: 8, kind: input, shape index: {}]   ;;  %s6314_s9 = inlined_call_operand.vmem [shape: f32[2,64,32], index: 9, kind: output, shape index: {}]  }
   0x1   :  { %3746 = vmatprep.subr.mxu1 %v4521_v0  ;;  %v4592_v1 = vld [vmem:[%s6305_s3 + $0x18] sm:$0xff]  ;;  %v4597_v2 = vld [vmem:[%s6305_s3 + $0x10] sm:$0xff]  ;;  %3754 = vmatprep.mubr.msk.f32.mxu1 %vm4522_vm1, %v4521_v0  ;;  %v4605_v3 = vld [vmem:[%s6306_s0] sm:$0xff]  ;;  %vm174_vm3 = vcmask 64512   ;;  %vm983_vm4 = vcmask 523264   ;;  %s4528_s16 = smov 56  }
   0x2   :  { %3747 = vmatpush3.msra.mxu1 %v4592_v1  ;;  %v4610_v4 = vld [vmem:[%s6306_s0 + $0x8] sm:$0xff]  ;;  %v4621_v6 = vld [vmem:[%s6306_s0 + $0x10] sm:$0xff]  ;;  %v4626_v7 = vld [vmem:[%s6306_s0 + $0x18] sm:$0xff]  ;;  %v55_v8 = vsel %vm54_vm0, %v4605_v3, 0.0  ;;  %s4529_s17 = smov 80   ;;  %s4530_s18 = smov 112  }
   0x3   :  { %3748 = vmatprep.subr.mxu1 %v4521_v0  ;;  %v4616_v5 = vld [vmem:[%s6305_s3 + $0x8] sm:$0xff]  ;;  %v56_v9 = vsel %vm54_vm0, %v4610_v4, 0.0  ;;  %v4636_v10 = vld [vmem:[%s6305_s3] sm:$0xff]  ;;  %v58_v13 = vsel %vm54_vm0, %v4621_v6, 0.0  ;;  %v4659_v16 = vld [vmem:[%s6306_s0 + $0x50] sm:$0xff]  ;;  %v60_v17 = vsel %vm54_vm0, %v4626_v7, 0.0 }
   0x4   :  { %3749 = vmatpush3.msra.mxu1 %v4597_v2  ;;  %v4641_v11 = vld [vmem:[%s6306_s0 + $0x20] sm:$0xff]  ;;  %v57_v12 = vadd.f32 %v56_v9, %v55_v8  ;;  %v4654_v15 = vld [vmem:[%s6306_s0 + $0x48] sm:$0xff]  ;;  %v4672_v19 = vld [vmem:[%s6306_s0 + $0x58] sm:$0xff]  ;;  %v79_v23 = vsel %vm54_vm0, %v4659_v16, 0.0  ;;  %s4531_s19 = smov 48   ;;  %s4532_s20 = smov 72  }
   0x5   :  { %3750 = vmatprep.subr.mxu1 %v4521_v0  ;;  %v4649_v14 = vld [vmem:[%s6306_s0 + $0x40] sm:$0xff]  ;;  %v4667_v18 = vld [vmem:[%s6306_s0 + $0x28] sm:$0xff]  ;;  %v77_v22 = vsel %vm54_vm0, %v4654_v15, 0.0  ;;  %v62_v25 = vsel %vm54_vm0, %v4641_v11, 0.0  ;;  %v4692_v27 = vld [vmem:[%s6306_s0 + $0x30] sm:$0xff]  ;;  %v81_v29 = vsel %vm54_vm0, %v4672_v19, 0.0 }
   0x6   :  { %3751 = vmatpush3.msra.mxu1 %v4616_v5  ;;  %v59_v20 = vadd.f32 %v58_v13, %v57_v12  ;;  %v76_v21 = vsel %vm54_vm0, %v4649_v14, 0.0  ;;  %v4684_v24 = vld [vmem:[%s6306_s0 + $0x60] sm:$0xff]  ;;  %v4699_v30 = vld [vmem:[%s6306_s0 + $0x68] sm:$0xff]  ;;  %v64_v31 = vsel %vm54_vm0, %v4667_v18, 0.0  ;;  %v4707_v33 = vld [vmem:[%s6306_s0 + $0x38] sm:$0xff]  ;;  %v66_v37 = vsel %vm54_vm0, %v4692_v27, 0.0 }
   0x7   :  { %3752 = vmatprep.subr.mxu1 %v4521_v0  ;;  %v78_v26 = vadd.f32 %v77_v22, %v76_v21  ;;  %v83_v35 = vsel %vm54_vm0, %v4684_v24, 0.0  ;;  %v4714_v36 = vld [vmem:[%s6306_s0 + $0x70] sm:$0xff]  ;;  %v85_v40 = vsel %vm54_vm0, %v4699_v30, 0.0  ;;  %v4723_v41 = vld [vmem:[%s6306_s0 + $0x78] sm:$0xff]  ;;  %v68_v42 = vsel %vm54_vm0, %v4707_v33, 0.0  ;;  %v4734_v63 = vld [vmem:[%s6307_s4] sm:$0xff] }
   0x8   :  { %3753 = vmatpush3.msra.mxu1 %v4636_v10  ;;  %v61_v28 = vadd.f32 %v60_v17, %v59_v20  ;;  %v87_v45 = vsel %vm54_vm0, %v4714_v36, 0.0  ;;  %v89_v48 = vsel %vm54_vm0, %v4723_v41, 0.0  ;;  %v4523_v17 = vmov 1966171168   ;;  %s4533_s21 = smov 104   ;;  %s4534_s22 = smov 40  }
   0x9   :  { %v80_v32 = vadd.f32 %v79_v23, %v78_v26  ;;  %3757 = vmatprep.subr.mxu1 %v4521_v0  ;;  %v250_v20 = vunpack.c.l.s4 %v4523_v17  ;;  %s4535_s23 = smov 8   ;;  %s4536_s24 = smov 16   ;;  %vm3270_vm5 = vcmask 130048   ;;  %vm3287_vm6 = vcmask 195584  }
   0xa   :  { %v63_v34 = vadd.f32 %v62_v25, %v61_v28  ;;  %s4537_s4 = smov 24  }
   0xb   :  { %v82_v38 = vadd.f32 %v81_v29, %v80_v32  ;;  %v251_v21 = vunpack.c.0.s8 %v250_v20 }
   0xc   :  { %v65_v39 = vadd.f32 %v64_v31, %v63_v34 }
   0xd   :  { %v84_v43 = vadd.f32 %v83_v35, %v82_v38 }
   0xe   :  { %v67_v44 = vadd.f32 %v66_v37, %v65_v39 }
   0xf   :  { %v86_v46 = vadd.f32 %v85_v40, %v84_v43 }
  0x10   :  { %v69_v47 = vadd.f32 %v68_v42, %v67_v44 }
  0x11   :  { %v88_v49 = vadd.f32 %v87_v45, %v86_v46 }
  0x12   :  { %v70_v50 = vrot.slane %v69_v47, 4 }
  0x13   :  { %v90_v51 = vadd.f32 %v89_v48, %v88_v49 }
  0x14   :  { %v71_v52 = vadd.f32 %v70_v50, %v69_v47 }
  0x15   :  { %v91_v53 = vrot.slane %v90_v51, 4 }
  0x16   :  { %v72_v54 = vrot.slane %v71_v52, 2 }
  0x17   :  { %v92_v55 = vadd.f32 %v91_v53, %v90_v51 }
  0x18   :  { %v73_v56 = vadd.f32 %v72_v54, %v71_v52 }
  0x19   :  { %v93_v57 = vrot.slane %v92_v55, 2 }
  0x1a   :  { %v74_v58 = vrot.slane %v73_v56, 1 }
  0x1b   :  { %v94_v59 = vadd.f32 %v93_v57, %v92_v55 }
  0x1c   :  { %v75_v60 = vadd.f32 %v74_v58, %v73_v56 }
  0x1d   :  { %v95_v61 = vrot.slane %v94_v59, 1 }
  0x1f   :  { %v96_v62 = vadd.f32 %v95_v61, %v94_v59 }
  0x21   :  { %v100_v8 = vsel %vm99_vm2, %v96_v62, %v75_v60 }
  0x22   :  { %3755 = vmatmul.mubr.msk.f32.vlgmr.msra.gmra.mxu1 %vm54_vm0, %v100_v8 }
  0x23   :  { %3758 = vmatpush3.msra.mxu1 %v4734_v63  ;;  %3759 = vmatprep.mubr.msk.f32.mxu1 %vm4522_vm1, %v4521_v0 }
  0x24   :  { %3762 = vmatprep.subr.mxu1 %v4521_v0 }
  0xe2   :  { %v169_v9 = vpop.f32.mrf.mxu1 }
  0xe3   :  { %v173_v12 = vmul.f32 0.00390625, %v169_v9 }
  0xe4   :  { %v3756_v13 = vpop.f32.mrf.mxu1 }
  0xe5   :  { %3760 = vmatmul.mubr.msk.f32.vlgmr.msra.gmra.mxu1 %vm174_vm3, %v173_v12 }
  0xe6   :  { %3763 = vmatpush3.msra.mxu1 %v4592_v1  ;;  %3770 = vmatprep.mubr.msk.f32.mxu1 %vm4522_vm1, %v4521_v0  ;;  %v252_v1 = vlaneseq }
  0xe7   :  { %3764 = vmatprep.subr.mxu1 %v4521_v0 }
  0xe8   :  { %3765 = vmatpush3.msra.mxu1 %v4597_v2  ;;  %v253_v22 = vshrl.u32 %v252_v1, 7 }
  0xe9   :  { %3766 = vmatprep.subr.mxu1 %v4521_v0 }
  0xea   :  { %3767 = vmatpush3.msra.mxu1 %v4616_v5  ;;  %v4753_v23 = vsub.s32 %v251_v21, %v253_v22  ;;  %v4759_v26 = vsub.s32 0, %v253_v22 }
  0xeb   :  { %3768 = vmatprep.subr.mxu1 %v4521_v0 }
  0xec   :  { %3769 = vmatpush3.msra.mxu1 %v4636_v10 }
  0xed   :  { %3773 = vmatprep.subr.mxu1 %v4521_v0 }
 0x1a5   :  { %v4755_v25 = vpop.f32.mrf.mxu1 }
 0x1a6   :  { %v255_v2 = vrot.slane %v4755_v25, %v4753_v23 }
 0x1a7   :  { %v3761_v5 = vpop.f32.mrf.mxu1 }
 0x1a8   :  { %v256_v28 = vcombine.high %v255_v2, %v255_v2  ;;  %v263_v10 = vrot.slane %v255_v2, %v4753_v23 }
 0x1aa   :  { %v270_v29 = vrot.slane %v256_v28, %v4753_v23  ;;  %v274_v31 = vrot.slane %v263_v10, %v4759_v26 }
 0x1ac   :  { %v278_v32 = vrot.slane %v270_v29, %v4759_v26  ;;  %v281_v34 = vsub.f32 %v4605_v3, %v274_v31  ;;  %v282_v35 = vsub.f32 %v4610_v4, %v274_v31  ;;  %v283_v37 = vsub.f32 %v4621_v6, %v274_v31 }
 0x1ad   :  { %v284_v40 = vsub.f32 %v4626_v7, %v274_v31  ;;  %v285_v45 = vsub.f32 %v4641_v11, %v274_v31  ;;  %v286_v50 = vsub.f32 %v4667_v18, %v274_v31  ;;  %v287_v56 = vsub.f32 %v4692_v27, %v274_v31 }
 0x1ae   :  { %v289_v38 = vsub.f32 %v4649_v14, %v278_v32  ;;  %v290_v39 = vsub.f32 %v4654_v15, %v278_v32  ;;  %v291_v42 = vsub.f32 %v4659_v16, %v278_v32  ;;  %v297_v43 = vmul.f32 %v281_v34, %v281_v34 }
 0x1af   :  { %v298_v44 = vmul.f32 %v282_v35, %v282_v35  ;;  %v292_v46 = vsub.f32 %v4672_v19, %v278_v32  ;;  %v299_v47 = vmul.f32 %v283_v37, %v283_v37  ;;  %v293_v51 = vsub.f32 %v4684_v24, %v278_v32 }
 0x1b0   :  { %v305_v48 = vmul.f32 %v289_v38, %v289_v38  ;;  %v306_v49 = vmul.f32 %v290_v39, %v290_v39  ;;  %v300_v52 = vmul.f32 %v284_v40, %v284_v40  ;;  %v307_v53 = vmul.f32 %v291_v42, %v291_v42 }
 0x1b1   :  { %v313_v54 = vsel %vm54_vm0, %v297_v43, 0.0  ;;  %v314_v55 = vsel %vm54_vm0, %v298_v44, 0.0  ;;  %v294_v57 = vsub.f32 %v4699_v30, %v278_v32  ;;  %v301_v58 = vmul.f32 %v285_v45, %v285_v45 }
 0x1b2   :  { %v315_v59 = vadd.f32 %v314_v55, %v313_v54  ;;  %v308_v60 = vmul.f32 %v292_v46, %v292_v46  ;;  %v316_v61 = vsel %vm54_vm0, %v299_v47, 0.0  ;;  %v334_v62 = vsel %vm54_vm0, %v305_v48, 0.0 }
 0x1b3   :  { %v335_v8 = vsel %vm54_vm0, %v306_v49, 0.0  ;;  %v288_v9 = vsub.f32 %v4707_v33, %v274_v31  ;;  %v295_v12 = vsub.f32 %v4714_v36, %v278_v32  ;;  %v302_v20 = vmul.f32 %v286_v50, %v286_v50 }
 0x1b4   :  { %v317_v13 = vadd.f32 %v316_v61, %v315_v59  ;;  %v336_v17 = vadd.f32 %v335_v8, %v334_v62  ;;  %v309_v1 = vmul.f32 %v293_v51, %v293_v51  ;;  %v318_v21 = vsel %vm54_vm0, %v300_v52, 0.0 }
 0x1b5   :  { %v337_v22 = vsel %vm54_vm0, %v307_v53, 0.0  ;;  %v296_v2 = vsub.f32 %v4723_v41, %v278_v32  ;;  %v303_v10 = vmul.f32 %v287_v56, %v287_v56  ;;  %v310_v29 = vmul.f32 %v294_v57, %v294_v57 }
 0x1b6   :  { %v319_v5 = vadd.f32 %v318_v21, %v317_v13  ;;  %v338_v28 = vadd.f32 %v337_v22, %v336_v17  ;;  %v320_v34 = vsel %vm54_vm0, %v301_v58, 0.0  ;;  %v339_v31 = vsel %vm54_vm0, %v308_v60, 0.0 }
 0x1b7   :  { %v304_v38 = vmul.f32 %v288_v9, %v288_v9  ;;  %v311_v39 = vmul.f32 %v295_v12, %v295_v12  ;;  %v322_v40 = vsel %vm54_vm0, %v302_v20, 0.0  ;;  %v341_v42 = vsel %vm54_vm0, %v309_v1, 0.0 }
 0x1b8   :  { %v321_v35 = vadd.f32 %v320_v34, %v319_v5  ;;  %v340_v37 = vadd.f32 %v339_v31, %v338_v28  ;;  %v312_v45 = vmul.f32 %v296_v2, %v296_v2  ;;  %v324_v32 = vsel %vm54_vm0, %v303_v10, 0.0  ;;  %v4243_v5 = vld [vmem:[%s6308_s5 + $0x8] sm:$0xff]  }
 0x1b9   :  { %v343_v46 = vsel %vm54_vm0, %v310_v29, 0.0  ;;  %v326_v49 = vsel %vm54_vm0, %v304_v38, 0.0  ;;  %v345_v50 = vsel %vm54_vm0, %v311_v39, 0.0  ;;  %v3497_v29 = vld [vmem:[%s6310_s2] ss:$0 sm:$0xff] }
 0x1ba   :  { %v323_v43 = vadd.f32 %v322_v40, %v321_v35  ;;  %v342_v44 = vadd.f32 %v341_v42, %v340_v37  ;;  %v347_v53 = vsel %vm54_vm0, %v312_v45, 0.0 }
 0x1bc   :  { %v325_v47 = vadd.f32 %v324_v32, %v323_v43  ;;  %v344_v48 = vadd.f32 %v343_v46, %v342_v44 }
 0x1be   :  { %v327_v51 = vadd.f32 %v326_v49, %v325_v47  ;;  %v346_v52 = vadd.f32 %v345_v50, %v344_v48 }
 0x1c0   :  { %v328_v54 = vrot.slane %v327_v51, 4  ;;  %v348_v55 = vadd.f32 %v347_v53, %v346_v52 }
 0x1c2   :  { %v329_v56 = vadd.f32 %v328_v54, %v327_v51  ;;  %v349_v57 = vrot.slane %v348_v55, 4 }
 0x1c4   :  { %v330_v58 = vrot.slane %v329_v56, 2  ;;  %v350_v59 = vadd.f32 %v349_v57, %v348_v55 }
 0x1c6   :  { %v331_v60 = vadd.f32 %v330_v58, %v329_v56  ;;  %v351_v61 = vrot.slane %v350_v59, 2 }
 0x1c8   :  { %v332_v62 = vrot.slane %v331_v60, 1  ;;  %v352_v8 = vadd.f32 %v351_v61, %v350_v59 }
 0x1ca   :  { %v353_v9 = vrot.slane %v352_v8, 1  ;;  %v333_v12 = vadd.f32 %v332_v62, %v331_v60 }
 0x1cc   :  { %v354_v13 = vadd.f32 %v353_v9, %v352_v8 }
 0x1ce   :  { %v357_v17 = vsel %vm99_vm2, %v354_v13, %v333_v12 }
 0x1cf   :  { %3771 = vmatmul.mubr.msk.f32.vlgmr.msra.gmra.mxu1 %vm54_vm0, %v357_v17 }
 0x1d0   :  { %3774 = vmatpush3.msra.mxu1 %v4734_v63  ;;  %3775 = vmatprep.mubr.msk.f32.mxu1 %vm4522_vm1, %v4521_v0  ;;  %v4244_v63 = vld [vmem:[%s6308_s5] sm:$0xff]   ;;  %s4524_s5 = smov 96  }
 0x1d1   :  { %3778 = vmatprep.subr.bf16.mxu1 %v4243_v5  ;;  %v3496_v0 = vld [vmem:[%s6309_s1] ss:$0 sm:$0xff] }
 0x28f   :  { %v426_v20 = vpop.f32.mrf.mxu1 }
 0x290   :  { %v430_v1 = vmul.f32 0.00390625, %v426_v20 }
 0x291   :  { %v3772_v21 = vpop.f32.mrf.mxu1 }
 0x292   :  { %v431_v22 = vadd.f32 1e-05, %v430_v1 }
 0x294   :  { %4247 = vrsqrt.f32 %v431_v22 }
 0x2a1   :  { %v4248_v2 = vpop.eup %4247 }
 0x2a2   :  { %3776 = vmatmul.mubr.msk.f32.vlgmr.msra.gmra.mxu1 %vm174_vm3, %v4248_v2 }
 0x2a3   :  { %3779 = vmatpush3.bf16.msra.mxu1 %v4243_v5 }
 0x2a4   :  { %3780 = vmatprep.subr.bf16.mxu1 %v4244_v63 }
 0x2a7   :  { %3781 = vmatpush3.bf16.msra.mxu1 %v4244_v63 }
 0x362   :  { %v502_v28 = vpop.f32.mrf.mxu1 }
 0x363   :  { %v513_v10 = vmul.f32 %v3496_v0, %v502_v28 }
 0x364   :  { %v3777_v34 = vpop.f32.mrf.mxu1 }
 0x365   :  { %v515_v31 = vmul.f32 %v513_v10, %v4755_v25  ;;  %v530_v35 = vrot.slane %v513_v10, %v4753_v23 }
 0x367   :  { %v522_v37 = vsub.f32 %v3497_v29, %v515_v31  ;;  %v538_v38 = vrot.slane %v530_v35, %v4753_v23  ;;  %v531_v39 = vcombine.high %v530_v35, %v530_v35 }
 0x369   :  { %v549_v40 = vrot.slane %v538_v38, %v4759_v26  ;;  %v579_v42 = vrot.slane %v522_v37, %v4753_v23  ;;  %v545_v45 = vrot.slane %v531_v39, %v4753_v23 }
 0x36b   :  { %v580_v43 = vcombine.high %v579_v42, %v579_v42  ;;  %v587_v44 = vrot.slane %v579_v42, %v4753_v23  ;;  %v556_v46 = vmul.f32 %v549_v40, %v4605_v3  ;;  %v557_v25 = vmul.f32 %v549_v40, %v4610_v4 }
 0x36c   :  { %v558_v47 = vmul.f32 %v549_v40, %v4621_v6  ;;  %v559_v48 = vmul.f32 %v549_v40, %v4626_v7  ;;  %v560_v49 = vmul.f32 %v549_v40, %v4641_v11  ;;  %v561_v50 = vmul.f32 %v549_v40, %v4667_v18 }
 0x36d   :  { %v598_v32 = vrot.slane %v587_v44, %v4759_v26  ;;  %v594_v51 = vrot.slane %v580_v43, %v4753_v23  ;;  %v553_v3 = vrot.slane %v545_v45, %v4759_v26  ;;  %v562_v11 = vmul.f32 %v549_v40, %v4692_v27 }
 0x36e   :  { %v563_v18 = vmul.f32 %v549_v40, %v4707_v33 }
 0x36f   :  { %v605_v52 = vadd.f32 %v598_v32, %v556_v46  ;;  %v606_v53 = vadd.f32 %v598_v32, %v557_v25  ;;  %v607_v54 = vadd.f32 %v598_v32, %v558_v47  ;;  %v608_v55 = vadd.f32 %v598_v32, %v559_v48 }
 0x370   :  { %v609_v56 = vadd.f32 %v598_v32, %v560_v49  ;;  %v610_v57 = vadd.f32 %v598_v32, %v561_v50  ;;  %v602_v6 = vrot.slane %v594_v51, %v4759_v26  ;;  %v564_v23 = vmul.f32 %v553_v3, %v4649_v14 }
 0x371   :  { %v621_v58 = vpack.c.bf16 %v606_v53, %v605_v52  ;;  %v622_v4 = vpack.c.bf16 %v608_v55, %v607_v54  ;;  %v565_v59 = vmul.f32 %v553_v3, %v4654_v15  ;;  %v611_v60 = vadd.f32 %v598_v32, %v562_v11 }
 0x372   :  { %v623_v7 = vpack.c.bf16 %v610_v57, %v609_v56  ;;  %v612_v61 = vadd.f32 %v598_v32, %v563_v18  ;;  %v613_v62 = vadd.f32 %v602_v6, %v564_v23  ;;  %v566_v12 = vmul.f32 %v553_v3, %v4659_v16 }
 0x373   :  { %3782 = vmatprep.mubr.msk.bf16.mxu1 %vm54_vm0, %v621_v58  ;;  %v614_v8 = vadd.f32 %v602_v6, %v565_v59  ;;  %v567_v27 = vmul.f32 %v553_v3, %v4672_v19  ;;  %v568_v33 = vmul.f32 %v553_v3, %v4684_v24  ;;  %v569_v14 = vmul.f32 %v553_v3, %v4699_v30  ;;  %v3498_v30 = vld [vmem:[%s6311_s6] ss:$0 sm:$0xff]  ;;  %s4525_s6 = smov 64  }
 0x374   :  { %3783 = vmatmul.mubr.msk.bf16.vlgmr.msra.gmra.mxu1 %vm54_vm0, %v622_v4  ;;  %v624_v26 = vpack.c.bf16 %v612_v61, %v611_v60  ;;  %v615_v13 = vadd.f32 %v602_v6, %v566_v12  ;;  %v570_v22 = vmul.f32 %v553_v3, %v4714_v36  ;;  %v571_v16 = vmul.f32 %v553_v3, %v4723_v41 }
 0x375   :  { %3786 = vmatprep.mubr.msk.bf16.mxu1 %vm54_vm0, %v623_v7  ;;  %v625_v9 = vpack.c.bf16 %v614_v8, %v613_v62  ;;  %v616_v15 = vadd.f32 %v602_v6, %v567_v27  ;;  %v617_v17 = vadd.f32 %v602_v6, %v568_v33  ;;  %v618_v20 = vadd.f32 %v602_v6, %v569_v14 }
 0x376   :  { %v619_v19 = vadd.f32 %v602_v6, %v570_v22  ;;  %v620_v2 = vadd.f32 %v602_v6, %v571_v16 }
 0x377   :  { %v626_v1 = vpack.c.bf16 %v616_v15, %v615_v13  ;;  %v627_v21 = vpack.c.bf16 %v618_v20, %v617_v17 }
 0x378   :  { %v628_v5 = vpack.c.bf16 %v620_v2, %v619_v19 }
 0x37c   :  { %3787 = vmatmul.mubr.msk.bf16.gmra.mxu1 %vm54_vm0, %v624_v26 }
 0x37d   :  { %3790 = vmatprep.mubr.msk.bf16.mxu1 %vm54_vm0, %v625_v9 }
 0x384   :  { %3791 = vmatmul.mubr.msk.bf16.gmra.mxu1 %vm54_vm0, %v626_v1 }
 0x385   :  { %3794 = vmatprep.mubr.msk.bf16.mxu1 %vm54_vm0, %v627_v21 }
 0x38c   :  { %3795 = vmatmul.mubr.msk.bf16.gmra.mxu1 %vm54_vm0, %v628_v5 }
 0x434   :  { %v3784_v24 = vpop.f32.mrf.mxu1 }
 0x435   :  { %v719_v28 = vadd.f32 %v3784_v24, %v3498_v30 }
 0x436   :  { %v710_v63 = vpop.f32.mrf.mxu1 }
 0x437   :  { %v711_v36 = vadd.f32 %v3498_v30, %v710_v63 }
 0x438   :  { %v3785_v0 = vpop.f32.mrf.mxu1 }
 0x439   :  { %v722_v10 = vadd.f32 %v3785_v0, %v3498_v30 }
 0x43a   :  { %v713_v29 = vpop.f32.mrf.mxu1 }
 0x43b   :  { %v4853_v34 = vpack.c.bf16 %v722_v10, %v719_v28  ;;  %v714_v41 = vadd.f32 %v3498_v30, %v713_v29 }
 0x43c   :  { %v3788_v31 = vpop.f32.mrf.mxu1 }
 0x43d   :  { %v4855_v35 = vpack.c.bf16 %v714_v41, %v711_v36  ;;  %787 = vrot.lane.b32.xlu1 %v4853_v34, %s4524_s5  ;;  %v735_v39 = vadd.f32 %v3788_v31, %v3498_v30 }
 0x43e   :  { %v726_v37 = vpop.f32.mrf.mxu1 }
 0x43f   :  { %3806 = vmatprep.mubr.msk.bf16.mxu0 %vm174_vm3, %v4855_v35  ;;  %v727_v32 = vadd.f32 %v3498_v30, %v726_v37 }
 0x440   :  { %v3789_v38 = vpop.f32.mrf.mxu1 }
 0x441   :  { %v738_v40 = vadd.f32 %v3789_v38, %v3498_v30 }
 0x442   :  { %v729_v42 = vpop.f32.mrf.mxu1 }
 0x443   :  { %v4861_v43 = vpack.c.bf16 %v738_v40, %v735_v39  ;;  %v730_v44 = vadd.f32 %v3498_v30, %v729_v42 }
 0x444   :  { %v3792_v45 = vpop.f32.mrf.mxu1 }
 0x445   :  { %791 = vrot.lane.b32.xlu0 %v4861_v43, %s4524_s5  ;;  %v4865_v25 = vpack.c.bf16 %v730_v44, %v727_v32  ;;  %v751_v53 = vadd.f32 %v3792_v45, %v3498_v30 }
 0x446   :  { %v742_v46 = vpop.f32.mrf.mxu1 }
 0x447   :  { %v743_v49 = vadd.f32 %v3498_v30, %v742_v46 }
 0x448   :  { %v3793_v47 = vpop.f32.mrf.mxu1 }
 0x449   :  { %789 = vrot.lane.b32.xlu0 %v4865_v25, %s4524_s5  ;;  %v754_v50 = vadd.f32 %v3793_v47, %v3498_v30 }
 0x44a   :  { %v745_v48 = vpop.f32.mrf.mxu1 }
 0x44b   :  { %v746_v51 = vadd.f32 %v3498_v30, %v745_v48  ;;  %v4873_v56 = vpack.c.bf16 %v754_v50, %v751_v53 }
 0x44c   :  { %v3796_v52 = vpop.f32.mrf.mxu1 }
 0x44d   :  { %v4869_v54 = vpack.c.bf16 %v746_v51, %v743_v49  ;;  %785 = vrot.lane.b32.xlu0 %v4855_v35, %s4524_s5  ;;  %v767_v3 = vadd.f32 %v3796_v52, %v3498_v30 }
 0x44e   :  { %v758_v55 = vpop.f32.mrf.mxu1 }
 0x44f   :  { %3822 = vmatprep.mubr.msk.bf16.mxu1 %vm174_vm3, %v4869_v54  ;;  %v759_v11 = vadd.f32 %v3498_v30, %v758_v55 }
 0x450   :  { %v3797_v57 = vpop.f32.mrf.mxu1 }
 0x451   :  { %v770_v58 = vadd.f32 %v3797_v57, %v3498_v30  ;;  %888 = vrot.lane.b32.xlu0 %v4873_v56, %s4524_s5 }
 0x452   :  { %v761_v4 = vpop.f32.mrf.mxu1 }
 0x453   :  { %v4879_v6 = vpack.c.bf16 %v770_v58, %v767_v3  ;;  %v762_v7 = vadd.f32 %v3498_v30, %v761_v4 }
 0x455   :  { %892 = vrot.lane.b32.xlu1 %v4879_v6, %s4524_s5  ;;  %1092 = vrot.lane.b32.xlu0 %v4865_v25, %s4525_s6  ;;  %v4884_v18 = vpack.c.bf16 %v762_v7, %v759_v11 }
 0x459   :  { %890 = vrot.lane.b32.xlu1 %v4884_v18, %s4524_s5  ;;  %1088 = vrot.lane.b32.xlu0 %v4855_v35, %s4525_s6 }
 0x45d   :  { %886 = vrot.lane.b32.xlu1 %v4869_v54, %s4524_s5  ;;  %1179 = vrot.lane.b32.xlu0 %v4873_v56, %s4525_s6 }
 0x461   :  { %1094 = vrot.lane.b32.xlu1 %v4861_v43, %s4525_s6  ;;  %1356 = vrot.lane.b32.xlu0 %v4853_v34, %s4526_s14 }
 0x465   :  { %1090 = vrot.lane.b32.xlu1 %v4853_v34, %s4525_s6  ;;  %1354 = vrot.lane.b32.xlu0 %v4855_v35, %s4526_s14 }
 0x469   :  { %1183 = vrot.lane.b32.xlu1 %v4879_v6, %s4525_s6  ;;  %1181 = vrot.lane.b32.xlu0 %v4884_v18, %s4525_s6 }
 0x46d   :  { %1360 = vrot.lane.b32.xlu1 %v4861_v43, %s4526_s14 }
 0x471   :  { %1358 = vrot.lane.b32.xlu1 %v4865_v25, %s4526_s14 }
 0x475   :  { %1177 = vrot.lane.b32.xlu1 %v4869_v54, %s4525_s6 }
 0x479   :  { %1465 = vrot.lane.b32.xlu1 %v4879_v6, %s4526_s14 }
 0x47d   :  { %1463 = vrot.lane.b32.xlu1 %v4884_v18, %s4526_s14 }
 0x4af   :  { %v788_v8 = vpop.permute.xlu1 %787 }
 0x4b0   :  { %v809_v12 = vsel %vm174_vm3, %v788_v8, 0 }
 0x4b7   :  { %v792_v23 = vpop.permute.xlu0 %791 }
 0x4b8   :  { %4074 = vmatprep.subr.msk.bf16.mxu0 %vm174_vm3, %v792_v23  ;;  %v815_v59 = vsel %vm174_vm3, %v792_v23, 0 }
 0x4b9   :  { %3799 = vmatpush3.bf16.xpose.msra.mxu0 %v815_v59 }
 0x4bb   :  { %v790_v60 = vpop.permute.xlu0 %789 }
 0x4bc   :  { %4075 = vmatprep.subr.msk.bf16.mxu0 %vm174_vm3, %v790_v60  ;;  %v812_v62 = vsel %vm174_vm3, %v790_v60, 0 }
 0x4bf   :  { %v786_v61 = vpop.permute.xlu0 %785 }
 0x4c0   :  { %v806_v15 = vsel %vm174_vm3, %v786_v61, 0 }
 0x4c1   :  { %3801 = vmatpush3.bf16.xpose.msra.mxu0 %v812_v62 }
 0x4c2   :  { %4076 = vmatprep.subr.msk.bf16.mxu0 %vm174_vm3, %v788_v8 }
 0x4c3   :  { %v889_v26 = vpop.permute.xlu0 %888 }
 0x4c4   :  { %v910_v16 = vsel %vm174_vm3, %v889_v26, 0 }
 0x4c7   :  { %v893_v9 = vpop.permute.xlu1 %892  ;;  %v1093_v33 = vpop.permute.xlu0 %1092 }
 0x4c8   :  { %4078 = vmatprep.subr.msk.bf16.mxu1 %vm174_vm3, %v893_v9  ;;  %v916_v27 = vsel %vm174_vm3, %v893_v9, 0 }
 0x4c9   :  { %3803 = vmatpush3.bf16.xpose.msra.mxu0 %v809_v12  ;;  %3815 = vmatpush3.bf16.xpose.msra.mxu1 %v916_v27 }
 0x4ca   :  { %4077 = vmatprep.subr.msk.bf16.mxu0 %vm174_vm3, %v786_v61 }
 0x4cb   :  { %v891_v14 = vpop.permute.xlu1 %890  ;;  %v1089_v20 = vpop.permute.xlu0 %1088 }
 0x4cc   :  { %4079 = vmatprep.subr.msk.bf16.mxu1 %vm174_vm3, %v891_v14  ;;  %v913_v17 = vsel %vm174_vm3, %v891_v14, 0 }
 0x4cf   :  { %v887_v13 = vpop.permute.xlu1 %886  ;;  %v1180_v21 = vpop.permute.xlu0 %1179 }
 0x4d0   :  { %v907_v5 = vsel %vm174_vm3, %v887_v13, 0 }
 0x4d1   :  { %3805 = vmatpush3.bf16.xpose.msra.mxu0 %v806_v15  ;;  %3817 = vmatpush3.bf16.xpose.msra.mxu1 %v913_v17 }
 0x4d2   :  { %4080 = vmatprep.subr.msk.bf16.mxu1 %vm174_vm3, %v889_v26 }
 0x4d3   :  { %v1095_v1 = vpop.permute.xlu1 %1094  ;;  %v4928_v19 = vpop.permute.xlu0 %1356 }
 0x4d4   :  { %3830 = vmatprep.subr.bf16.mxu0 %v1095_v1 }
 0x4d7   :  { %v1091_v22 = vpop.permute.xlu1 %1090  ;;  %v4933_v24 = vpop.permute.xlu0 %1354 }
 0x4d8   :  { %3807 = vmatmul.mubr.msk.bf16.vlgmr.msra.gmra.mxu0 %vm174_vm3, %v4853_v34 }
 0x4d9   :  { %3810 = vmatprep.mubr.msk.bf16.mxu0 %vm174_vm3, %v4865_v25  ;;  %3819 = vmatpush3.bf16.xpose.msra.mxu1 %v910_v16 }
 0x4da   :  { %3831 = vmatpush3.bf16.msra.mxu0 %v1095_v1  ;;  %4081 = vmatprep.subr.msk.bf16.mxu1 %vm174_vm3, %v887_v13 }
 0x4db   :  { %3832 = vmatprep.subr.bf16.mxu0 %v1093_v33  ;;  %v1184_v2 = vpop.permute.xlu1 %1183  ;;  %v1182_v63 = vpop.permute.xlu0 %1181 }
 0x4de   :  { %3833 = vmatpush3.bf16.msra.mxu0 %v1093_v33 }
 0x4df   :  { %3834 = vmatprep.subr.bf16.mxu0 %v1091_v22  ;;  %v4935_v30 = vpop.permute.xlu1 %1360 }
 0x4e0   :  { %3811 = vmatmul.mubr.msk.bf16.gmra.mxu0 %vm174_vm3, %v4861_v43 }
 0x4e1   :  { %3821 = vmatpush3.bf16.xpose.msra.mxu1 %v907_v5 }
 0x4e2   :  { %3835 = vmatpush3.bf16.msra.mxu0 %v1091_v22  ;;  %3846 = vmatprep.subr.bf16.mxu1 %v1184_v2 }
 0x4e3   :  { %3836 = vmatprep.subr.bf16.mxu0 %v1089_v20  ;;  %v4941_v0 = vpop.permute.xlu1 %1358 }
 0x4e6   :  { %3837 = vmatpush3.bf16.msra.mxu0 %v1089_v20 }
 0x4e7   :  { %4082 = vmatprep.subr.msk.bf16.mxu0 %vm174_vm3, %v4935_v30  ;;  %v1178_v28 = vpop.permute.xlu1 %1177 }
 0x4e8   :  { %3823 = vmatmul.mubr.msk.bf16.vlgmr.msra.gmra.mxu1 %vm174_vm3, %v4873_v56 }
 0x4e9   :  { %3826 = vmatprep.mubr.msk.bf16.mxu1 %vm174_vm3, %v4884_v18  ;;  %3847 = vmatpush3.bf16.msra.mxu1 %v1184_v2 }
 0x4ea   :  { %3848 = vmatprep.subr.bf16.mxu1 %v1182_v63 }
 0x4eb   :  { %v4947_v10 = vpop.permute.xlu1 %1465 }
 0x4ed   :  { %3849 = vmatpush3.bf16.msra.mxu1 %v1182_v63 }
 0x4ee   :  { %3850 = vmatprep.subr.bf16.mxu1 %v1180_v21 }
 0x4ef   :  { %v5043_v26 = vpop.permute.xlu1 %1463 }
 0x4f0   :  { %3827 = vmatmul.mubr.msk.bf16.gmra.mxu1 %vm174_vm3, %v4879_v6 }
 0x4f1   :  { %3851 = vmatpush3.bf16.msra.mxu1 %v1180_v21 }
 0x4f2   :  { %3852 = vmatprep.subr.bf16.mxu1 %v1178_v28 }
 0x4f5   :  { %3853 = vmatpush3.bf16.msra.mxu1 %v1178_v28 }
 0x4f6   :  { %4086 = vmatprep.subr.msk.bf16.mxu1 %vm174_vm3, %v4947_v10 }
 0x598   :  { %v4951_v29 = vpop.f32.mrf.mxu0 }
 0x599   :  { %v990_v36 = vsel %vm983_vm4, %v4951_v29, -inf }
 0x59a   :  { %991 = vmax.xlane.f32.xlu0 %v990_v36  ;;  %v4955_v41 = vpop.f32.mrf.mxu0 }
 0x59b   :  { %v984_v37 = vsel %vm983_vm4, %v4955_v41, -inf }
 0x59c   :  { %v4957_v31 = vpop.f32.mrf.mxu0 }
 0x59d   :  { %v993_v42 = vsel %vm983_vm4, %v4957_v31, -inf }
 0x59e   :  { %985 = vmax.xlane.f32.xlu0 %v984_v37  ;;  %v4961_v38 = vpop.f32.mrf.mxu0 }
 0x59f   :  { %v987_v39 = vsel %vm983_vm4, %v4961_v38, -inf }
 0x5a0   :  { %988 = vmax.xlane.f32.xlu1 %v987_v39  ;;  %v4965_v40 = vpop.f32.mrf.mxu0 }
 0x5a1   :  { %v1002_v45 = vsel %vm983_vm4, %v4965_v40, -inf }
 0x5a2   :  { %994 = vmax.xlane.f32.xlu0 %v993_v42  ;;  %v4969_v44 = vpop.f32.mrf.mxu0 }
 0x5a3   :  { %v996_v47 = vsel %vm983_vm4, %v4969_v44, -inf }
 0x5a4   :  { %1003 = vmax.xlane.f32.xlu1 %v1002_v45  ;;  %v4973_v32 = vpop.f32.mrf.mxu0 }
 0x5a5   :  { %v1005_v51 = vsel %vm983_vm4, %v4973_v32, -inf }
 0x5a6   :  { %v4975_v46 = vpop.f32.mrf.mxu0 }
 0x5a7   :  { %v999_v48 = vsel %vm983_vm4, %v4975_v46, -inf }
 0x5a8   :  { %v4981_v49 = vpop.f32.mrf.mxu1  ;;  %997 = vmax.xlane.f32.xlu1 %v996_v47  ;;  %1000 = vmax.xlane.f32.xlu0 %v999_v48 }
 0x5a9   :  { %v1014_v52 = vsel %vm983_vm4, %v4981_v49, -inf }
 0x5aa   :  { %v4983_v50 = vpop.f32.mrf.mxu1 }
 0x5ab   :  { %v1008_v55 = vsel %vm983_vm4, %v4983_v50, -inf }
 0x5ac   :  { %v4989_v53 = vpop.f32.mrf.mxu1  ;;  %1006 = vmax.xlane.f32.xlu1 %v1005_v51  ;;  %1015 = vmax.xlane.f32.xlu0 %v1014_v52 }
 0x5ad   :  { %v1017_v57 = vsel %vm983_vm4, %v4989_v53, -inf }
 0x5ae   :  { %v4995_v3 = vpop.f32.mrf.mxu1 }
 0x5af   :  { %v1011_v58 = vsel %vm983_vm4, %v4995_v3, -inf }
 0x5b0   :  { %1009 = vmax.xlane.f32.xlu1 %v1008_v55  ;;  %1018 = vmax.xlane.f32.xlu0 %v1017_v57  ;;  %v5001_v4 = vpop.f32.mrf.mxu1 }
 0x5b1   :  { %v1026_v60 = vsel %vm983_vm4, %v5001_v4, -inf }
 0x5b2   :  { %v5003_v7 = vpop.f32.mrf.mxu1 }
 0x5b3   :  { %v1020_v11 = vsel %vm983_vm4, %v5003_v7, -inf }
 0x5b4   :  { %1012 = vmax.xlane.f32.xlu0 %v1011_v58  ;;  %v5007_v23 = vpop.f32.mrf.mxu1 }
 0x5b5   :  { %v1029_v59 = vsel %vm983_vm4, %v5007_v23, -inf }
 0x5b6   :  { %v5013_v61 = vpop.f32.mrf.mxu1 }
 0x5b7   :  { %v1023_v62 = vsel %vm983_vm4, %v5013_v61, -inf }
 0x5c1   :  { %1348 = vrot.lane.b32.xlu1 %v4853_v34, %s4527_s15 }
 0x5ca   :  { %1346 = vrot.lane.b32.xlu0 %v4855_v35, %s4527_s15 }
 0x5e5   :  { %1021 = vmax.xlane.f32.xlu1 %v1020_v11 }
 0x5e9   :  { %1030 = vmax.xlane.f32.xlu1 %v1029_v59  ;;  %1027 = vmax.xlane.f32.xlu0 %v1026_v60  ;;  %v1384_v59 = vsel %vm174_vm3, %v4935_v30, 0  ;;  %v1381_v30 = vsel %vm174_vm3, %v4941_v0, 0 }
 0x5ed   :  { %1024 = vmax.xlane.f32.xlu0 %v1023_v62 }
 0x5fa   :  { %1459 = vrot.lane.b32.xlu1 %v4869_v54, %s4526_s14 }
 0x5fe   :  { %1453 = vrot.lane.b32.xlu1 %v4873_v56, %s4527_s15 }
 0x602   :  { %1352 = vrot.lane.b32.xlu1 %v4861_v43, %s4527_s15 }
 0x603   :  { %1461 = vrot.lane.b32.xlu0 %v4873_v56, %s4526_s14 }
 0x606   :  { %1457 = vrot.lane.b32.xlu1 %v4879_v6, %s4527_s15 }
 0x607   :  { %1451 = vrot.lane.b32.xlu0 %v4869_v54, %s4527_s15 }
 0x60a   :  { %1666 = vrot.lane.b32.xlu1 %v4861_v43, %s4528_s16 }
 0x60b   :  { %1350 = vrot.lane.b32.xlu0 %v4865_v25, %s4527_s15 }
 0x60e   :  { %1662 = vrot.lane.b32.xlu1 %v4853_v34, %s4528_s16 }
 0x60f   :  { %1455 = vrot.lane.b32.xlu0 %v4884_v18, %s4527_s15 }
 0x612   :  { %1755 = vrot.lane.b32.xlu1 %v4879_v6, %s4528_s16 }
 0x613   :  { %1664 = vrot.lane.b32.xlu0 %v4865_v25, %s4528_s16 }
 0x616   :  { %1932 = vrot.lane.b32.xlu1 %v4861_v43, %s4529_s17 }
 0x617   :  { %1660 = vrot.lane.b32.xlu0 %v4855_v35, %s4528_s16 }
 0x61a   :  { %1930 = vrot.lane.b32.xlu1 %v4865_v25, %s4529_s17 }
 0x61b   :  { %1753 = vrot.lane.b32.xlu0 %v4884_v18, %s4528_s16 }
 0x61e   :  { %1749 = vrot.lane.b32.xlu1 %v4869_v54, %s4528_s16 }
 0x61f   :  { %1751 = vrot.lane.b32.xlu0 %v4873_v56, %s4528_s16 }
 0x622   :  { %2037 = vrot.lane.b32.xlu1 %v4879_v6, %s4529_s17 }
 0x623   :  { %v992_v8 = vpop.xlane.xlu0 %991  ;;  %1928 = vrot.lane.b32.xlu0 %v4853_v34, %s4529_s17 }
 0x624   :  { %v1034_v9 = vsub.f32 %v4951_v29, %v992_v8 }
 0x626   :  { %2035 = vrot.lane.b32.xlu1 %v4884_v18, %s4529_s17  ;;  %v1052_v15 = vmul.f32 1.442695, %v1034_v9 }
 0x627   :  { %v986_v12 = vpop.xlane.xlu0 %985  ;;  %1926 = vrot.lane.b32.xlu0 %v4855_v35, %s4529_s17 }
 0x628   :  { %v1032_v27 = vsub.f32 %v4955_v41, %v986_v12 }
 0x629   :  { %v989_v33 = vpop.xlane.xlu1 %988 }
 0x62a   :  { %v1048_v14 = vmul.f32 1.442695, %v1032_v27  ;;  %v1033_v13 = vsub.f32 %v4961_v38, %v989_v33 }
 0x62b   :  { %v995_v17 = vpop.xlane.xlu0 %994 }
 0x62c   :  { %v1050_v20 = vmul.f32 1.442695, %v1033_v13  ;;  %v1035_v1 = vsub.f32 %v4957_v31, %v995_v17  ;;  %4249 = vpow2.f32 %v1048_v14 }
 0x62d   :  { %v1004_v21 = vpop.xlane.xlu1 %1003 }
 0x62e   :  { %4251 = vpow2.f32 %v1050_v20  ;;  %v1054_v22 = vmul.f32 1.442695, %v1035_v1  ;;  %v1038_v16 = vsub.f32 %v4965_v40, %v1004_v21  ;;  %v1489_v1 = vsel %vm174_vm3, %v4947_v10, 0 }
 0x62f   :  { %4253 = vpow2.f32 %v1052_v15  ;;  %v1486_v21 = vsel %vm174_vm3, %v5043_v26, 0 }
 0x630   :  { %4255 = vpow2.f32 %v1054_v22  ;;  %v1060_v41 = vmul.f32 1.442695, %v1038_v16 }
 0x631   :  { %v998_v2 = vpop.xlane.xlu1 %997  ;;  %v1001_v5 = vpop.xlane.xlu0 %1000 }
 0x632   :  { %v1036_v63 = vsub.f32 %v4969_v44, %v998_v2  ;;  %v1037_v28 = vsub.f32 %v4975_v46, %v1001_v5 }
 0x634   :  { %v1056_v29 = vmul.f32 1.442695, %v1036_v63  ;;  %v1058_v36 = vmul.f32 1.442695, %v1037_v28 }
 0x635   :  { %v1007_v37 = vpop.xlane.xlu1 %1006  ;;  %v1016_v38 = vpop.xlane.xlu0 %1015 }
 0x636   :  { %4257 = vpow2.f32 %v1056_v29  ;;  %v1039_v31 = vsub.f32 %v4973_v32, %v1007_v37  ;;  %v1042_v48 = vsub.f32 %v4981_v49, %v1016_v38 }
 0x637   :  { %4259 = vpow2.f32 %v1058_v36 }
 0x638   :  { %v1062_v39 = vmul.f32 1.442695, %v1039_v31  ;;  %4261 = vpow2.f32 %v1060_v41 }
 0x639   :  { %v1010_v42 = vpop.xlane.xlu1 %1009  ;;  %v1019_v45 = vpop.xlane.xlu0 %1018 }
 0x63a   :  { %v5057_v40 = vpop.eup %4249  ;;  %4263 = vpow2.f32 %v1062_v39  ;;  %v1040_v44 = vsub.f32 %v4983_v50, %v1010_v42  ;;  %v1043_v46 = vsub.f32 %v4989_v53, %v1019_v45  ;;  %v1068_v53 = vmul.f32 1.442695, %v1042_v48 }
 0x63b   :  { %v5061_v47 = vpop.eup %4251 }
 0x63c   :  { %v5064_v51 = vpop.eup %4253  ;;  %v1064_v52 = vmul.f32 1.442695, %v1040_v44  ;;  %v1080_v32 = vpack.c.bf16 %v5061_v47, %v5057_v40  ;;  %v1070_v57 = vmul.f32 1.442695, %v1043_v46 }
 0x63d   :  { %v5068_v55 = vpop.eup %4255  ;;  %v1013_v58 = vpop.xlane.xlu0 %1012 }
 0x63e   :  { %6326 = vst [vmem:[#allocation2_spill] sm:$0xff] %v5068_v55  ;;  %v1081_v11 = vpack.c.bf16 %v5068_v55, %v5064_v51  ;;  %v1041_v50 = vsub.f32 %v4995_v3, %v1013_v58  ;;  %3838 = vmatprep.mubr.msk.bf16.mxu0 %vm983_vm4, %v1080_v32  ;;  %4265 = vpow2.f32 %v1064_v52  ;;  %v1349_v22 = vpop.permute.xlu1 %1348 }
 0x63f   :  { %4267 = vpow2.f32 %v1070_v57 }
 0x640   :  { %v1066_v49 = vmul.f32 1.442695, %v1041_v50  ;;  %3839 = vmatmul.mubr.msk.bf16.vlgmr.msra.gmra.mxu0 %vm983_vm4, %v1081_v11 }
 0x641   :  { %3863 = vmatpush3.bf16.xpose.msra.mxu0 %v1384_v59  ;;  %v1347_v27 = vpop.permute.xlu0 %1346 }
 0x642   :  { %4269 = vpow2.f32 %v1066_v49  ;;  %4083 = vmatprep.subr.msk.bf16.mxu0 %vm174_vm3, %v4941_v0  ;;  %v1378_v0 = vsel %vm174_vm3, %v4928_v19, 0 }
 0x643   :  { %v5079_v60 = vpop.eup %4257  ;;  %4271 = vpow2.f32 %v1068_v53 }
 0x644   :  { %v5081_v3 = vpop.eup %4259 }
 0x645   :  { %6327 = vst [vmem:[#allocation3_spill] sm:$0xff] %v5081_v3  ;;  %v1082_v62 = vpack.c.bf16 %v5081_v3, %v5079_v60  ;;  %v5085_v8 = vpop.eup %4261 }
 0x647   :  { %v5087_v9 = vpop.eup %4263  ;;  %3842 = vmatprep.mubr.msk.bf16.mxu0 %vm983_vm4, %v1082_v62 }
 0x648   :  { %6328 = vst [vmem:[#allocation4_spill] sm:$0xff] %v5087_v9  ;;  %v1083_v12 = vpack.c.bf16 %v5087_v9, %v5085_v8 }
 0x649   :  { %3865 = vmatpush3.bf16.xpose.msra.mxu0 %v1381_v30 }
 0x64a   :  { %4084 = vmatprep.subr.msk.bf16.mxu0 %vm174_vm3, %v4928_v19  ;;  %3843 = vmatmul.mubr.msk.bf16.gmra.mxu0 %vm983_vm4, %v1083_v12  ;;  %v1375_v19 = vsel %vm174_vm3, %v4933_v24, 0 }
 0x64b   :  { %3870 = vmatprep.mubr.msk.bf16.mxu0 %vm174_vm3, %v1347_v27  ;;  %v5098_v33 = vpop.eup %4265 }
 0x64c   :  { %6329 = vst [vmem:[#allocation5_spill] sm:$0xff] %v5098_v33  ;;  %v5100_v14 = vpop.eup %4267 }
 0x64d   :  { %6330 = vst [vmem:[#allocation6_spill] sm:$0xff] %v5100_v14 }
 0x64f   :  { %v5102_v13 = vpop.eup %4269 }
 0x650   :  { %6331 = vst [vmem:[#allocation7_spill] sm:$0xff] %v5102_v13  ;;  %v5104_v15 = vpop.eup %4271  ;;  %v1084_v17 = vpack.c.bf16 %v5102_v13, %v5098_v33 }
 0x651   :  { %6332 = vst [vmem:[#allocation8_spill] sm:$0xff] %v5104_v15  ;;  %v1085_v20 = vpack.c.bf16 %v5100_v14, %v5104_v15  ;;  %3867 = vmatpush3.bf16.xpose.msra.mxu0 %v1378_v0 }
 0x652   :  { %4085 = vmatprep.subr.msk.bf16.mxu0 %vm174_vm3, %v4933_v24  ;;  %3854 = vmatprep.mubr.msk.bf16.mxu1 %vm983_vm4, %v1084_v17 }
 0x653   :  { %3855 = vmatmul.mubr.msk.bf16.vlgmr.msra.gmra.mxu1 %vm983_vm4, %v1085_v20 }
 0x654   :  { %3879 = vmatpush3.bf16.xpose.msra.mxu1 %v1489_v1 }
 0x655   :  { %4087 = vmatprep.subr.msk.bf16.mxu1 %vm174_vm3, %v5043_v26 }
 0x659   :  { %3869 = vmatpush3.bf16.xpose.msra.mxu0 %v1375_v19 }
 0x65c   :  { %3881 = vmatpush3.bf16.xpose.msra.mxu1 %v1486_v21 }
 0x660   :  { %3871 = vmatmul.mubr.msk.bf16.vlgmr.msra.gmra.mxu0 %vm174_vm3, %v1349_v22 }
 0x66e   :  { %v1022_v16 = vpop.xlane.xlu1 %1021 }
 0x66f   :  { %v1044_v2 = vsub.f32 %v5003_v7, %v1022_v16 }
 0x671   :  { %v1072_v29 = vmul.f32 1.442695, %v1044_v2 }
 0x672   :  { %v1031_v5 = vpop.xlane.xlu1 %1030  ;;  %v1028_v10 = vpop.xlane.xlu0 %1027 }
 0x673   :  { %v1047_v63 = vsub.f32 %v5007_v23, %v1031_v5  ;;  %v1046_v28 = vsub.f32 %v5001_v4, %v1028_v10  ;;  %4273 = vpow2.f32 %v1072_v29 }
 0x675   :  { %v1078_v36 = vmul.f32 1.442695, %v1047_v63  ;;  %v1076_v24 = vmul.f32 1.442695, %v1046_v28 }
 0x676   :  { %v1460_v41 = vpop.permute.xlu1 %1459  ;;  %v1025_v37 = vpop.xlane.xlu0 %1024 }
 0x677   :  { %v1045_v26 = vsub.f32 %v5013_v61, %v1025_v37  ;;  %4275 = vpow2.f32 %v1078_v36  ;;  %v1480_v61 = vsel %vm174_vm3, %v1460_v41, 0 }
 0x678   :  { %4277 = vpow2.f32 %v1076_v24 }
 0x679   :  { %v1074_v38 = vmul.f32 1.442695, %v1045_v26 }
 0x67a   :  { %v1454_v31 = vpop.permute.xlu1 %1453  ;;  %v1462_v39 = vpop.permute.xlu0 %1461 }
 0x67b   :  { %4279 = vpow2.f32 %v1074_v38  ;;  %4088 = vmatprep.subr.msk.bf16.mxu1 %vm174_vm3, %v1462_v39  ;;  %v1483_v7 = vsel %vm174_vm3, %v1462_v39, 0 }
 0x67c   :  { %3883 = vmatpush3.bf16.xpose.msra.mxu1 %v1483_v7 }
 0x67d   :  { %4089 = vmatprep.subr.msk.bf16.mxu1 %vm174_vm3, %v1460_v41 }
 0x67e   :  { %v1353_v4 = vpop.permute.xlu1 %1352  ;;  %v1452_v23 = vpop.permute.xlu0 %1451 }
 0x680   :  { %v5135_v44 = vpop.eup %4273 }
 0x681   :  { %6333 = vst [vmem:[#allocation9_spill] sm:$0xff] %v5135_v44 }
 0x682   :  { %v1458_v42 = vpop.permute.xlu1 %1457  ;;  %v1351_v45 = vpop.permute.xlu0 %1350 }
 0x683   :  { %3874 = vmatprep.mubr.msk.bf16.mxu0 %vm174_vm3, %v1351_v45 }
 0x684   :  { %3875 = vmatmul.mubr.msk.bf16.gmra.mxu0 %vm174_vm3, %v1353_v4  ;;  %3885 = vmatpush3.bf16.xpose.msra.mxu1 %v1480_v61  ;;  %v5137_v46 = vpop.eup %4275 }
 0x685   :  { %6334 = vst [vmem:[#allocation10_spill] sm:$0xff] %v5137_v46  ;;  %v5139_v32 = vpop.eup %4277 }
 0x686   :  { %v1667_v48 = vpop.permute.xlu1 %1666  ;;  %v1456_v52 = vpop.permute.xlu0 %1455  ;;  %6335 = vst [vmem:[#allocation11_spill] sm:$0xff] %v5139_v32  ;;  %v1087_v53 = vpack.c.bf16 %v5137_v46, %v5139_v32 }
 0x687   :  { %3894 = vmatprep.subr.bf16.mxu0 %v1667_v48 }
 0x688   :  { %v5141_v57 = vpop.eup %4279  ;;  %3895 = vmatpush3.bf16.msra.mxu0 %v1667_v48 }
 0x689   :  { %6336 = vst [vmem:[#allocation12_spill] sm:$0xff] %v5141_v57  ;;  %v1086_v58 = vpack.c.bf16 %v5141_v57, %v5135_v44 }
 0x68a   :  { %v1663_v11 = vpop.permute.xlu1 %1662  ;;  %v1665_v50 = vpop.permute.xlu0 %1664 }
 0x68b   :  { %3858 = vmatprep.mubr.msk.bf16.mxu1 %vm983_vm4, %v1086_v58  ;;  %3896 = vmatprep.subr.bf16.mxu0 %v1665_v50 }
 0x68c   :  { %3859 = vmatmul.mubr.msk.bf16.gmra.mxu1 %vm983_vm4, %v1087_v53  ;;  %3897 = vmatpush3.bf16.msra.mxu0 %v1665_v50 }
 0x68d   :  { %3886 = vmatprep.mubr.msk.bf16.mxu1 %vm174_vm3, %v1452_v23  ;;  %3898 = vmatprep.subr.bf16.mxu0 %v1663_v11 }
 0x68e   :  { %v1756_v49 = vpop.permute.xlu1 %1755  ;;  %v1661_v59 = vpop.permute.xlu0 %1660 }
 0x68f   :  { %3910 = vmatprep.subr.bf16.mxu1 %v1756_v49 }
 0x690   :  { %3899 = vmatpush3.bf16.msra.mxu0 %v1663_v11 }
 0x691   :  { %3900 = vmatprep.subr.bf16.mxu0 %v1661_v59 }
 0x692   :  { %v5150_v62 = vpop.permute.xlu1 %1932  ;;  %v1754_v30 = vpop.permute.xlu0 %1753 }
 0x694   :  { %3887 = vmatmul.mubr.msk.bf16.vlgmr.msra.gmra.mxu1 %vm174_vm3, %v1454_v31  ;;  %3901 = vmatpush3.bf16.msra.mxu0 %v1661_v59 }
 0x695   :  { %3911 = vmatpush3.bf16.msra.mxu1 %v1756_v49  ;;  %3890 = vmatprep.mubr.msk.bf16.mxu1 %vm174_vm3, %v1456_v52 }
 0x696   :  { %3912 = vmatprep.subr.bf16.mxu1 %v1754_v30  ;;  %4090 = vmatprep.subr.msk.bf16.mxu0 %vm174_vm3, %v5150_v62  ;;  %v5156_v12 = vpop.permute.xlu1 %1930  ;;  %v1752_v27 = vpop.permute.xlu0 %1751 }
 0x699   :  { %3913 = vmatpush3.bf16.msra.mxu1 %v1754_v30 }
 0x69a   :  { %3914 = vmatprep.subr.bf16.mxu1 %v1752_v27  ;;  %v1750_v0 = vpop.permute.xlu1 %1749 }
 0x69c   :  { %3891 = vmatmul.mubr.msk.bf16.gmra.mxu1 %vm174_vm3, %v1458_v42 }
 0x69d   :  { %3915 = vmatpush3.bf16.msra.mxu1 %v1752_v27 }
 0x69e   :  { %3916 = vmatprep.subr.bf16.mxu1 %v1750_v0  ;;  %v5159_v17 = vpop.permute.xlu1 %2037 }
 0x6a1   :  { %3917 = vmatpush3.bf16.msra.mxu1 %v1750_v0 }
 0x6a2   :  { %4094 = vmatprep.subr.msk.bf16.mxu1 %vm174_vm3, %v5159_v17 }
 0x700   :  { %v5163_v20 = vpop.f32.mrf.mxu0 }
 0x701   :  { %6337 = vst [vmem:[#allocation13_spill] sm:$0xff] %v5163_v20 }
 0x702   :  { %v5165_v1 = vpop.f32.mrf.mxu0 }
 0x703   :  { %6338 = vst [vmem:[#allocation14_spill] sm:$0xff] %v5165_v1 }
 0x704   :  { %v5167_v19 = vpop.f32.mrf.mxu0 }
 0x705   :  { %6339 = vst [vmem:[#allocation15_spill] sm:$0xff] %v5167_v19 }
 0x706   :  { %v5169_v21 = vpop.f32.mrf.mxu0 }
 0x707   :  { %6340 = vst [vmem:[#allocation16_spill] sm:$0xff] %v5169_v21 }
 0x70a   :  { %v5171_v22 = vpop.f32.mrf.mxu0 }
 0x70b   :  { %6341 = vst [vmem:[#allocation17_spill] sm:$0xff] %v5171_v22 }
 0x70c   :  { %v5173_v16 = vpop.f32.mrf.mxu0 }
 0x70d   :  { %6342 = vst [vmem:[#allocation18_spill] sm:$0xff] %v5173_v16 }
 0x70e   :  { %v5175_v2 = vpop.f32.mrf.mxu0 }
 0x70f   :  { %6343 = vst [vmem:[#allocation19_spill] sm:$0xff] %v5175_v2 }
 0x710   :  { %v5177_v5 = vpop.f32.mrf.mxu0 }
 0x711   :  { %6344 = vst [vmem:[#allocation20_spill] sm:$0xff] %v5177_v5 }
 0x713   :  { %v5195_v26 = vpop.f32.mrf.mxu1 }
 0x714   :  { %6345 = vst [vmem:[#allocation21_spill] sm:$0xff] %v5195_v26 }
 0x715   :  { %v5197_v38 = vpop.f32.mrf.mxu1 }
 0x716   :  { %6346 = vst [vmem:[#allocation22_spill] sm:$0xff] %v5197_v38 }
 0x717   :  { %v5203_v7 = vpop.f32.mrf.mxu1 }
 0x718   :  { %6347 = vst [vmem:[#allocation23_spill] sm:$0xff] %v5203_v7 }
 0x719   :  { %v5211_v45 = vpop.f32.mrf.mxu1 }
 0x71a   :  { %6348 = vst [vmem:[#allocation24_spill] sm:$0xff] %v5211_v45 }
 0x720   :  { %v5179_v10 = vpop.f32.mrf.mxu0 }
 0x721   :  { %v1562_v63 = vsel %vm983_vm4, %v5179_v10, -inf }
 0x722   :  { %1563 = vmax.xlane.f32.xlu0 %v1562_v63  ;;  %v5183_v28 = vpop.f32.mrf.mxu0 }
 0x723   :  { %v1556_v36 = vsel %vm983_vm4, %v5183_v28, -inf }
 0x724   :  { %v5185_v29 = vpop.f32.mrf.mxu0 }
 0x725   :  { %v1565_v37 = vsel %vm983_vm4, %v5185_v29, -inf }
 0x726   :  { %1557 = vmax.xlane.f32.xlu0 %v1556_v36  ;;  %v5189_v24 = vpop.f32.mrf.mxu0 }
 0x727   :  { %v1559_v41 = vsel %vm983_vm4, %v5189_v24, -inf }
 0x728   :  { %1560 = vmax.xlane.f32.xlu1 %v1559_v41 }
 0x72a   :  { %1566 = vmax.xlane.f32.xlu0 %v1565_v37 }
 0x744   :  { %v5199_v31 = vpop.f32.mrf.mxu0 }
 0x745   :  { %v1574_v39 = vsel %vm983_vm4, %v5199_v31, -inf }
 0x746   :  { %1575 = vmax.xlane.f32.xlu1 %v1574_v39  ;;  %v5205_v4 = vpop.f32.mrf.mxu0 }
 0x747   :  { %v1568_v42 = vsel %vm983_vm4, %v5205_v4, -inf }
 0x748   :  { %v5207_v23 = vpop.f32.mrf.mxu0 }
 0x749   :  { %v1577_v58 = vsel %vm983_vm4, %v5207_v23, -inf }
 0x74a   :  { %1569 = vmax.xlane.f32.xlu1 %v1568_v42  ;;  %v5213_v61 = vpop.f32.mrf.mxu0 }
 0x74b   :  { %v1571_v48 = vsel %vm983_vm4, %v5213_v61, -inf }
 0x74c   :  { %v5217_v52 = vpop.f32.mrf.mxu1  ;;  %1572 = vmax.xlane.f32.xlu0 %v1571_v48 }
 0x74d   :  { %6349 = vst [vmem:[#allocation25_spill] sm:$0xff] %v5217_v52 }
 0x74e   :  { %v5221_v11 = vpop.f32.mrf.mxu1  ;;  %1578 = vmax.xlane.f32.xlu1 %v1577_v58 }
 0x74f   :  { %6350 = vst [vmem:[#allocation26_spill] sm:$0xff] %v5221_v11 }
 0x750   :  { %v5223_v50 = vpop.f32.mrf.mxu1 }
 0x751   :  { %6351 = vst [vmem:[#allocation27_spill] sm:$0xff] %v5223_v50 }
 0x752   :  { %v5225_v53 = vpop.f32.mrf.mxu1 }
 0x753   :  { %6352 = vst [vmem:[#allocation28_spill] sm:$0xff] %v5225_v53  ;;  %v5273_v53 = vpop.permute.xlu1 %2035 }
 0x754   :  { %v5227_v49 = vpop.f32.mrf.mxu1 }
 0x755   :  { %v1586_v59 = vsel %vm983_vm4, %v5227_v49, -inf }
 0x756   :  { %v5231_v30 = vpop.f32.mrf.mxu1  ;;  %1587 = vmax.xlane.f32.xlu0 %v1586_v59 }
 0x757   :  { %v1580_v27 = vsel %vm983_vm4, %v5231_v30, -inf }
 0x758   :  { %v5235_v0 = vpop.f32.mrf.mxu1  ;;  %1581 = vmax.xlane.f32.xlu1 %v1580_v27 }
 0x759   :  { %v1589_v63 = vsel %vm983_vm4, %v5235_v0, -inf }
 0x75a   :  { %v5239_v36 = vpop.f32.mrf.mxu1  ;;  %1590 = vmax.xlane.f32.xlu0 %v1589_v63 }
 0x75b   :  { %v1583_v41 = vsel %vm983_vm4, %v5239_v36, -inf }
 0x75c   :  { %v5247_v37 = vpop.f32.mrf.mxu1 }
 0x75d   :  { %v1598_v59 = vsel %vm983_vm4, %v5247_v37, -inf }
 0x75e   :  { %1584 = vmax.xlane.f32.xlu0 %v1583_v41  ;;  %v5249_v39 = vpop.f32.mrf.mxu1  ;;  %v5263_v41 = vpop.permute.xlu0 %1928 }
 0x75f   :  { %v1592_v42 = vsel %vm983_vm4, %v5249_v39, -inf }
 0x760   :  { %v5253_v48 = vpop.f32.mrf.mxu1 }
 0x761   :  { %v1601_v58 = vsel %vm983_vm4, %v5253_v48, -inf }
 0x762   :  { %v5259_v27 = vpop.f32.mrf.mxu1 }
 0x763   :  { %v1595_v63 = vsel %vm983_vm4, %v5259_v27, -inf }
 0x769   :  { %1920 = vrot.lane.b32.xlu1 %v4853_v34, %s4530_s18 }
 0x774   :  { %1918 = vrot.lane.b32.xlu0 %v4855_v35, %s4530_s18 }
 0x78d   :  { %1593 = vmax.xlane.f32.xlu1 %v1592_v42  ;;  %v5269_v42 = vpop.permute.xlu0 %1926 }
 0x791   :  { %1602 = vmax.xlane.f32.xlu1 %v1601_v58 }
 0x793   :  { %1599 = vmax.xlane.f32.xlu0 %v1598_v59 }
 0x797   :  { %1596 = vmax.xlane.f32.xlu0 %v1595_v63 }
 0x7a2   :  { %2031 = vrot.lane.b32.xlu1 %v4869_v54, %s4529_s17 }
 0x7a6   :  { %2025 = vrot.lane.b32.xlu1 %v4873_v56, %s4530_s18 }
 0x7aa   :  { %1924 = vrot.lane.b32.xlu1 %v4861_v43, %s4530_s18 }
 0x7ab   :  { %v1564_v58 = vpop.xlane.xlu0 %1563 }
 0x7ac   :  { %v1606_v59 = vsub.f32 %v5179_v10, %v1564_v58 }
 0x7ad   :  { %2033 = vrot.lane.b32.xlu0 %v4873_v56, %s4529_s17 }
 0x7ae   :  { %2029 = vrot.lane.b32.xlu1 %v4879_v6, %s4530_s18  ;;  %v1624_v38 = vmul.f32 1.442695, %v1606_v59 }
 0x7af   :  { %v1558_v63 = vpop.xlane.xlu0 %1557 }
 0x7b0   :  { %v1604_v11 = vsub.f32 %v5183_v28, %v1558_v63 }
 0x7b1   :  { %v1561_v50 = vpop.xlane.xlu1 %1560  ;;  %2023 = vrot.lane.b32.xlu0 %v4869_v54, %s4530_s18 }
 0x7b2   :  { %v1620_v52 = vmul.f32 1.442695, %v1604_v11  ;;  %v1605_v45 = vsub.f32 %v5189_v24, %v1561_v50  ;;  %2238 = vrot.lane.b32.xlu1 %v4861_v43, %s4531_s19 }
 0x7b3   :  { %v1567_v7 = vpop.xlane.xlu0 %1566 }
 0x7b4   :  { %v1622_v26 = vmul.f32 1.442695, %v1605_v45  ;;  %v1607_v5 = vsub.f32 %v5185_v29, %v1567_v7  ;;  %4281 = vpow2.f32 %v1620_v52  ;;  %v1956_v7 = vsel %vm174_vm3, %v5150_v62, 0 }
 0x7b5   :  { %1922 = vrot.lane.b32.xlu0 %v4865_v25, %s4530_s18  ;;  %v1953_v62 = vsel %vm174_vm3, %v5156_v12, 0 }
 0x7b6   :  { %4283 = vpow2.f32 %v1622_v26  ;;  %v1626_v10 = vmul.f32 1.442695, %v1607_v5  ;;  %2234 = vrot.lane.b32.xlu1 %v4853_v34, %s4531_s19 }
 0x7b7   :  { %4285 = vpow2.f32 %v1624_v38 }
 0x7b8   :  { %4287 = vpow2.f32 %v1626_v10 }
 0x7b9   :  { %2027 = vrot.lane.b32.xlu0 %v4884_v18, %s4530_s18 }
 0x7ba   :  { %2327 = vrot.lane.b32.xlu1 %v4879_v6, %s4531_s19 }
 0x7bd   :  { %2236 = vrot.lane.b32.xlu0 %v4865_v25, %s4531_s19 }
 0x7be   :  { %2504 = vrot.lane.b32.xlu1 %v4861_v43, %s4532_s20 }
 0x7c1   :  { %2232 = vrot.lane.b32.xlu0 %v4855_v35, %s4531_s19  ;;  %v5301_v5 = vpop.eup %4281 }
 0x7c2   :  { %2502 = vrot.lane.b32.xlu1 %v4865_v25, %s4532_s20 }
 0x7c3   :  { %v5305_v28 = vpop.eup %4283 }
 0x7c4   :  { %v5307_v29 = vpop.eup %4285  ;;  %v1652_v24 = vpack.c.bf16 %v5305_v28, %v5301_v5 }
 0x7c5   :  { %v5311_v26 = vpop.eup %4287  ;;  %2325 = vrot.lane.b32.xlu0 %v4884_v18, %s4531_s19 }
 0x7c6   :  { %v1653_v38 = vpack.c.bf16 %v5311_v26, %v5307_v29  ;;  %3902 = vmatprep.mubr.msk.bf16.mxu0 %vm983_vm4, %v1652_v24  ;;  %2321 = vrot.lane.b32.xlu1 %v4869_v54, %s4531_s19 }
 0x7c8   :  { %3903 = vmatmul.mubr.msk.bf16.vlgmr.msra.gmra.mxu0 %vm983_vm4, %v1653_v38 }
 0x7c9   :  { %3927 = vmatpush3.bf16.xpose.msra.mxu0 %v1956_v7  ;;  %2323 = vrot.lane.b32.xlu0 %v4873_v56, %s4531_s19  ;;  %v1950_v7 = vsel %vm174_vm3, %v5263_v41, 0 }
 0x7ca   :  { %4091 = vmatprep.subr.msk.bf16.mxu0 %vm174_vm3, %v5156_v12  ;;  %2609 = vrot.lane.b32.xlu1 %v4879_v6, %s4532_s20 }
 0x7cd   :  { %2500 = vrot.lane.b32.xlu0 %v4853_v34, %s4532_s20 }
 0x7ce   :  { %2607 = vrot.lane.b32.xlu1 %v4884_v18, %s4532_s20 }
 0x7cf   :  { %v1576_v45 = vpop.xlane.xlu1 %1575 }
 0x7d0   :  { %v1610_v52 = vsub.f32 %v5199_v31, %v1576_v45 }
 0x7d1   :  { %3929 = vmatpush3.bf16.xpose.msra.mxu0 %v1953_v62  ;;  %2498 = vrot.lane.b32.xlu0 %v4855_v35, %s4532_s20 }
 0x7d2   :  { %4092 = vmatprep.subr.msk.bf16.mxu0 %vm174_vm3, %v5263_v41  ;;  %v1632_v10 = vmul.f32 1.442695, %v1610_v52 }
 0x7d3   :  { %v1570_v11 = vpop.xlane.xlu1 %1569 }
 0x7d4   :  { %v1608_v50 = vsub.f32 %v5205_v4, %v1570_v11  ;;  %v1947_v4 = vsel %vm174_vm3, %v5269_v42, 0 }
 0x7d5   :  { %v1573_v58 = vpop.xlane.xlu0 %1572 }
 0x7d6   :  { %v1628_v59 = vmul.f32 1.442695, %v1608_v50  ;;  %v1609_v63 = vsub.f32 %v5213_v61, %v1573_v58 }
 0x7d7   :  { %v1579_v24 = vpop.xlane.xlu1 %1578 }
 0x7d8   :  { %v1630_v38 = vmul.f32 1.442695, %v1609_v63  ;;  %v1611_v12 = vsub.f32 %v5207_v23, %v1579_v24  ;;  %4289 = vpow2.f32 %v1628_v59 }
 0x7d9   :  { %3931 = vmatpush3.bf16.xpose.msra.mxu0 %v1950_v7 }
 0x7da   :  { %4291 = vpow2.f32 %v1630_v38  ;;  %v1634_v62 = vmul.f32 1.442695, %v1611_v12  ;;  %4093 = vmatprep.subr.msk.bf16.mxu0 %vm174_vm3, %v5269_v42 }
 0x7db   :  { %4293 = vpow2.f32 %v1632_v10 }
 0x7dc   :  { %4295 = vpow2.f32 %v1634_v62 }
 0x7df   :  { %v1588_v31 = vpop.xlane.xlu0 %1587 }
 0x7e0   :  { %v1614_v52 = vsub.f32 %v5227_v49, %v1588_v31 }
 0x7e1   :  { %3933 = vmatpush3.bf16.xpose.msra.mxu0 %v1947_v4  ;;  %v1582_v61 = vpop.xlane.xlu1 %1581 }
 0x7e2   :  { %v1612_v23 = vsub.f32 %v5231_v30, %v1582_v61  ;;  %v1640_v38 = vmul.f32 1.442695, %v1614_v52 }
 0x7e3   :  { %v1591_v45 = vpop.xlane.xlu0 %1590 }
 0x7e4   :  { %v1615_v41 = vsub.f32 %v5235_v0, %v1591_v45  ;;  %v1636_v50 = vmul.f32 1.442695, %v1612_v23  ;;  %v2061_v45 = vsel %vm174_vm3, %v5159_v17, 0 }
 0x7e5   :  { %v5352_v11 = vpop.eup %4289 }
 0x7e6   :  { %v1642_v59 = vmul.f32 1.442695, %v1615_v41  ;;  %4297 = vpow2.f32 %v1636_v50  ;;  %v2058_v41 = vsel %vm174_vm3, %v5273_v53, 0 }
 0x7e7   :  { %v5354_v58 = vpop.eup %4291  ;;  %v1585_v63 = vpop.xlane.xlu0 %1584 }
 0x7e8   :  { %v5356_v10 = vpop.eup %4293  ;;  %v1613_v42 = vsub.f32 %v5239_v36, %v1585_v63  ;;  %v1654_v24 = vpack.c.bf16 %v5354_v58, %v5352_v11  ;;  %4299 = vpow2.f32 %v1642_v59  ;;  %v1921_v36 = vpop.permute.xlu1 %1920 }
 0x7e9   :  { %v5361_v30 = vpop.eup %4295 }
 0x7ea   :  { %v1638_v0 = vmul.f32 1.442695, %v1613_v42  ;;  %3906 = vmatprep.mubr.msk.bf16.mxu0 %vm983_vm4, %v1654_v24  ;;  %v1655_v49 = vpack.c.bf16 %v5361_v30, %v5356_v10 }
 0x7eb   :  { %v1919_v12 = vpop.permute.xlu0 %1918 }
 0x7ec   :  { %4301 = vpow2.f32 %v1638_v0  ;;  %3907 = vmatmul.mubr.msk.bf16.gmra.mxu0 %vm983_vm4, %v1655_v49 }
 0x7ed   :  { %4303 = vpow2.f32 %v1640_v38  ;;  %3934 = vmatprep.mubr.msk.bf16.mxu0 %vm174_vm3, %v1919_v12 }
 0x7f3   :  { %v5369_v7 = vpop.eup %4297 }
 0x7f4   :  { %3935 = vmatmul.mubr.msk.bf16.vlgmr.msra.gmra.mxu0 %vm174_vm3, %v1921_v36 }
 0x7f5   :  { %v5371_v62 = vpop.eup %4299 }
 0x7f9   :  { %v5373_v31 = vpop.eup %4301 }
 0x7fa   :  { %v5375_v4 = vpop.eup %4303  ;;  %v1656_v61 = vpack.c.bf16 %v5373_v31, %v5369_v7 }
 0x7fb   :  { %v1657_v23 = vpack.c.bf16 %v5371_v62, %v5375_v4 }
 0x7fc   :  { %3918 = vmatprep.mubr.msk.bf16.mxu1 %vm983_vm4, %v1656_v61 }
 0x7fd   :  { %3919 = vmatmul.mubr.msk.bf16.vlgmr.msra.gmra.mxu1 %vm983_vm4, %v1657_v23 }
 0x7fe   :  { %3943 = vmatpush3.bf16.xpose.msra.mxu1 %v2061_v45 }
 0x7ff   :  { %4095 = vmatprep.subr.msk.bf16.mxu1 %vm174_vm3, %v5273_v53 }
 0x806   :  { %3945 = vmatpush3.bf16.xpose.msra.mxu1 %v2058_v41 }
 0x816   :  { %v1594_v52 = vpop.xlane.xlu1 %1593 }
 0x817   :  { %v1616_v59 = vsub.f32 %v5249_v39, %v1594_v52 }
 0x819   :  { %v1644_v0 = vmul.f32 1.442695, %v1616_v59 }
 0x81a   :  { %v1603_v50 = vpop.xlane.xlu1 %1602 }
 0x81b   :  { %v1619_v24 = vsub.f32 %v5253_v48, %v1603_v50  ;;  %4305 = vpow2.f32 %v1644_v0 }
 0x81c   :  { %v1600_v63 = vpop.xlane.xlu0 %1599 }
 0x81d   :  { %v1618_v42 = vsub.f32 %v5247_v37, %v1600_v63  ;;  %v1650_v36 = vmul.f32 1.442695, %v1619_v24 }
 0x81e   :  { %v2032_v38 = vpop.permute.xlu1 %2031 }
 0x81f   :  { %v1648_v17 = vmul.f32 1.442695, %v1618_v42 }
 0x820   :  { %v1597_v49 = vpop.xlane.xlu0 %1596 }
 0x821   :  { %v1617_v12 = vsub.f32 %v5259_v27, %v1597_v49  ;;  %4307 = vpow2.f32 %v1648_v17  ;;  %v2052_v27 = vsel %vm174_vm3, %v2032_v38, 0 }
 0x822   :  { %v2026_v61 = vpop.permute.xlu1 %2025 }
 0x823   :  { %v1646_v53 = vmul.f32 1.442695, %v1617_v12 }
 0x824   :  { %v2034_v23 = vpop.permute.xlu0 %2033 }
 0x825   :  { %4309 = vpow2.f32 %v1646_v53  ;;  %4096 = vmatprep.subr.msk.bf16.mxu1 %vm174_vm3, %v2034_v23  ;;  %v2055_v39 = vsel %vm174_vm3, %v2034_v23, 0 }
 0x826   :  { %4311 = vpow2.f32 %v1650_v36  ;;  %v1925_v37 = vpop.permute.xlu1 %1924  ;;  %3947 = vmatpush3.bf16.xpose.msra.mxu1 %v2055_v39 }
 0x827   :  { %4097 = vmatprep.subr.msk.bf16.mxu1 %vm174_vm3, %v2032_v38 }
 0x828   :  { %v2024_v48 = vpop.permute.xlu0 %2023  ;;  %v5399_v50 = vpop.eup %4305 }
 0x82a   :  { %v2030_v45 = vpop.permute.xlu1 %2029 }
 0x82c   :  { %v1923_v41 = vpop.permute.xlu0 %1922 }
 0x82d   :  { %3938 = vmatprep.mubr.msk.bf16.mxu0 %vm174_vm3, %v1923_v41 }
 0x82e   :  { %v2239_v52 = vpop.permute.xlu1 %2238  ;;  %3939 = vmatmul.mubr.msk.bf16.gmra.mxu0 %vm174_vm3, %v1925_v37  ;;  %3949 = vmatpush3.bf16.xpose.msra.mxu1 %v2052_v27  ;;  %v5401_v63 = vpop.eup %4307 }
 0x82f   :  { %3958 = vmatprep.subr.bf16.mxu0 %v2239_v52 }
 0x830   :  { %3959 = vmatpush3.bf16.msra.mxu0 %v2239_v52  ;;  %v2028_v59 = vpop.permute.xlu0 %2027 }
 0x832   :  { %v5403_v42 = vpop.eup %4309  ;;  %v2235_v24 = vpop.permute.xlu1 %2234 }
 0x833   :  { %v5405_v0 = vpop.eup %4311  ;;  %v1658_v17 = vpack.c.bf16 %v5403_v42, %v5399_v50 }
 0x834   :  { %v2237_v38 = vpop.permute.xlu0 %2236  ;;  %v1659_v49 = vpack.c.bf16 %v5405_v0, %v5401_v63 }
 0x835   :  { %3922 = vmatprep.mubr.msk.bf16.mxu1 %vm983_vm4, %v1658_v17  ;;  %3960 = vmatprep.subr.bf16.mxu0 %v2237_v38 }
 0x836   :  { %v2328_v12 = vpop.permute.xlu1 %2327  ;;  %3923 = vmatmul.mubr.msk.bf16.gmra.mxu1 %vm983_vm4, %v1659_v49  ;;  %3961 = vmatpush3.bf16.msra.mxu0 %v2237_v38 }
 0x837   :  { %3950 = vmatprep.mubr.msk.bf16.mxu1 %vm174_vm3, %v2024_v48  ;;  %3962 = vmatprep.subr.bf16.mxu0 %v2235_v24 }
 0x838   :  { %3974 = vmatprep.subr.bf16.mxu1 %v2328_v12  ;;  %v2233_v36 = vpop.permute.xlu0 %2232 }
 0x83a   :  { %v5414_v53 = vpop.permute.xlu1 %2504  ;;  %3963 = vmatpush3.bf16.msra.mxu0 %v2235_v24 }
 0x83b   :  { %3964 = vmatprep.subr.bf16.mxu0 %v2233_v36 }
 0x83c   :  { %v2326_v23 = vpop.permute.xlu0 %2325 }
 0x83e   :  { %3951 = vmatmul.mubr.msk.bf16.vlgmr.msra.gmra.mxu1 %vm174_vm3, %v2026_v61  ;;  %3965 = vmatpush3.bf16.msra.mxu0 %v2233_v36  ;;  %v5417_v39 = vpop.permute.xlu1 %2502 }
 0x83f   :  { %3975 = vmatpush3.bf16.msra.mxu1 %v2328_v12  ;;  %3954 = vmatprep.mubr.msk.bf16.mxu1 %vm174_vm3, %v2028_v59 }
 0x840   :  { %3976 = vmatprep.subr.bf16.mxu1 %v2326_v23  ;;  %4098 = vmatprep.subr.msk.bf16.mxu0 %vm174_vm3, %v5414_v53  ;;  %v2324_v37 = vpop.permute.xlu0 %2323 }
 0x842   :  { %v2322_v48 = vpop.permute.xlu1 %2321 }
 0x843   :  { %3977 = vmatpush3.bf16.msra.mxu1 %v2326_v23 }
 0x844   :  { %3978 = vmatprep.subr.bf16.mxu1 %v2324_v37 }
 0x846   :  { %3955 = vmatmul.mubr.msk.bf16.gmra.mxu1 %vm174_vm3, %v2030_v45  ;;  %v5423_v41 = vpop.permute.xlu1 %2609 }
 0x847   :  { %3979 = vmatpush3.bf16.msra.mxu1 %v2324_v37 }
 0x848   :  { %3980 = vmatprep.subr.bf16.mxu1 %v2322_v48 }
 0x84a   :  { %v5527_v14 = vpop.permute.xlu1 %2607 }
 0x84b   :  { %3981 = vmatpush3.bf16.msra.mxu1 %v2322_v48 }
 0x84c   :  { %4102 = vmatprep.subr.msk.bf16.mxu1 %vm174_vm3, %v5423_v41 }
 0x888   :  { %v5427_v61 = vpop.f32.mrf.mxu0 }
 0x889   :  { %6353 = vst [vmem:[#allocation29_spill] sm:$0xff] %v5427_v61 }
 0x88a   :  { %v5429_v27 = vpop.f32.mrf.mxu0 }
 0x88b   :  { %6354 = vst [vmem:[#allocation30_spill] sm:$0xff] %v5429_v27 }
 0x88c   :  { %v5431_v52 = vpop.f32.mrf.mxu0 }
 0x88d   :  { %6355 = vst [vmem:[#allocation31_spill] sm:$0xff] %v5431_v52 }
 0x88e   :  { %v5433_v59 = vpop.f32.mrf.mxu0 }
 0x88f   :  { %6356 = vst [vmem:[#allocation32_spill] sm:$0xff] %v5433_v59 }
 0x8ac   :  { %v5435_v24 = vpop.f32.mrf.mxu0 }
 0x8ad   :  { %6357 = vst [vmem:[#allocation33_spill] sm:$0xff] %v5435_v24 }
 0x8ae   :  { %v5437_v17 = vpop.f32.mrf.mxu0 }
 0x8af   :  { %6358 = vst [vmem:[#allocation34_spill] sm:$0xff] %v5437_v17 }
 0x8b0   :  { %v5439_v45 = vpop.f32.mrf.mxu0 }
 0x8b1   :  { %6359 = vst [vmem:[#allocation35_spill] sm:$0xff] %v5439_v45 }
 0x8b2   :  { %v5441_v38 = vpop.f32.mrf.mxu0 }
 0x8b3   :  { %6360 = vst [vmem:[#allocation36_spill] sm:$0xff] %v5441_v38 }
 0x8b4   :  { %v5443_v49 = vpop.f32.mrf.mxu0 }
 0x8b5   :  { %v2134_v12 = vsel %vm983_vm4, %v5443_v49, -inf }
 0x8b6   :  { %2135 = vmax.xlane.f32.xlu0 %v2134_v12  ;;  %v5447_v36 = vpop.f32.mrf.mxu0 }
 0x8b7   :  { %v2128_v37 = vsel %vm983_vm4, %v5447_v36, -inf }
 0x8b8   :  { %v5449_v23 = vpop.f32.mrf.mxu0 }
 0x8b9   :  { %v2137_v22 = vsel %vm983_vm4, %v5449_v23, -inf }
 0x8ba   :  { %2129 = vmax.xlane.f32.xlu0 %v2128_v37  ;;  %v5453_v48 = vpop.f32.mrf.mxu0 }
 0x8bb   :  { %v2131_v2 = vsel %vm983_vm4, %v5453_v48, -inf }
 0x8bc   :  { %2132 = vmax.xlane.f32.xlu1 %v2131_v2 }
 0x8bd   :  { %v5459_v16 = vpop.f32.mrf.mxu1 }
 0x8be   :  { %2138 = vmax.xlane.f32.xlu0 %v2137_v22  ;;  %6361 = vst [vmem:[#allocation37_spill] sm:$0xff] %v5459_v16 }
 0x8bf   :  { %v5461_v12 = vpop.f32.mrf.mxu1 }
 0x8c0   :  { %6362 = vst [vmem:[#allocation38_spill] sm:$0xff] %v5461_v12 }
 0x8c1   :  { %v5467_v37 = vpop.f32.mrf.mxu1 }
 0x8c2   :  { %6363 = vst [vmem:[#allocation39_spill] sm:$0xff] %v5467_v37 }
 0x8c3   :  { %v5475_v22 = vpop.f32.mrf.mxu1 }
 0x8c4   :  { %6364 = vst [vmem:[#allocation40_spill] sm:$0xff] %v5475_v22 }
 0x8ee   :  { %v5463_v21 = vpop.f32.mrf.mxu0 }
 0x8ef   :  { %v2146_v1 = vsel %vm983_vm4, %v5463_v21, -inf }
 0x8f0   :  { %2147 = vmax.xlane.f32.xlu1 %v2146_v1  ;;  %v5469_v19 = vpop.f32.mrf.mxu0 }
 0x8f1   :  { %v2140_v2 = vsel %vm983_vm4, %v5469_v19, -inf }
 0x8f2   :  { %v5471_v20 = vpop.f32.mrf.mxu0 }
 0x8f3   :  { %v2149_v1 = vsel %vm983_vm4, %v5471_v20, -inf }
 0x8f4   :  { %2141 = vmax.xlane.f32.xlu1 %v2140_v2  ;;  %v5477_v16 = vpop.f32.mrf.mxu0 }
 0x8f5   :  { %v2143_v12 = vsel %vm983_vm4, %v5477_v16, -inf }
 0x8f6   :  { %v5481_v45 = vpop.f32.mrf.mxu1  ;;  %2144 = vmax.xlane.f32.xlu0 %v2143_v12 }
 0x8f7   :  { %6365 = vst [vmem:[#allocation41_spill] sm:$0xff] %v5481_v45 }
 0x8f8   :  { %v5485_v37 = vpop.f32.mrf.mxu1  ;;  %2150 = vmax.xlane.f32.xlu1 %v2149_v1 }
 0x8f9   :  { %6366 = vst [vmem:[#allocation42_spill] sm:$0xff] %v5485_v37  ;;  %v2501_v37 = vpop.permute.xlu0 %2500 }
 0x8fa   :  { %v5487_v24 = vpop.f32.mrf.mxu1 }
 0x8fb   :  { %6367 = vst [vmem:[#allocation43_spill] sm:$0xff] %v5487_v24 }
 0x8fc   :  { %v5489_v38 = vpop.f32.mrf.mxu1 }
 0x8fd   :  { %6368 = vst [vmem:[#allocation44_spill] sm:$0xff] %v5489_v38  ;;  %v2499_v61 = vpop.permute.xlu0 %2498 }
 0x8fe   :  { %v5491_v22 = vpop.f32.mrf.mxu1 }
 0x8ff   :  { %v2158_v2 = vsel %vm983_vm4, %v5491_v22, -inf }
 0x900   :  { %v5495_v17 = vpop.f32.mrf.mxu1  ;;  %2159 = vmax.xlane.f32.xlu0 %v2158_v2 }
 0x901   :  { %v2152_v12 = vsel %vm983_vm4, %v5495_v17, -inf }
 0x902   :  { %v5499_v45 = vpop.f32.mrf.mxu1  ;;  %2153 = vmax.xlane.f32.xlu1 %v2152_v12 }
 0x903   :  { %v2161_v1 = vsel %vm983_vm4, %v5499_v45, -inf }
 0x904   :  { %v5503_v24 = vpop.f32.mrf.mxu1  ;;  %2162 = vmax.xlane.f32.xlu0 %v2161_v1 }
 0x905   :  { %v2155_v38 = vsel %vm983_vm4, %v5503_v24, -inf }
 0x906   :  { %v5511_v2 = vpop.f32.mrf.mxu1 }
 0x907   :  { %v2170_v59 = vsel %vm983_vm4, %v5511_v2, -inf }
 0x908   :  { %2156 = vmax.xlane.f32.xlu0 %v2155_v38  ;;  %v5513_v12 = vpop.f32.mrf.mxu1 }
 0x909   :  { %v2164_v52 = vsel %vm983_vm4, %v5513_v12, -inf }
 0x90a   :  { %v5517_v1 = vpop.f32.mrf.mxu1 }
 0x90b   :  { %v2173_v38 = vsel %vm983_vm4, %v5517_v1, -inf }
 0x90c   :  { %v5523_v27 = vpop.f32.mrf.mxu1 }
 0x90d   :  { %v2167_v57 = vsel %vm983_vm4, %v5523_v27, -inf }
 0x913   :  { %2492 = vrot.lane.b32.xlu1 %v4853_v34, %s4533_s21 }
 0x91e   :  { %2490 = vrot.lane.b32.xlu0 %v4855_v35, %s4533_s21 }
 0x937   :  { %2165 = vmax.xlane.f32.xlu1 %v2164_v52 }
 0x93b   :  { %2174 = vmax.xlane.f32.xlu1 %v2173_v38 }
 0x93d   :  { %2171 = vmax.xlane.f32.xlu0 %v2170_v59 }
 0x93f   :  { %v2136_v46 = vpop.xlane.xlu0 %2135 }
 0x940   :  { %v2178_v52 = vsub.f32 %v5443_v49, %v2136_v46 }
 0x941   :  { %2168 = vmax.xlane.f32.xlu0 %v2167_v57 }
 0x942   :  { %v2196_v9 = vmul.f32 1.442695, %v2178_v52 }
 0x943   :  { %v2130_v13 = vpop.xlane.xlu0 %2129 }
 0x944   :  { %v2176_v32 = vsub.f32 %v5447_v36, %v2130_v13 }
 0x945   :  { %v2133_v44 = vpop.xlane.xlu1 %2132 }
 0x946   :  { %v2192_v38 = vmul.f32 1.442695, %v2176_v32  ;;  %v2177_v15 = vsub.f32 %v5453_v48, %v2133_v44 }
 0x947   :  { %v2139_v3 = vpop.xlane.xlu0 %2138 }
 0x948   :  { %v2194_v55 = vmul.f32 1.442695, %v2177_v15  ;;  %v2179_v59 = vsub.f32 %v5449_v23, %v2139_v3  ;;  %4313 = vpow2.f32 %v2192_v38  ;;  %v2528_v15 = vsel %vm174_vm3, %v5414_v53, 0 }
 0x94a   :  { %4315 = vpow2.f32 %v2194_v55  ;;  %v2198_v33 = vmul.f32 1.442695, %v2179_v59 }
 0x94b   :  { %4317 = vpow2.f32 %v2196_v9 }
 0x94c   :  { %4319 = vpow2.f32 %v2198_v33  ;;  %2494 = vrot.lane.b32.xlu1 %v4865_v25, %s4533_s21 }
 0x950   :  { %2603 = vrot.lane.b32.xlu1 %v4869_v54, %s4532_s20 }
 0x954   :  { %2597 = vrot.lane.b32.xlu1 %v4873_v56, %s4533_s21 }
 0x955   :  { %v5539_v13 = vpop.eup %4313 }
 0x957   :  { %v5541_v44 = vpop.eup %4315  ;;  %2605 = vrot.lane.b32.xlu0 %v4873_v56, %s4532_s20 }
 0x958   :  { %v5545_v55 = vpop.eup %4317  ;;  %2601 = vrot.lane.b32.xlu1 %v4879_v6, %s4533_s21  ;;  %v2224_v3 = vpack.c.bf16 %v5541_v44, %v5539_v13 }
 0x959   :  { %v5551_v9 = vpop.eup %4319 }
 0x95a   :  { %v2225_v33 = vpack.c.bf16 %v5551_v9, %v5545_v55  ;;  %3966 = vmatprep.mubr.msk.bf16.mxu0 %vm983_vm4, %v2224_v3 }
 0x95b   :  { %2496 = vrot.lane.b32.xlu0 %v4861_v43, %s4533_s21 }
 0x95c   :  { %2810 = vrot.lane.b32.xlu1 %v4861_v43, %s4534_s22  ;;  %3967 = vmatmul.mubr.msk.bf16.vlgmr.msra.gmra.mxu0 %vm983_vm4, %v2225_v33  ;;  %v2525_v43 = vsel %vm174_vm3, %v5417_v39, 0 }
 0x95d   :  { %3991 = vmatpush3.bf16.xpose.msra.mxu0 %v2528_v15 }
 0x95e   :  { %4099 = vmatprep.subr.msk.bf16.mxu0 %vm174_vm3, %v5417_v39 }
 0x95f   :  { %2595 = vrot.lane.b32.xlu0 %v4869_v54, %s4533_s21 }
 0x960   :  { %2806 = vrot.lane.b32.xlu1 %v4853_v34, %s4534_s22  ;;  %v2522_v34 = vsel %vm174_vm3, %v2501_v37, 0 }
 0x963   :  { %2599 = vrot.lane.b32.xlu0 %v4884_v18, %s4533_s21 }
 0x964   :  { %2899 = vrot.lane.b32.xlu1 %v4879_v6, %s4534_s22  ;;  %v2519_v6 = vsel %vm174_vm3, %v2499_v61, 0 }
 0x965   :  { %3993 = vmatpush3.bf16.xpose.msra.mxu0 %v2525_v43 }
 0x966   :  { %4100 = vmatprep.subr.msk.bf16.mxu0 %vm174_vm3, %v2501_v37 }
 0x967   :  { %2808 = vrot.lane.b32.xlu0 %v4865_v25, %s4534_s22 }
 0x968   :  { %2897 = vrot.lane.b32.xlu1 %v4884_v18, %s4534_s22 }
 0x96b   :  { %2804 = vrot.lane.b32.xlu0 %v4855_v35, %s4534_s22 }
 0x96d   :  { %3995 = vmatpush3.bf16.xpose.msra.mxu0 %v2522_v34 }
 0x96e   :  { %4101 = vmatprep.subr.msk.bf16.mxu0 %vm174_vm3, %v2499_v61 }
 0x975   :  { %3997 = vmatpush3.bf16.xpose.msra.mxu0 %v2519_v6 }
 0x979   :  { %v2148_v46 = vpop.xlane.xlu1 %2147 }
 0x97a   :  { %v2182_v32 = vsub.f32 %v5463_v21, %v2148_v46 }
 0x97c   :  { %v2204_v49 = vmul.f32 1.442695, %v2182_v32 }
 0x97d   :  { %v2142_v57 = vpop.xlane.xlu1 %2141 }
 0x97e   :  { %v2180_v25 = vsub.f32 %v5469_v19, %v2142_v57 }
 0x97f   :  { %v2145_v53 = vpop.xlane.xlu0 %2144 }
 0x980   :  { %v2200_v39 = vmul.f32 1.442695, %v2180_v25  ;;  %v2181_v18 = vsub.f32 %v5477_v16, %v2145_v53 }
 0x981   :  { %v2151_v35 = vpop.xlane.xlu1 %2150 }
 0x982   :  { %v2202_v36 = vmul.f32 1.442695, %v2181_v18  ;;  %v2183_v23 = vsub.f32 %v5471_v20, %v2151_v35  ;;  %4321 = vpow2.f32 %v2200_v39  ;;  %v2630_v35 = vsel %vm174_vm3, %v5527_v14, 0 }
 0x984   :  { %4323 = vpow2.f32 %v2202_v36  ;;  %v2206_v48 = vmul.f32 1.442695, %v2183_v23 }
 0x985   :  { %4325 = vpow2.f32 %v2204_v49  ;;  %v2633_v49 = vsel %vm174_vm3, %v5423_v41, 0 }
 0x986   :  { %4327 = vpow2.f32 %v2206_v48 }
 0x989   :  { %v2160_v61 = vpop.xlane.xlu0 %2159 }
 0x98a   :  { %v2186_v38 = vsub.f32 %v5491_v22, %v2160_v61 }
 0x98b   :  { %v2154_v37 = vpop.xlane.xlu1 %2153 }
 0x98c   :  { %v2184_v21 = vsub.f32 %v5495_v17, %v2154_v37  ;;  %v2212_v6 = vmul.f32 1.442695, %v2186_v38 }
 0x98d   :  { %v2163_v52 = vpop.xlane.xlu0 %2162 }
 0x98e   :  { %v2187_v19 = vsub.f32 %v5499_v45, %v2163_v52  ;;  %v2208_v59 = vmul.f32 1.442695, %v2184_v21 }
 0x98f   :  { %v5592_v16 = vpop.eup %4321 }
 0x990   :  { %v2214_v20 = vmul.f32 1.442695, %v2187_v19  ;;  %4329 = vpow2.f32 %v2208_v59 }
 0x991   :  { %v5594_v3 = vpop.eup %4323  ;;  %v2157_v33 = vpop.xlane.xlu0 %2156 }
 0x992   :  { %v5596_v15 = vpop.eup %4325  ;;  %v2185_v43 = vsub.f32 %v5503_v24, %v2157_v33  ;;  %v2226_v34 = vpack.c.bf16 %v5594_v3, %v5592_v16  ;;  %4331 = vpow2.f32 %v2214_v20  ;;  %v2493_v24 = vpop.permute.xlu1 %2492 }
 0x993   :  { %v5601_v17 = vpop.eup %4327 }
 0x994   :  { %v2210_v45 = vmul.f32 1.442695, %v2185_v43  ;;  %3970 = vmatprep.mubr.msk.bf16.mxu0 %vm983_vm4, %v2226_v34  ;;  %v2227_v22 = vpack.c.bf16 %v5601_v17, %v5596_v15 }
 0x995   :  { %v2491_v46 = vpop.permute.xlu0 %2490 }
 0x996   :  { %4333 = vpow2.f32 %v2210_v45  ;;  %3971 = vmatmul.mubr.msk.bf16.gmra.mxu0 %vm983_vm4, %v2227_v22 }
 0x997   :  { %4335 = vpow2.f32 %v2212_v6  ;;  %3998 = vmatprep.mubr.msk.bf16.mxu0 %vm174_vm3, %v2491_v46 }
 0x99d   :  { %v5609_v32 = vpop.eup %4329 }
 0x99e   :  { %3999 = vmatmul.mubr.msk.bf16.vlgmr.msra.gmra.mxu0 %vm174_vm3, %v2493_v24 }
 0x99f   :  { %v5611_v57 = vpop.eup %4331 }
 0x9a3   :  { %v5613_v25 = vpop.eup %4333 }
 0x9a4   :  { %v5615_v53 = vpop.eup %4335  ;;  %v2228_v39 = vpack.c.bf16 %v5613_v25, %v5609_v32 }
 0x9a5   :  { %v2229_v18 = vpack.c.bf16 %v5611_v57, %v5615_v53 }
 0x9a6   :  { %3982 = vmatprep.mubr.msk.bf16.mxu1 %vm983_vm4, %v2228_v39 }
 0x9a7   :  { %3983 = vmatmul.mubr.msk.bf16.vlgmr.msra.gmra.mxu1 %vm983_vm4, %v2229_v18 }
 0x9a8   :  { %4007 = vmatpush3.bf16.xpose.msra.mxu1 %v2633_v49 }
 0x9a9   :  { %4103 = vmatprep.subr.msk.bf16.mxu1 %vm174_vm3, %v5527_v14 }
 0x9b0   :  { %4009 = vmatpush3.bf16.xpose.msra.mxu1 %v2630_v35 }
 0x9c0   :  { %v2166_v36 = vpop.xlane.xlu1 %2165 }
 0x9c1   :  { %v2188_v48 = vsub.f32 %v5513_v12, %v2166_v36 }
 0x9c3   :  { %v2216_v19 = vmul.f32 1.442695, %v2188_v48 }
 0x9c4   :  { %v2175_v23 = vpop.xlane.xlu1 %2174 }
 0x9c5   :  { %v2191_v21 = vsub.f32 %v5517_v1, %v2175_v23  ;;  %4337 = vpow2.f32 %v2216_v19 }
 0x9c6   :  { %v2172_v61 = vpop.xlane.xlu0 %2171 }
 0x9c7   :  { %v2190_v37 = vsub.f32 %v5511_v2, %v2172_v61  ;;  %v2222_v20 = vmul.f32 1.442695, %v2191_v21 }
 0x9c8   :  { %v2495_v52 = vpop.permute.xlu1 %2494 }
 0x9c9   :  { %4002 = vmatprep.mubr.msk.bf16.mxu0 %vm174_vm3, %v2495_v52  ;;  %v2220_v41 = vmul.f32 1.442695, %v2190_v37 }
 0x9ca   :  { %v2169_v38 = vpop.xlane.xlu0 %2168 }
 0x9cb   :  { %v2189_v59 = vsub.f32 %v5523_v27, %v2169_v38  ;;  %4339 = vpow2.f32 %v2220_v41 }
 0x9cc   :  { %v2604_v14 = vpop.permute.xlu1 %2603 }
 0x9cd   :  { %v2218_v33 = vmul.f32 1.442695, %v2189_v59  ;;  %v2624_v6 = vsel %vm174_vm3, %v2604_v14, 0 }
 0x9ce   :  { %v2606_v43 = vpop.permute.xlu0 %2605 }
 0x9cf   :  { %4341 = vpow2.f32 %v2218_v33  ;;  %4104 = vmatprep.subr.msk.bf16.mxu1 %vm174_vm3, %v2606_v43  ;;  %v2627_v2 = vsel %vm174_vm3, %v2606_v43, 0 }
 0x9d0   :  { %4343 = vpow2.f32 %v2222_v20  ;;  %v2598_v12 = vpop.permute.xlu1 %2597  ;;  %4011 = vmatpush3.bf16.xpose.msra.mxu1 %v2627_v2 }
 0x9d1   :  { %4105 = vmatprep.subr.msk.bf16.mxu1 %vm174_vm3, %v2604_v14 }
 0x9d2   :  { %v2497_v1 = vpop.permute.xlu0 %2496  ;;  %v5639_v22 = vpop.eup %4337 }
 0x9d3   :  { %4003 = vmatmul.mubr.msk.bf16.gmra.mxu0 %vm174_vm3, %v2497_v1 }
 0x9d4   :  { %v2602_v27 = vpop.permute.xlu1 %2601 }
 0x9d6   :  { %v2596_v34 = vpop.permute.xlu0 %2595 }
 0x9d8   :  { %v2811_v45 = vpop.permute.xlu1 %2810  ;;  %4013 = vmatpush3.bf16.xpose.msra.mxu1 %v2624_v6  ;;  %v5641_v24 = vpop.eup %4339 }
 0x9d9   :  { %4022 = vmatprep.subr.bf16.mxu0 %v2811_v45 }
 0x9da   :  { %4023 = vmatpush3.bf16.msra.mxu0 %v2811_v45  ;;  %v2600_v46 = vpop.permute.xlu0 %2599 }
 0x9dc   :  { %v5643_v39 = vpop.eup %4341  ;;  %v2807_v18 = vpop.permute.xlu1 %2806 }
 0x9dd   :  { %v5645_v49 = vpop.eup %4343  ;;  %v2230_v35 = vpack.c.bf16 %v5643_v39, %v5639_v22 }
 0x9de   :  { %v2809_v36 = vpop.permute.xlu0 %2808  ;;  %v2231_v23 = vpack.c.bf16 %v5645_v49, %v5641_v24 }
 0x9df   :  { %3986 = vmatprep.mubr.msk.bf16.mxu1 %vm983_vm4, %v2230_v35  ;;  %4024 = vmatprep.subr.bf16.mxu0 %v2809_v36 }
 0x9e0   :  { %v2900_v48 = vpop.permute.xlu1 %2899  ;;  %3987 = vmatmul.mubr.msk.bf16.gmra.mxu1 %vm983_vm4, %v2231_v23  ;;  %4025 = vmatpush3.bf16.msra.mxu0 %v2809_v36 }
 0x9e1   :  { %4014 = vmatprep.mubr.msk.bf16.mxu1 %vm174_vm3, %v2596_v34  ;;  %4026 = vmatprep.subr.bf16.mxu0 %v2807_v18 }
 0x9e2   :  { %4038 = vmatprep.subr.bf16.mxu1 %v2900_v48  ;;  %v2805_v61 = vpop.permute.xlu0 %2804 }
 0x9e4   :  { %4027 = vmatpush3.bf16.msra.mxu0 %v2807_v18  ;;  %v2898_v37 = vpop.permute.xlu1 %2897 }
 0x9e5   :  { %4028 = vmatprep.subr.bf16.mxu0 %v2805_v61 }
 0x9e8   :  { %4015 = vmatmul.mubr.msk.bf16.vlgmr.msra.gmra.mxu1 %vm174_vm3, %v2598_v12  ;;  %4029 = vmatpush3.bf16.msra.mxu0 %v2805_v61 }
 0x9e9   :  { %4039 = vmatpush3.bf16.msra.mxu1 %v2900_v48  ;;  %4018 = vmatprep.mubr.msk.bf16.mxu1 %vm174_vm3, %v2600_v46 }
 0x9ea   :  { %4040 = vmatprep.subr.bf16.mxu1 %v2898_v37 }
 0x9ed   :  { %4041 = vmatpush3.bf16.msra.mxu1 %v2898_v37 }
 0x9f0   :  { %4019 = vmatmul.mubr.msk.bf16.gmra.mxu1 %vm174_vm3, %v2602_v27 }
 0xa1c   :  { %v5657_v21 = vpop.f32.mrf.mxu0 }
 0xa1d   :  { %6369 = vst [vmem:[#allocation45_spill] sm:$0xff] %v5657_v21  ;;  %v2410_v21 = vsel %vm983_vm4, %v5539_v13, 0.0  ;;  %v1844_v13 = vsel %vm983_vm4, %v5307_v29, 0.0  ;;  %v2413_v29 = vsel %vm983_vm4, %v5541_v44, 0.0  ;;  %v1853_v44 = vsel %vm983_vm4, %v5354_v58, 0.0 }
 0xa1e   :  { %v5659_v52 = vpop.f32.mrf.mxu0  ;;  %v1859_v58 = vsel %vm983_vm4, %v5361_v30, 0.0  ;;  %v2440_v30 = vsel %vm983_vm4, %v5615_v53, 0.0 }
 0xa1f   :  { %6370 = vst [vmem:[#allocation46_spill] sm:$0xff] %v5659_v52 }
 0xa20   :  { %v5661_v19 = vpop.f32.mrf.mxu0 }
 0xa21   :  { %6371 = vst [vmem:[#allocation47_spill] sm:$0xff] %v5661_v19 }
 0xa22   :  { %v5663_v41 = vpop.f32.mrf.mxu0 }
 0xa23   :  { %6372 = vst [vmem:[#allocation48_spill] sm:$0xff] %v5663_v41 }
 0xa56   :  { %v5665_v38 = vpop.f32.mrf.mxu0 }
 0xa57   :  { %6373 = vst [vmem:[#allocation49_spill] sm:$0xff] %v5665_v38 }
 0xa58   :  { %v5667_v59 = vpop.f32.mrf.mxu0 }
 0xa59   :  { %6374 = vst [vmem:[#allocation50_spill] sm:$0xff] %v5667_v59 }
 0xa5a   :  { %v5669_v20 = vpop.f32.mrf.mxu0 }
 0xa5b   :  { %6375 = vst [vmem:[#allocation51_spill] sm:$0xff] %v5669_v20 }
 0xa5c   :  { %v5671_v14 = vpop.f32.mrf.mxu0 }
 0xa5d   :  { %6376 = vst [vmem:[#allocation52_spill] sm:$0xff] %v5671_v14 }
 0xa5e   :  { %v5673_v33 = vpop.f32.mrf.mxu0 }
 0xa5f   :  { %v2706_v43 = vsel %vm983_vm4, %v5673_v33, -inf }
 0xa60   :  { %2707 = vmax.xlane.f32.xlu0 %v2706_v43  ;;  %v5677_v2 = vpop.f32.mrf.mxu0 }
 0xa61   :  { %v2700_v1 = vsel %vm983_vm4, %v5677_v2, -inf }
 0xa62   :  { %v5679_v12 = vpop.f32.mrf.mxu0 }
 0xa63   :  { %v2709_v6 = vsel %vm983_vm4, %v5679_v12, -inf }
 0xa64   :  { %2701 = vmax.xlane.f32.xlu0 %v2700_v1  ;;  %v5683_v27 = vpop.f32.mrf.mxu0 }
 0xa65   :  { %v2703_v34 = vsel %vm983_vm4, %v5683_v27, -inf }
 0xa66   :  { %2704 = vmax.xlane.f32.xlu1 %v2703_v34 }
 0xa67   :  { %v5689_v45 = vpop.f32.mrf.mxu1 }
 0xa68   :  { %2710 = vmax.xlane.f32.xlu0 %v2709_v6  ;;  %6377 = vst [vmem:[#allocation53_spill] sm:$0xff] %v5689_v45 }
 0xa69   :  { %v5697_v36 = vpop.f32.mrf.mxu1 }
 0xa6a   :  { %6378 = vst [vmem:[#allocation54_spill] sm:$0xff] %v5697_v36 }
 0xa6b   :  { %v5707_v43 = vpop.f32.mrf.mxu1 }
 0xa6c   :  { %6379 = vst [vmem:[#allocation55_spill] sm:$0xff] %v5707_v43 }
 0xa6d   :  { %v5711_v34 = vpop.f32.mrf.mxu1 }
 0xa6e   :  { %6380 = vst [vmem:[#allocation56_spill] sm:$0xff] %v5711_v34 }
 0xa93   :  { %v5691_v46 = vpop.f32.mrf.mxu0 }
 0xa94   :  { %v2718_v18 = vsel %vm983_vm4, %v5691_v46, -inf }
 0xa95   :  { %2719 = vmax.xlane.f32.xlu1 %v2718_v18  ;;  %v5695_v35 = vpop.f32.mrf.mxu0 }
 0xa96   :  { %v2712_v48 = vsel %vm983_vm4, %v5695_v35, -inf }
 0xa97   :  { %v5699_v23 = vpop.f32.mrf.mxu0 }
 0xa98   :  { %v2721_v61 = vsel %vm983_vm4, %v5699_v23, -inf }
 0xa99   :  { %2713 = vmax.xlane.f32.xlu1 %v2712_v48  ;;  %2722 = vmax.xlane.f32.xlu0 %v2721_v61  ;;  %v5705_v37 = vpop.f32.mrf.mxu0 }
 0xa9a   :  { %v2715_v1 = vsel %vm983_vm4, %v5705_v37, -inf }
 0xa9d   :  { %2716 = vmax.xlane.f32.xlu0 %v2715_v1 }
 0xaa0   :  { %v5713_v6 = vpop.f32.mrf.mxu1 }
 0xaa1   :  { %6381 = vst [vmem:[#allocation57_spill] sm:$0xff] %v5713_v6 }
 0xaa2   :  { %v5715_v18 = vpop.f32.mrf.mxu1 }
 0xaa3   :  { %6382 = vst [vmem:[#allocation58_spill] sm:$0xff] %v5715_v18 }
 0xaa4   :  { %v5717_v36 = vpop.f32.mrf.mxu1 }
 0xaa5   :  { %6383 = vst [vmem:[#allocation59_spill] sm:$0xff] %v5717_v36 }
 0xaa6   :  { %v5719_v45 = vpop.f32.mrf.mxu1 }
 0xaa7   :  { %6384 = vst [vmem:[#allocation60_spill] sm:$0xff] %v5719_v45 }
 0xaa8   :  { %v5721_v48 = vpop.f32.mrf.mxu1 }
 0xaa9   :  { %v2730_v61 = vsel %vm983_vm4, %v5721_v48, -inf }
 0xaaa   :  { %2731 = vmax.xlane.f32.xlu1 %v2730_v61  ;;  %v5725_v43 = vpop.f32.mrf.mxu1 }
 0xaab   :  { %v2724_v1 = vsel %vm983_vm4, %v5725_v43, -inf }
 0xaac   :  { %v5727_v20 = vpop.f32.mrf.mxu1 }
 0xaad   :  { %v2733_v34 = vsel %vm983_vm4, %v5727_v20, -inf }
 0xaae   :  { %2725 = vmax.xlane.f32.xlu1 %v2724_v1  ;;  %2734 = vmax.xlane.f32.xlu0 %v2733_v34  ;;  %v5733_v36 = vpop.f32.mrf.mxu1 }
 0xaaf   :  { %v2727_v45 = vsel %vm983_vm4, %v5733_v36, -inf }
 0xab0   :  { %v5735_v6 = vpop.f32.mrf.mxu1 }
 0xab1   :  { %v2742_v61 = vsel %vm983_vm4, %v5735_v6, -inf }
 0xab2   :  { %2728 = vmax.xlane.f32.xlu0 %v2727_v45  ;;  %2743 = vmax.xlane.f32.xlu1 %v2742_v61  ;;  %v5741_v18 = vpop.f32.mrf.mxu1  ;;  %v1841_v61 = vsel %vm983_vm4, %v5305_v28, 0.0 }
 0xab3   :  { %v2736_v1 = vsel %vm983_vm4, %v5741_v18, -inf }
 0xab4   :  { %v5743_v38 = vpop.f32.mrf.mxu1 }
 0xab5   :  { %v2745_v34 = vsel %vm983_vm4, %v5743_v38, -inf }
 0xab6   :  { %2737 = vmax.xlane.f32.xlu1 %v2736_v1  ;;  %2746 = vmax.xlane.f32.xlu0 %v2745_v34  ;;  %v5749_v14 = vpop.f32.mrf.mxu1 }
 0xab7   :  { %v2739_v59 = vsel %vm983_vm4, %v5749_v14, -inf }
 0xaba   :  { %2740 = vmax.xlane.f32.xlu0 %v2739_v59  ;;  %v1838_v59 = vsel %vm983_vm4, %v5301_v5, 0.0 }
 0xac7   :  { %2893 = vrot.lane.b32.xlu1 %v4869_v54, %s4534_s22 }
 0xad0   :  { %2895 = vrot.lane.b32.xlu0 %v4873_v56, %s4534_s22 }
 0xae9   :  { %v2708_v45 = vpop.xlane.xlu0 %2707 }
 0xaea   :  { %v2750_v1 = vsub.f32 %v5673_v33, %v2708_v45  ;;  %v1868_v45 = vsel %vm983_vm4, %v5375_v4, 0.0  ;;  %v1874_v4 = vsel %vm983_vm4, %v5399_v50, 0.0  ;;  %v2443_v50 = vsel %vm983_vm4, %v5611_v57, 0.0 }
 0xaeb   :  { %1842 = vadd.xlane.f32.xlu1 %v1841_v61 }
 0xaec   :  { %v2768_v52 = vmul.f32 1.442695, %v2750_v1  ;;  %v2425_v1 = vsel %vm983_vm4, %v5594_v3, 0.0  ;;  %v1871_v3 = vsel %vm983_vm4, %v5371_v62, 0.0 }
 0xaed   :  { %v2702_v34 = vpop.xlane.xlu0 %2701 }
 0xaee   :  { %v2748_v19 = vsub.f32 %v5677_v2, %v2702_v34  ;;  %v2416_v2 = vsel %vm983_vm4, %v5545_v55, 0.0  ;;  %v1856_v55 = vsel %vm983_vm4, %v5356_v10, 0.0  ;;  %v2428_v10 = vsel %vm983_vm4, %v5596_v15, 0.0 }
 0xaef   :  { %v2705_v54 = vpop.xlane.xlu1 %2704  ;;  %2411 = vadd.xlane.f32.xlu1 %v2410_v21  ;;  %1839 = vadd.xlane.f32.xlu0 %v1838_v59  ;;  %v1850_v21 = vsel %vm983_vm4, %v5352_v11, 0.0  ;;  %v1862_v15 = vsel %vm983_vm4, %v5369_v7, 0.0  ;;  %v2434_v34 = vsel %vm983_vm4, %v5609_v32, 0.0  ;;  %v2431_v59 = vsel %vm983_vm4, %v5601_v17, 0.0 }
 0xaf0   :  { %v2764_v56 = vmul.f32 1.442695, %v2748_v19  ;;  %v2749_v41 = vsub.f32 %v5683_v27, %v2705_v54  ;;  %v1847_v19 = vsel %vm983_vm4, %v5311_v26, 0.0  ;;  %v1865_v7 = vsel %vm983_vm4, %v5373_v31, 0.0 }
 0xaf1   :  { %v2711_v28 = vpop.xlane.xlu0 %2710  ;;  %v1880_v17 = vsel %vm983_vm4, %v5401_v63, 0.0  ;;  %v2437_v32 = vsel %vm983_vm4, %v5613_v25, 0.0  ;;  %v2446_v31 = vsel %vm983_vm4, %v5639_v22, 0.0  ;;  %v1877_v63 = vsel %vm983_vm4, %v5403_v42, 0.0 }
 0xaf2   :  { %v2766_v61 = vmul.f32 1.442695, %v2749_v41  ;;  %v2751_v33 = vsub.f32 %v5679_v12, %v2711_v28  ;;  %4345 = vpow2.f32 %v2764_v56  ;;  %v2419_v41 = vsel %vm983_vm4, %v5551_v9, 0.0 }
 0xaf3   :  { %2417 = vadd.xlane.f32.xlu1 %v2416_v2  ;;  %1845 = vadd.xlane.f32.xlu0 %v1844_v13  ;;  %v2452_v56 = vsel %vm983_vm4, %v5641_v24, 0.0  ;;  %v1266_v2 = vsel %vm983_vm4, %v5057_v40, 0.0  ;;  %v1883_v24 = vsel %vm983_vm4, %v5405_v0, 0.0  ;;  %v1278_v40 = vsel %vm983_vm4, %v5079_v60, 0.0 }
 0xaf4   :  { %4347 = vpow2.f32 %v2766_v61  ;;  %v2770_v5 = vmul.f32 1.442695, %v2751_v33  ;;  %v2455_v0 = vsel %vm983_vm4, %v5645_v49, 0.0 }
 0xaf5   :  { %4349 = vpow2.f32 %v2768_v52  ;;  %v2422_v52 = vsel %vm983_vm4, %v5592_v16, 0.0 }
 0xaf6   :  { %4351 = vpow2.f32 %v2770_v5 }
 0xaf7   :  { %1851 = vadd.xlane.f32.xlu1 %v1850_v21  ;;  %1848 = vadd.xlane.f32.xlu0 %v1847_v19 }
 0xafb   :  { %1857 = vadd.xlane.f32.xlu1 %v1856_v55  ;;  %2414 = vadd.xlane.f32.xlu0 %v2413_v29  ;;  %v6385_v55 = vld [vmem:[#allocation5_spill] sm:$0xff]  ;;  %v6386_v29 = vld [vmem:[#allocation2_spill] sm:$0xff] }
 0xafc   :  { %v1290_v60 = vsel %vm983_vm4, %v6385_v55, 0.0  ;;  %v1275_v49 = vsel %vm983_vm4, %v6386_v29, 0.0 }
 0xaff   :  { %2423 = vadd.xlane.f32.xlu1 %v2422_v52  ;;  %2420 = vadd.xlane.f32.xlu0 %v2419_v41  ;;  %v5783_v11 = vpop.eup %4345 }
 0xb01   :  { %v5785_v26 = vpop.eup %4347 }
 0xb02   :  { %v5787_v12 = vpop.eup %4349  ;;  %v2796_v16 = vpack.c.bf16 %v5785_v26, %v5783_v11 }
 0xb03   :  { %v5795_v27 = vpop.eup %4351  ;;  %2429 = vadd.xlane.f32.xlu1 %v2428_v10  ;;  %1854 = vadd.xlane.f32.xlu0 %v1853_v44 }
 0xb04   :  { %v2797_v9 = vpack.c.bf16 %v5795_v27, %v5787_v12  ;;  %4030 = vmatprep.mubr.msk.bf16.mxu0 %vm983_vm4, %v2796_v16 }
 0xb06   :  { %4031 = vmatmul.mubr.msk.bf16.vlgmr.msra.gmra.mxu0 %vm983_vm4, %v2797_v9 }
 0xb07   :  { %1863 = vadd.xlane.f32.xlu1 %v1862_v15  ;;  %1860 = vadd.xlane.f32.xlu0 %v1859_v58  ;;  %v6387_v15 = vld [vmem:[#allocation3_spill] sm:$0xff] }
 0xb08   :  { %v1281_v58 = vsel %vm983_vm4, %v6387_v15, 0.0 }
 0xb0b   :  { %1869 = vadd.xlane.f32.xlu1 %v1868_v45  ;;  %2426 = vadd.xlane.f32.xlu0 %v2425_v1  ;;  %v2988_v45 = vsel %vm983_vm4, %v5787_v12, 0.0 }
 0xb0f   :  { %2435 = vadd.xlane.f32.xlu1 %v2434_v34  ;;  %2432 = vadd.xlane.f32.xlu0 %v2431_v59 }
 0xb13   :  { %2441 = vadd.xlane.f32.xlu1 %v2440_v30  ;;  %1866 = vadd.xlane.f32.xlu0 %v1865_v7  ;;  %v6388_v7 = vld [vmem:[#allocation4_spill] sm:$0xff] }
 0xb17   :  { %1875 = vadd.xlane.f32.xlu1 %v1874_v4  ;;  %1872 = vadd.xlane.f32.xlu0 %v1871_v3  ;;  %v1287_v4 = vsel %vm983_vm4, %v6388_v7, 0.0 }
 0xb1b   :  { %1881 = vadd.xlane.f32.xlu1 %v1880_v17  ;;  %2438 = vadd.xlane.f32.xlu0 %v2437_v32  ;;  %v2982_v17 = vsel %vm983_vm4, %v5783_v11, 0.0 }
 0xb1e   :  { %v2720_v53 = vpop.xlane.xlu1 %2719 }
 0xb1f   :  { %2447 = vadd.xlane.f32.xlu1 %v2446_v31  ;;  %2444 = vadd.xlane.f32.xlu0 %v2443_v50  ;;  %v2754_v22 = vsub.f32 %v5691_v46, %v2720_v53  ;;  %v1272_v46 = vsel %vm983_vm4, %v5064_v51, 0.0  ;;  %v1269_v51 = vsel %vm983_vm4, %v5061_v47, 0.0 }
 0xb21   :  { %v2776_v42 = vmul.f32 1.442695, %v2754_v22 }
 0xb22   :  { %v2714_v62 = vpop.xlane.xlu1 %2713  ;;  %v2723_v54 = vpop.xlane.xlu0 %2722 }
 0xb23   :  { %v2752_v25 = vsub.f32 %v5695_v35, %v2714_v62  ;;  %v2755_v28 = vsub.f32 %v5699_v23, %v2723_v54  ;;  %2453 = vadd.xlane.f32.xlu1 %v2452_v56  ;;  %1878 = vadd.xlane.f32.xlu0 %v1877_v63  ;;  %v2449_v23 = vsel %vm983_vm4, %v5643_v39, 0.0  ;;  %v2991_v62 = vsel %vm983_vm4, %v5795_v27, 0.0 }
 0xb25   :  { %v2772_v61 = vmul.f32 1.442695, %v2752_v25  ;;  %v2778_v57 = vmul.f32 1.442695, %v2755_v28 }
 0xb26   :  { %v2717_v33 = vpop.xlane.xlu0 %2716 }
 0xb27   :  { %v2753_v13 = vsub.f32 %v5705_v37, %v2717_v33  ;;  %1267 = vadd.xlane.f32.xlu1 %v1266_v2  ;;  %1884 = vadd.xlane.f32.xlu0 %v1883_v24  ;;  %4353 = vpow2.f32 %v2772_v61  ;;  %v1284_v37 = vsel %vm983_vm4, %v5085_v8, 0.0 }
 0xb28   :  { %4355 = vpow2.f32 %v2778_v57 }
 0xb29   :  { %v2774_v35 = vmul.f32 1.442695, %v2753_v13 }
 0xb2b   :  { %4357 = vpow2.f32 %v2774_v35  ;;  %1273 = vadd.xlane.f32.xlu1 %v1272_v46  ;;  %2450 = vadd.xlane.f32.xlu0 %v2449_v23 }
 0xb2c   :  { %4359 = vpow2.f32 %v2776_v42 }
 0xb2f   :  { %1279 = vadd.xlane.f32.xlu1 %v1278_v40  ;;  %2456 = vadd.xlane.f32.xlu0 %v2455_v0 }
 0xb33   :  { %v2732_v5 = vpop.xlane.xlu1 %2731  ;;  %1285 = vadd.xlane.f32.xlu1 %v1284_v37  ;;  %1270 = vadd.xlane.f32.xlu0 %v1269_v51 }
 0xb34   :  { %v2758_v39 = vsub.f32 %v5721_v48, %v2732_v5  ;;  %v4354_v21 = vpop.eup %4353 }
 0xb35   :  { %v4356_v52 = vpop.eup %4355 }
 0xb36   :  { %v2784_v19 = vmul.f32 1.442695, %v2758_v39 }
 0xb37   :  { %v2726_v41 = vpop.xlane.xlu1 %2725  ;;  %1291 = vadd.xlane.f32.xlu1 %v1290_v60  ;;  %1276 = vadd.xlane.f32.xlu0 %v1275_v49  ;;  %v2735_v8 = vpop.xlane.xlu0 %2734  ;;  %v6390_v60 = vld [vmem:[#allocation9_spill] sm:$0xff] }
 0xb38   :  { %v5858_v10 = vpop.eup %4357  ;;  %v2756_v47 = vsub.f32 %v5725_v43, %v2726_v41  ;;  %v2759_v44 = vsub.f32 %v5727_v20, %v2735_v8  ;;  %4361 = vpow2.f32 %v2784_v19  ;;  %v1302_v29 = vsel %vm983_vm4, %v6390_v60, 0.0  ;;  %v6392_v8 = vld [vmem:[#allocation7_spill] sm:$0xff]  ;;  %v6404_v60 = vld [vmem:[#allocation34_spill] sm:$0xff] }
 0xb39   :  { %v2798_v48 = vpack.c.bf16 %v5858_v10, %v4354_v21  ;;  %v4360_v16 = vpop.eup %4359  ;;  %v2997_v2 = vsel %vm983_vm4, %v5858_v10, 0.0  ;;  %v1293_v10 = vsel %vm983_vm4, %v6392_v8, 0.0 }
 0xb3a   :  { %v2780_v9 = vmul.f32 1.442695, %v2756_v47  ;;  %v2799_v59 = vpack.c.bf16 %v4356_v52, %v4360_v16  ;;  %v2786_v30 = vmul.f32 1.442695, %v2759_v44  ;;  %v3000_v50 = vsel %vm983_vm4, %v4360_v16, 0.0  ;;  %v6393_v47 = vld [vmem:[#allocation6_spill] sm:$0xff] }
 0xb3b   :  { %v2744_v1 = vpop.xlane.xlu1 %2743  ;;  %1282 = vadd.xlane.f32.xlu0 %v1281_v58  ;;  %2989 = vadd.xlane.f32.xlu1 %v2988_v45  ;;  %v2729_v34 = vpop.xlane.xlu0 %2728  ;;  %v1299_v44 = vsel %vm983_vm4, %v6393_v47, 0.0 }
 0xb3c   :  { %v2762_v43 = vsub.f32 %v5735_v6, %v2744_v1  ;;  %4034 = vmatprep.mubr.msk.bf16.mxu0 %vm983_vm4, %v2798_v48  ;;  %v2757_v20 = vsub.f32 %v5733_v36, %v2729_v34  ;;  %4363 = vpow2.f32 %v2780_v9  ;;  %v6394_v48 = vld [vmem:[#allocation12_spill] sm:$0xff]  ;;  %v6395_v9 = vld [vmem:[#allocation10_spill] sm:$0xff] }
 0xb3d   :  { %4035 = vmatmul.mubr.msk.bf16.gmra.mxu0 %vm983_vm4, %v2799_v59  ;;  %4365 = vpow2.f32 %v2786_v30  ;;  %v1305_v16 = vsel %vm983_vm4, %v6394_v48, 0.0  ;;  %v1311_v15 = vsel %vm983_vm4, %v6395_v9, 0.0  ;;  %v6406_v48 = vld [vmem:[#allocation33_spill] sm:$0xff]  ;;  %v6407_v9 = vld [vmem:[#allocation35_spill] sm:$0xff] }
 0xb3e   :  { %v2792_v3 = vmul.f32 1.442695, %v2762_v43  ;;  %v2782_v12 = vmul.f32 1.442695, %v2757_v20 }
 0xb3f   :  { %v2738_v32 = vpop.xlane.xlu1 %2737  ;;  %1288 = vadd.xlane.f32.xlu0 %v1287_v4  ;;  %2983 = vadd.xlane.f32.xlu1 %v2982_v17  ;;  %v2747_v53 = vpop.xlane.xlu0 %2746 }
 0xb40   :  { %v2760_v6 = vsub.f32 %v5741_v18, %v2738_v32  ;;  %v2763_v36 = vsub.f32 %v5743_v38, %v2747_v53  ;;  %4367 = vpow2.f32 %v2782_v12  ;;  %v2994_v18 = vsel %vm983_vm4, %v4354_v21, 0.0  ;;  %v6389_v21 = vld [vmem:[#allocation8_spill] sm:$0xff]  ;;  %v6396_v32 = vld [vmem:[#allocation30_spill] sm:$0xff] }
 0xb41   :  { %4369 = vpow2.f32 %v2792_v3  ;;  %v2985_v38 = vsel %vm983_vm4, %v5785_v26, 0.0  ;;  %v1296_v19 = vsel %vm983_vm4, %v6389_v21, 0.0 }
 0xb42   :  { %v2788_v31 = vmul.f32 1.442695, %v2760_v6  ;;  %v2794_v54 = vmul.f32 1.442695, %v2763_v36  ;;  %v6397_v6 = vld [vmem:[#allocation32_spill] sm:$0xff] }
 0xb43   :  { %3001 = vadd.xlane.f32.xlu1 %v3000_v50  ;;  %2992 = vadd.xlane.f32.xlu0 %v2991_v62  ;;  %v2741_v11 = vpop.xlane.xlu0 %2740  ;;  %v2894_v27 = vpop.permute.xlu1 %2893 }
 0xb44   :  { %v2761_v56 = vsub.f32 %v5749_v14, %v2741_v11  ;;  %4371 = vpow2.f32 %v2788_v31  ;;  %v3003_v14 = vsel %vm983_vm4, %v4356_v52, 0.0  ;;  %v6391_v52 = vld [vmem:[#allocation11_spill] sm:$0xff] }
 0xb45   :  { %v4362_v25 = vpop.eup %4361  ;;  %4373 = vpow2.f32 %v2794_v54  ;;  %v1308_v41 = vsel %vm983_vm4, %v6391_v52, 0.0 }
 0xb46   :  { %v2790_v63 = vmul.f32 1.442695, %v2761_v56  ;;  %v3012_v22 = vsel %vm983_vm4, %v4362_v25, 0.0 }
 0xb47   :  { %2995 = vadd.xlane.f32.xlu1 %v2994_v18  ;;  %2986 = vadd.xlane.f32.xlu0 %v2985_v38  ;;  %v2896_v28 = vpop.permute.xlu0 %2895  ;;  %v6398_v18 = vld [vmem:[#allocation29_spill] sm:$0xff] }
 0xb48   :  { %4375 = vpow2.f32 %v2790_v63  ;;  %4042 = vmatprep.subr.bf16.mxu1 %v2896_v28 }
 0xb49   :  { %4043 = vmatpush3.bf16.msra.mxu1 %v2896_v28  ;;  %v4364_v61 = vpop.eup %4363 }
 0xb4a   :  { %4044 = vmatprep.subr.bf16.mxu1 %v2894_v27  ;;  %v4366_v57 = vpop.eup %4365  ;;  %v3006_v33 = vsel %vm983_vm4, %v4364_v61, 0.0 }
 0xb4b   :  { %3013 = vadd.xlane.f32.xlu1 %v3012_v22  ;;  %3004 = vadd.xlane.f32.xlu0 %v3003_v14  ;;  %v2801_v42 = vpack.c.bf16 %v4366_v57, %v4362_v25  ;;  %v3015_v46 = vsel %vm983_vm4, %v4366_v57, 0.0  ;;  %v6399_v25 = vld [vmem:[#allocation31_spill] sm:$0xff] }
 0xb4d   :  { %4045 = vmatpush3.bf16.msra.mxu1 %v2894_v27  ;;  %v4368_v26 = vpop.eup %4367 }
 0xb4e   :  { %v4370_v24 = vpop.eup %4369  ;;  %v2800_v13 = vpack.c.bf16 %v4368_v26, %v4364_v61  ;;  %v3009_v51 = vsel %vm983_vm4, %v4368_v26, 0.0  ;;  %v6400_v26 = vld [vmem:[#allocation46_spill] sm:$0xff] }
 0xb4f   :  { %3007 = vadd.xlane.f32.xlu1 %v3006_v33  ;;  %2998 = vadd.xlane.f32.xlu0 %v2997_v2  ;;  %v3024_v35 = vsel %vm983_vm4, %v4370_v24, 0.0  ;;  %v6401_v2 = vld [vmem:[#allocation48_spill] sm:$0xff] }
 0xb50   :  { %4046 = vmatprep.mubr.msk.bf16.mxu1 %vm983_vm4, %v2800_v13 }
 0xb51   :  { %4047 = vmatmul.mubr.msk.bf16.vlgmr.msra.gmra.mxu1 %vm983_vm4, %v2801_v42  ;;  %v4372_v23 = vpop.eup %4371 }
 0xb52   :  { %v4374_v40 = vpop.eup %4373  ;;  %v3018_v37 = vsel %vm983_vm4, %v4372_v23, 0.0 }
 0xb53   :  { %3025 = vadd.xlane.f32.xlu1 %v3024_v35  ;;  %3016 = vadd.xlane.f32.xlu0 %v3015_v46  ;;  %v2803_v39 = vpack.c.bf16 %v4374_v40, %v4370_v24  ;;  %v3027_v55 = vsel %vm983_vm4, %v4374_v40, 0.0  ;;  %v6402_v40 = vld [vmem:[#allocation45_spill] sm:$0xff] }
 0xb55   :  { %v4376_v0 = vpop.eup %4375 }
 0xb56   :  { %v2802_v5 = vpack.c.bf16 %v4376_v0, %v4372_v23  ;;  %v3021_v49 = vsel %vm983_vm4, %v4376_v0, 0.0 }
 0xb57   :  { %3019 = vadd.xlane.f32.xlu1 %v3018_v37  ;;  %3010 = vadd.xlane.f32.xlu0 %v3009_v51  ;;  %v6403_v37 = vld [vmem:[#allocation47_spill] sm:$0xff] }
 0xb58   :  { %4050 = vmatprep.mubr.msk.bf16.mxu1 %vm983_vm4, %v2802_v5 }
 0xb59   :  { %4051 = vmatmul.mubr.msk.bf16.gmra.mxu1 %vm983_vm4, %v2803_v39 }
 0xb5b   :  { %1297 = vadd.xlane.f32.xlu1 %v1296_v19  ;;  %3028 = vadd.xlane.f32.xlu0 %v3027_v55 }
 0xb5f   :  { %1303 = vadd.xlane.f32.xlu1 %v1302_v29  ;;  %3022 = vadd.xlane.f32.xlu0 %v3021_v49  ;;  %v6405_v49 = vld [vmem:[#allocation36_spill] sm:$0xff] }
 0xb63   :  { %1309 = vadd.xlane.f32.xlu1 %v1308_v41  ;;  %1294 = vadd.xlane.f32.xlu0 %v1293_v10 }
 0xb67   :  { %1300 = vadd.xlane.f32.xlu0 %v1299_v44 }
 0xb6b   :  { %1306 = vadd.xlane.f32.xlu0 %v1305_v16 }
 0xb6f   :  { %1312 = vadd.xlane.f32.xlu0 %v1311_v15 }
 0xb74   :  { %v1843_v58 = vpop.xlane.xlu1 %1842 }
 0xb75   :  { %4377 = vrcp.f32 %v1843_v58 }
 0xb78   :  { %v2412_v45 = vpop.xlane.xlu1 %2411  ;;  %v1840_v1 = vpop.xlane.xlu0 %1839 }
 0xb79   :  { %4379 = vrcp.f32 %v1840_v1 }
 0xb7c   :  { %v2418_v34 = vpop.xlane.xlu1 %2417  ;;  %v1846_v59 = vpop.xlane.xlu0 %1845 }
 0xb7d   :  { %4381 = vrcp.f32 %v1846_v59 }
 0xb80   :  { %v1852_v30 = vpop.xlane.xlu1 %1851  ;;  %v1849_v43 = vpop.xlane.xlu0 %1848 }
 0xb81   :  { %4383 = vrcp.f32 %v1849_v43 }
 0xb82   :  { %4385 = vrcp.f32 %v2412_v45  ;;  %v4378_v4 = vpop.eup %4377 }
 0xb83   :  { %v1903_v36 = vmul.f32 %v4378_v4, %v6397_v6 }
 0xb84   :  { %v1858_v20 = vpop.xlane.xlu1 %1857  ;;  %v2415_v7 = vpop.xlane.xlu0 %2414 }
 0xb85   :  { %4387 = vrcp.f32 %v2415_v7 }
 0xb86   :  { %v4380_v3 = vpop.eup %4379  ;;  %4389 = vrcp.f32 %v2418_v34 }
 0xb87   :  { %v1902_v53 = vmul.f32 %v4380_v3, %v6396_v32 }
 0xb88   :  { %v2424_v12 = vpop.xlane.xlu1 %2423  ;;  %v2421_v17 = vpop.xlane.xlu0 %2420 }
 0xb89   :  { %4391 = vrcp.f32 %v2421_v17  ;;  %v4123_v31 = vpack.i.bf16 %v1903_v36, %v1902_v53  ;;  %v6410_v53 = vld [vmem:[#allocation49_spill] sm:$0xff]  ;;  %v6411_v36 = vld [vmem:[#allocation51_spill] sm:$0xff] }
 0xb8a   :  { %4393 = vrcp.f32 %v1852_v30  ;;  %v4382_v54 = vpop.eup %4381  ;;  %v6408_v30 = vld [vmem:[#allocation50_spill] sm:$0xff] }
 0xb8b   :  { %4124 = vrot.lane.b32.xlu1 %v4123_v31, %s4535_s23  ;;  %v1904_v38 = vmul.f32 %v4382_v54, %v6398_v18 }
 0xb8c   :  { %v2430_v50 = vpop.xlane.xlu1 %2429  ;;  %v1855_v62 = vpop.xlane.xlu0 %1854 }
 0xb8d   :  { %4395 = vrcp.f32 %v1855_v62 }
 0xb8e   :  { %v4384_v11 = vpop.eup %4383  ;;  %4397 = vrcp.f32 %v1858_v20  ;;  %v6409_v20 = vld [vmem:[#allocation52_spill] sm:$0xff] }
 0xb8f   :  { %v1905_v28 = vmul.f32 %v4384_v11, %v6399_v25  ;;  %v4386_v27 = vpop.eup %4385 }
 0xb90   :  { %v1864_v56 = vpop.xlane.xlu1 %1863  ;;  %v1861_v63 = vpop.xlane.xlu0 %1860  ;;  %v2474_v33 = vmul.f32 %v4386_v27, %v6400_v26 }
 0xb91   :  { %4399 = vrcp.f32 %v1861_v63  ;;  %v4128_v22 = vpack.i.bf16 %v1905_v28, %v1904_v38  ;;  %v6412_v63 = vld [vmem:[#allocation38_spill] sm:$0xff]  ;;  %v6413_v38 = vld [vmem:[#allocation40_spill] sm:$0xff] }
 0xb92   :  { %v4388_v14 = vpop.eup %4387  ;;  %4401 = vrcp.f32 %v2424_v12 }
 0xb93   :  { %4129 = vrot.lane.b32.xlu0 %v4128_v22, %s4535_s23  ;;  %v2475_v24 = vmul.f32 %v4388_v14, %v6401_v2  ;;  %v4390_v13 = vpop.eup %4389 }
 0xb94   :  { %v1870_v61 = vpop.xlane.xlu1 %1869  ;;  %v2427_v57 = vpop.xlane.xlu0 %2426  ;;  %v2476_v0 = vmul.f32 %v4390_v13, %v6402_v40 }
 0xb95   :  { %4403 = vrcp.f32 %v2427_v57  ;;  %v4133_v42 = vpack.i.bf16 %v2475_v24, %v2474_v33  ;;  %v6414_v57 = vld [vmem:[#allocation37_spill] sm:$0xff]  ;;  %v6415_v33 = vld [vmem:[#allocation39_spill] sm:$0xff] }
 0xb96   :  { %v4392_v35 = vpop.eup %4391  ;;  %4405 = vrcp.f32 %v2430_v50 }
 0xb97   :  { %4134 = vrot.lane.b32.xlu1 %v4133_v42, %s4536_s24  ;;  %v2477_v51 = vmul.f32 %v4392_v35, %v6403_v37  ;;  %v4394_v5 = vpop.eup %4393 }
 0xb98   :  { %v5922_v46 = vpop.xlane.xlu1 %2435  ;;  %v2433_v23 = vpop.xlane.xlu0 %2432  ;;  %v1906_v29 = vmul.f32 %v4394_v5, %v6404_v60  ;;  %v6416_v5 = vld [vmem:[#allocation42_spill] sm:$0xff] }
 0xb99   :  { %4407 = vrcp.f32 %v2433_v23  ;;  %v4138_v39 = vpack.i.bf16 %v2477_v51, %v2476_v0 }
 0xb9a   :  { %v4396_v21 = vpop.eup %4395  ;;  %4409 = vrcp.f32 %v1864_v56 }
 0xb9b   :  { %4139 = vrot.lane.b32.xlu1 %v4138_v39, %s4536_s24  ;;  %v1907_v52 = vmul.f32 %v4396_v21, %v6405_v49  ;;  %v4398_v41 = vpop.eup %4397  ;;  %v6417_v21 = vld [vmem:[#allocation44_spill] sm:$0xff] }
 0xb9c   :  { %v5927_v19 = vpop.xlane.xlu1 %2441  ;;  %v1867_v55 = vpop.xlane.xlu0 %1866  ;;  %v1908_v16 = vmul.f32 %v4398_v41, %v6406_v48  ;;  %v6418_v41 = vld [vmem:[#allocation41_spill] sm:$0xff] }
 0xb9d   :  { %4411 = vrcp.f32 %v1867_v55  ;;  %v4143_v8 = vpack.i.bf16 %v1907_v52, %v1906_v29 }
 0xb9e   :  { %v4400_v10 = vpop.eup %4399  ;;  %4413 = vrcp.f32 %v1870_v61 }
 0xb9f   :  { %4144 = vrot.lane.b32.xlu0 %v4143_v8, %s4535_s23  ;;  %v1909_v15 = vmul.f32 %v4400_v10, %v6407_v9  ;;  %v4402_v58 = vpop.eup %4401  ;;  %v6419_v10 = vld [vmem:[#allocation43_spill] sm:$0xff] }
 0xba0   :  { %v1876_v47 = vpop.xlane.xlu1 %1875  ;;  %v1873_v44 = vpop.xlane.xlu0 %1872  ;;  %v2478_v43 = vmul.f32 %v4402_v58, %v6408_v30  ;;  %v6420_v58 = vld [vmem:[#allocation58_spill] sm:$0xff] }
 0xba1   :  { %4415 = vrcp.f32 %v1873_v44  ;;  %v4148_v45 = vpack.i.bf16 %v1909_v15, %v1908_v16 }
 0xba2   :  { %v4404_v1 = vpop.eup %4403  ;;  %4417 = vrcp.f32 %v1876_v47 }
 0xba3   :  { %4149 = vrot.lane.b32.xlu1 %v4148_v45, %s4535_s23  ;;  %v2479_v7 = vmul.f32 %v4404_v1, %v6409_v20  ;;  %v4406_v4 = vpop.eup %4405  ;;  %v6421_v1 = vld [vmem:[#allocation60_spill] sm:$0xff] }
 0xba4   :  { %v1882_v34 = vpop.xlane.xlu1 %1881  ;;  %v5935_v59 = vpop.xlane.xlu0 %2438  ;;  %v2480_v6 = vmul.f32 %v4406_v4, %v6410_v53  ;;  %v6422_v4 = vld [vmem:[#allocation57_spill] sm:$0xff] }
 0xba5   :  { %v4153_v3 = vpack.i.bf16 %v2479_v7, %v2478_v43 }
 0xba6   :  { %v4408_v12 = vpop.eup %4407 }
 0xba7   :  { %4154 = vrot.lane.b32.xlu0 %v4153_v3, %s4536_s24  ;;  %v2481_v31 = vmul.f32 %v4408_v12, %v6411_v36  ;;  %v4410_v50 = vpop.eup %4409  ;;  %v6423_v12 = vld [vmem:[#allocation59_spill] sm:$0xff] }
 0xba8   :  { %v2448_v17 = vpop.xlane.xlu1 %2447  ;;  %v2445_v32 = vpop.xlane.xlu0 %2444  ;;  %v1910_v18 = vmul.f32 %v4410_v50, %v6412_v63 }
 0xba9   :  { %v4158_v62 = vpack.i.bf16 %v2481_v31, %v2480_v6 }
 0xbaa   :  { %v4412_v54 = vpop.eup %4411 }
 0xbab   :  { %4159 = vrot.lane.b32.xlu1 %v4158_v62, %s4536_s24  ;;  %v1911_v25 = vmul.f32 %v4412_v54, %v6413_v38  ;;  %v4414_v28 = vpop.eup %4413 }
 0xbac   :  { %v2454_v11 = vpop.xlane.xlu1 %2453  ;;  %v1879_v56 = vpop.xlane.xlu0 %1878  ;;  %v1912_v26 = vmul.f32 %v4414_v28, %v6414_v57 }
 0xbad   :  { %4419 = vrcp.f32 %v1879_v56  ;;  %v4163_v27 = vpack.i.bf16 %v1911_v25, %v1910_v18 }
 0xbae   :  { %v4416_v22 = vpop.eup %4415  ;;  %4421 = vrcp.f32 %v1882_v34 }
 0xbaf   :  { %4164 = vrot.lane.b32.xlu0 %v4163_v27, %s4535_s23  ;;  %v1913_v2 = vmul.f32 %v4416_v22, %v6415_v33  ;;  %v4418_v40 = vpop.eup %4417  ;;  %v6424_v22 = vld [vmem:[#allocation55_spill] sm:$0xff] }
 0xbb0   :  { %v5946_v14 = vpop.xlane.xlu1 %1267  ;;  %v1885_v61 = vpop.xlane.xlu0 %1884  ;;  %v5960_v39 = vmul.f32 %v4418_v40, %v6416_v5  ;;  %v6426_v5 = vld [vmem:[#allocation56_spill] sm:$0xff] }
 0xbb1   :  { %4423 = vrcp.f32 %v1885_v61  ;;  %v4168_v24 = vpack.i.bf16 %v1913_v2, %v1912_v26  ;;  %v6425_v2 = vld [vmem:[#allocation53_spill] sm:$0xff] }
 0xbb2   :  { %4425 = vrcp.f32 %v2448_v17 }
 0xbb3   :  { %4169 = vrot.lane.b32.xlu1 %v4168_v24, %s4535_s23 }
 0xbb4   :  { %v5951_v13 = vpop.xlane.xlu1 %1273  ;;  %v2451_v42 = vpop.xlane.xlu0 %2450 }
 0xbb5   :  { %4427 = vrcp.f32 %v2451_v42 }
 0xbb6   :  { %4429 = vrcp.f32 %v2454_v11  ;;  %v4245_v11 = vld [vmem:[%s6312_s7 + $0x8] sm:$0xff]  }
 0xbb7   :  { %4054 = vmatprep.subr.bf16.mxu0 %v4245_v11 }
 0xbb8   :  { %v5953_v35 = vpop.xlane.xlu1 %1279  ;;  %v2457_v23 = vpop.xlane.xlu0 %2456  ;;  %4055 = vmatpush3.bf16.msra.mxu0 %v4245_v11 }
 0xbb9   :  { %4431 = vrcp.f32 %v2457_v23 }
 0xbba   :  { %v4420_v0 = vpop.eup %4419 }
 0xbbb   :  { %v5963_v55 = vmul.f32 %v4420_v0, %v6417_v21  ;;  %v4422_v60 = vpop.eup %4421 }
 0xbbc   :  { %v5955_v37 = vpop.xlane.xlu1 %1285  ;;  %v5957_v51 = vpop.xlane.xlu0 %1270  ;;  %v5970_v8 = vmul.f32 %v4422_v60, %v6418_v41  ;;  %v6427_v60 = vld [vmem:[#allocation54_spill] sm:$0xff] }
 0xbbd   :  { %v4203_v29 = vpack.i.bf16 %v5963_v55, %v5960_v39 }
 0xbbe   :  { %v4424_v49 = vpop.eup %4423 }
 0xbbf   :  { %v5973_v47 = vmul.f32 %v4424_v49, %v6419_v10  ;;  %v4426_v44 = vpop.eup %4425 }
 0xbc0   :  { %v5967_v52 = vpop.xlane.xlu0 %1276  ;;  %v5975_v48 = vpop.xlane.xlu1 %1291  ;;  %v5982_v45 = vmul.f32 %v4426_v44, %v6420_v58 }
 0xbc1   :  { %v4208_v16 = vpack.i.bf16 %v5973_v47, %v5970_v8 }
 0xbc2   :  { %v4428_v9 = vpop.eup %4427 }
 0xbc3   :  { %v5985_v34 = vmul.f32 %v4428_v9, %v6421_v1  ;;  %v4430_v30 = vpop.eup %4429 }
 0xbc4   :  { %v5979_v15 = vpop.xlane.xlu0 %1282  ;;  %v2990_v7 = vpop.xlane.xlu1 %2989  ;;  %v5990_v3 = vmul.f32 %v4430_v30, %v6422_v4 }
 0xbc5   :  { %v4223_v43 = vpack.i.bf16 %v5985_v34, %v5982_v45  ;;  %4433 = vrcp.f32 %v2990_v7 }
 0xbc6   :  { %v4432_v20 = vpop.eup %4431  ;;  %4435 = vrcp.f32 %v2445_v32  ;;  %v4032_v62 = vpop.f32.mrf.mxu0 }
 0xbc7   :  { %v5993_v17 = vmul.f32 %v4432_v20, %v6423_v12 }
 0xbc8   :  { %v5995_v53 = vpop.xlane.xlu0 %1288  ;;  %v2984_v36 = vpop.xlane.xlu1 %2983 }
 0xbc9   :  { %v4228_v6 = vpack.i.bf16 %v5993_v17, %v5990_v3  ;;  %v2862_v54 = vpop.f32.mrf.mxu0 }
 0xbcc   :  { %v2993_v31 = vpop.xlane.xlu0 %2992  ;;  %v3002_v10 = vpop.xlane.xlu1 %3001 }
 0xbcd   :  { %4437 = vrcp.f32 %v2993_v31 }
 0xbce   :  { %4439 = vrcp.f32 %v5927_v19  ;;  %v4246_v19 = vld [vmem:[%s6312_s7] sm:$0xff]  }
 0xbcf   :  { %4441 = vrcp.f32 %v2984_v36  ;;  %4056 = vmatprep.subr.bf16.mxu0 %v4246_v19 }
 0xbd0   :  { %4443 = vrcp.f32 %v5935_v59  ;;  %v2987_v50 = vpop.xlane.xlu0 %2986  ;;  %v4033_v59 = vpop.f32.mrf.mxu0  ;;  %4057 = vmatpush3.bf16.msra.mxu0 %v4246_v19 }
 0xbd1   :  { %4445 = vrcp.f32 %v2987_v50  ;;  %v2996_v9 = vpop.xlane.xlu1 %2995 }
 0xbd2   :  { %4447 = vrcp.f32 %v5922_v46  ;;  %v4434_v56 = vpop.eup %4433  ;;  %v2865_v26 = vpop.f32.mrf.mxu0 }
 0xbd3   :  { %v4436_v32 = vpop.eup %4435  ;;  %v3048_v38 = vmul.f32 %v4434_v56, %v4032_v62  ;;  %4449 = vrcp.f32 %v3002_v10 }
 0xbd4   :  { %v2485_v61 = vmul.f32 %v4436_v32, %v6424_v22  ;;  %v3005_v44 = vpop.xlane.xlu0 %3004 }
 0xbd5   :  { %4451 = vrcp.f32 %v3005_v44  ;;  %v3014_v1 = vpop.xlane.xlu1 %3013 }
 0xbd6   :  { %4453 = vrcp.f32 %v2996_v9 }
 0xbd8   :  { %v2999_v58 = vpop.xlane.xlu0 %2998 }
 0xbd9   :  { %4455 = vrcp.f32 %v2999_v58  ;;  %v3008_v11 = vpop.xlane.xlu1 %3007 }
 0xbda   :  { %v4438_v63 = vpop.eup %4437  ;;  %4457 = vrcp.f32 %v3014_v1 }
 0xbdb   :  { %v4440_v18 = vpop.eup %4439  ;;  %v3049_v25 = vmul.f32 %v4438_v63, %v4033_v59 }
 0xbdc   :  { %v4442_v46 = vpop.eup %4441  ;;  %v2484_v24 = vmul.f32 %v4440_v18, %v6425_v2  ;;  %v3017_v20 = vpop.xlane.xlu0 %3016 }
 0xbdd   :  { %v4444_v28 = vpop.eup %4443  ;;  %v4173_v27 = vpack.i.bf16 %v3049_v25, %v3048_v38  ;;  %v3046_v33 = vmul.f32 %v4442_v46, %v2862_v54  ;;  %v3026_v38 = vpop.xlane.xlu1 %3025  ;;  %4459 = vrcp.f32 %v3017_v20 }
 0xbde   :  { %v4446_v57 = vpop.eup %4445  ;;  %v4188_v40 = vpack.i.bf16 %v2485_v61, %v2484_v24  ;;  %v2483_v21 = vmul.f32 %v4444_v28, %v6426_v5  ;;  %4461 = vrcp.f32 %v3008_v11 }
 0xbdf   :  { %4174 = vrot.lane.b32.xlu1 %v4173_v27, %s4537_s4  ;;  %v3047_v42 = vmul.f32 %v4446_v57, %v2865_v26  ;;  %v4448_v23 = vpop.eup %4447 }
 0xbe0   :  { %v2482_v49 = vmul.f32 %v4448_v23, %v6427_v60  ;;  %v4450_v4 = vpop.eup %4449  ;;  %v3011_v32 = vpop.xlane.xlu0 %3010 }
 0xbe1   :  { %v4178_v0 = vpack.i.bf16 %v3047_v42, %v3046_v33  ;;  %4463 = vrcp.f32 %v3011_v32  ;;  %v3020_v46 = vpop.xlane.xlu1 %3019 }
 0xbe2   :  { %v4183_v41 = vpack.i.bf16 %v2483_v21, %v2482_v49  ;;  %v4452_v12 = vpop.eup %4451  ;;  %4465 = vrcp.f32 %v3026_v38 }
 0xbe3   :  { %4189 = vrot.lane.b32.xlu1 %v4188_v40, %s4536_s24  ;;  %4179 = vrot.lane.b32.xlu0 %v4178_v0, %s4537_s4  ;;  %v4454_v31 = vpop.eup %4453 }
 0xbe4   :  { %v3029_v25 = vpop.xlane.xlu0 %3028 }
 0xbe5   :  { %4467 = vrcp.f32 %v3029_v25 }
 0xbe6   :  { %v4456_v54 = vpop.eup %4455  ;;  %4469 = vrcp.f32 %v3020_v46 }
 0xbe7   :  { %4184 = vrot.lane.b32.xlu0 %v4183_v41, %s4536_s24  ;;  %v4458_v61 = vpop.eup %4457 }
 0xbe8   :  { %v3023_v28 = vpop.xlane.xlu0 %3022 }
 0xbe9   :  { %4471 = vrcp.f32 %v3023_v28 }
 0xbea   :  { %v4460_v57 = vpop.eup %4459  ;;  %4473 = vrcp.f32 %v5951_v13 }
 0xbeb   :  { %v4462_v33 = vpop.eup %4461  ;;  %4475 = vrcp.f32 %v5967_v52 }
 0xbec   :  { %v6042_v3 = vpop.xlane.xlu0 %1294  ;;  %4477 = vrcp.f32 %v5946_v14 }
 0xbed   :  { %4479 = vrcp.f32 %v5957_v51 }
 0xbee   :  { %4481 = vrcp.f32 %v5953_v35 }
 0xbef   :  { %4483 = vrcp.f32 %v5955_v37 }
 0xbf0   :  { %4485 = vrcp.f32 %v5995_v53 }
 0xbf1   :  { %4487 = vrcp.f32 %v5979_v15  ;;  %v6432_v15 = vld [vmem:[#allocation18_spill] sm:$0xff] }
 0xbf2   :  { %4489 = vrcp.f32 %v5975_v48 }
 0xbfd   :  { %v4036_v30 = vpop.f32.mrf.mxu0 }
 0xbfe   :  { %v3052_v50 = vmul.f32 %v4450_v4, %v4036_v30  ;;  %v6038_v30 = vpop.xlane.xlu1 %1297 }
 0xbff   :  { %v2878_v7 = vpop.f32.mrf.mxu0  ;;  %4491 = vrcp.f32 %v6038_v30 }
 0xc00   :  { %v3050_v19 = vmul.f32 %v4454_v31, %v2878_v7 }
 0xc01   :  { %v4037_v36 = vpop.f32.mrf.mxu0 }
 0xc02   :  { %v3053_v62 = vmul.f32 %v4452_v12, %v4037_v36  ;;  %v6040_v20 = vpop.xlane.xlu1 %1303 }
 0xc03   :  { %v2881_v56 = vpop.f32.mrf.mxu0 }
 0xc04   :  { %v4193_v63 = vpack.i.bf16 %v3053_v62, %v3052_v50  ;;  %v3051_v59 = vmul.f32 %v4456_v54, %v2881_v56 }
 0xc06   :  { %v4198_v18 = vpack.i.bf16 %v3051_v59, %v3050_v19  ;;  %4194 = vrot.lane.b32.xlu1 %v4193_v63, %s4537_s4  ;;  %v6044_v17 = vpop.xlane.xlu1 %1309  ;;  %v6428_v63 = vld [vmem:[#allocation13_spill] sm:$0xff]  ;;  %v6429_v59 = vld [vmem:[#allocation15_spill] sm:$0xff] }
 0xc08   :  { %4199 = vrot.lane.b32.xlu0 %v4198_v18, %s4537_s4 }
 0xc0a   :  { %4209 = vrot.lane.b32.xlu1 %v4208_v16, %s4535_s23  ;;  %v4464_v16 = vpop.eup %4463  ;;  %v4125_v7 = vpop.permute.xlu1 %4124 }
 0xc0b   :  { %v4466_v40 = vpop.eup %4465  ;;  %v4127_v25 = vunpack.i.h.bf16 %v4125_v7  ;;  %v4126_v46 = vunpack.i.l.bf16 %v4125_v7 }
 0xc0c   :  { %4204 = vrot.lane.b32.xlu0 %v4203_v29, %s4535_s23  ;;  %v4468_v0 = vpop.eup %4467 }
 0xc0d   :  { %v4470_v21 = vpop.eup %4469 }
 0xc0e   :  { %v4472_v41 = vpop.eup %4471  ;;  %v4135_v45 = vpop.permute.xlu1 %4134 }
 0xc0f   :  { %v4474_v62 = vpop.eup %4473 }
 0xc10   :  { %v4476_v54 = vpop.eup %4475  ;;  %v1332_v51 = vmul.f32 %v4474_v62, %v6428_v63 }
 0xc11   :  { %v4048_v27 = vpop.f32.mrf.mxu1  ;;  %v4478_v14 = vpop.eup %4477  ;;  %v1333_v18 = vmul.f32 %v4476_v54, %v6429_v59 }
 0xc12   :  { %v3056_v8 = vmul.f32 %v4458_v61, %v4048_v27  ;;  %v4480_v38 = vpop.eup %4479 }
 0xc13   :  { %v2951_v22 = vpop.f32.mrf.mxu1 }
 0xc14   :  { %v3054_v24 = vmul.f32 %v4462_v33, %v2951_v22  ;;  %v4137_v33 = vunpack.i.h.bf16 %v4135_v45 }
 0xc15   :  { %v4049_v26 = vpop.f32.mrf.mxu1 }
 0xc16   :  { %v3057_v47 = vmul.f32 %v4460_v57, %v4049_v26 }
 0xc17   :  { %v2954_v2 = vpop.f32.mrf.mxu1 }
 0xc18   :  { %v4213_v42 = vpack.i.bf16 %v3057_v47, %v3056_v8  ;;  %v3055_v39 = vmul.f32 %v4464_v16, %v2954_v2  ;;  %v4136_v8 = vunpack.i.l.bf16 %v4135_v45  ;;  %v6430_v2 = vld [vmem:[#allocation14_spill] sm:$0xff] }
 0xc19   :  { %v4052_v55 = vpop.f32.mrf.mxu1 }
 0xc1a   :  { %v4218_v29 = vpack.i.bf16 %v3055_v39, %v3054_v24  ;;  %4214 = vrot.lane.b32.xlu1 %v4213_v42, %s4537_s4  ;;  %v3060_v60 = vmul.f32 %v4466_v40, %v4052_v55  ;;  %v1330_v24 = vmul.f32 %v4478_v14, %v6430_v2  ;;  %v6431_v42 = vld [vmem:[#allocation16_spill] sm:$0xff]  ;;  %v6434_v14 = vld [vmem:[#allocation19_spill] sm:$0xff] }
 0xc1b   :  { %v2967_v23 = vpop.f32.mrf.mxu1  ;;  %v1331_v39 = vmul.f32 %v4480_v38, %v6431_v42 }
 0xc1c   :  { %4219 = vrot.lane.b32.xlu0 %v4218_v29, %s4537_s4  ;;  %v3058_v44 = vmul.f32 %v4470_v21, %v2967_v23 }
 0xc1d   :  { %v4053_v5 = vpop.f32.mrf.mxu1 }
 0xc1e   :  { %v3061_v49 = vmul.f32 %v4468_v0, %v4053_v5  ;;  %4229 = vrot.lane.b32.xlu1 %v4228_v6, %s4536_s24  ;;  %v6046_v6 = vpop.xlane.xlu0 %1300  ;;  %v3254_v0 = vsel %vm174_vm3, %v1330_v24, %v4126_v46  ;;  %v3255_v5 = vsel %vm174_vm3, %v1331_v39, %v4127_v25 }
 0xc1f   :  { %v2970_v10 = vpop.f32.mrf.mxu1  ;;  %4493 = vrcp.f32 %v6046_v6 }
 0xc20   :  { %v4238_v9 = vpack.i.bf16 %v3061_v49, %v3060_v60  ;;  %v3059_v58 = vmul.f32 %v4472_v41, %v2970_v10  ;;  %4224 = vrot.lane.b32.xlu0 %v4223_v43, %s4536_s24  ;;  %v4140_v43 = vpop.permute.xlu1 %4139  ;;  %v3271_v49 = vsel %vm3270_vm5, %v3254_v0, %v4136_v8  ;;  %v3272_v41 = vsel %vm3270_vm5, %v3255_v5, %v4137_v33 }
 0xc21   :  { %v4142_v32 = vunpack.i.h.bf16 %v4140_v43  ;;  %v4141_v19 = vunpack.i.l.bf16 %v4140_v43  ;;  %4495 = vrcp.f32 %v6042_v3 }
 0xc22   :  { %v4233_v1 = vpack.i.bf16 %v3059_v58, %v3058_v44  ;;  %4239 = vrot.lane.b32.xlu1 %v4238_v9, %s4537_s4  ;;  %v6048_v4 = vpop.xlane.xlu0 %1306  ;;  %v4482_v58 = vpop.eup %4481  ;;  %4497 = vrcp.f32 %v6040_v20 }
 0xc23   :  { %4499 = vrcp.f32 %v6044_v17 }
 0xc24   :  { %4234 = vrot.lane.b32.xlu0 %v4233_v1, %s4537_s4  ;;  %v6056_v36 = vpop.permute.xlu1 %4149  ;;  %v4484_v1 = vpop.eup %4483 }
 0xc25   :  { %v4486_v7 = vpop.eup %4485  ;;  %v4151_v62 = vunpack.i.l.bf16 %v6056_v36 }
 0xc26   :  { %v6052_v34 = vpop.xlane.xlu0 %1312  ;;  %v4488_v43 = vpop.eup %4487  ;;  %v1337_v63 = vmul.f32 %v4486_v7, %v6434_v14 }
 0xc27   :  { %v4490_v6 = vpop.eup %4489  ;;  %4501 = vrcp.f32 %v6052_v34  ;;  %v6436_v34 = vld [vmem:[#allocation21_spill] sm:$0xff] }
 0xc28   :  { %v6060_v50 = vpop.permute.xlu1 %4159  ;;  %v4492_v39 = vpop.eup %4491  ;;  %4503 = vrcp.f32 %v6048_v4 }
 0xc29   :  { %v4162_v37 = vunpack.i.h.bf16 %v6060_v50  ;;  %v4161_v53 = vunpack.i.l.bf16 %v6060_v50 }
 0xc2a   :  { %v4130_v12 = vpop.permute.xlu0 %4129 }
 0xc2b   :  { %v4132_v52 = vunpack.i.h.bf16 %v4130_v12  ;;  %v4131_v56 = vunpack.i.l.bf16 %v4130_v12  ;;  %v4152_v12 = vunpack.i.h.bf16 %v6056_v36  ;;  %v6435_v36 = vld [vmem:[#allocation20_spill] sm:$0xff] }
 0xc2c   :  { %v6064_v13 = vpop.permute.xlu1 %4169  ;;  %v4494_v3 = vpop.eup %4493 }
 0xc2d   :  { %v3257_v22 = vsel %vm174_vm3, %v1333_v18, %v4132_v52  ;;  %v3256_v61 = vsel %vm174_vm3, %v1332_v51, %v4131_v56  ;;  %v1334_v56 = vmul.f32 %v4482_v58, %v6432_v15  ;;  %v1335_v51 = vmul.f32 %v4488_v43, %v6435_v36 }
 0xc2e   :  { %v6058_v31 = vpop.permute.xlu0 %4144  ;;  %v3273_v47 = vsel %vm3270_vm5, %v3256_v61, %v4141_v19  ;;  %v3274_v16 = vsel %vm3270_vm5, %v3257_v22, %v4142_v32  ;;  %v6433_v32 = vld [vmem:[#allocation17_spill] sm:$0xff]  ;;  %v3261_v38 = vsel %vm174_vm3, %v1337_v63, %v4152_v12 }
 0xc2f   :  { %v4147_v54 = vunpack.i.h.bf16 %v6058_v31  ;;  %v4146_v35 = vunpack.i.l.bf16 %v6058_v31  ;;  %v1336_v19 = vmul.f32 %v4484_v1, %v6433_v32  ;;  %v3278_v30 = vsel %vm3270_vm5, %v3261_v38, %v4162_v37 }
 0xc31   :  { %v3260_v50 = vsel %vm174_vm3, %v1336_v19, %v4151_v62  ;;  %v3259_v46 = vsel %vm174_vm3, %v1335_v51, %v4147_v54 }
 0xc32   :  { %v6062_v11 = vpop.permute.xlu0 %4154  ;;  %v3277_v22 = vsel %vm3270_vm5, %v3260_v50, %v4161_v53 }
 0xc33   :  { %v4157_v31 = vunpack.i.h.bf16 %v6062_v11  ;;  %v4156_v59 = vunpack.i.l.bf16 %v6062_v11 }
 0xc36   :  { %v6068_v28 = vpop.permute.xlu0 %4164 }
 0xc37   :  { %v4167_v0 = vunpack.i.h.bf16 %v6068_v28  ;;  %v4166_v5 = vunpack.i.l.bf16 %v6068_v28 }
 0xc51   :  { %v4175_v27 = vpop.permute.xlu1 %4174 }
 0xc52   :  { %v4177_v57 = vunpack.i.h.bf16 %v4175_v27  ;;  %v4176_v26 = vunpack.i.l.bf16 %v4175_v27  ;;  %v3258_v27 = vsel %vm174_vm3, %v1334_v56, %v4146_v35 }
 0xc53   :  { %v3275_v8 = vsel %vm3270_vm5, %v3258_v27, %v4156_v59 }
 0xc54   :  { %v3290_v55 = vsel %vm3287_vm6, %v3273_v47, %v4176_v26  ;;  %v3291_v29 = vsel %vm3287_vm6, %v3274_v16, %v4177_v57  ;;  %v3276_v47 = vsel %vm3270_vm5, %v3259_v46, %v4157_v31 }
 0xc55   :  { %v3305_v23 = vpack.c.bf16 %v3291_v29, %v3290_v55  ;;  %v4180_v40 = vpop.permute.xlu0 %4179  ;;  %v6090_v45 = vpop.permute.xlu1 %4189 }
 0xc56   :  { %v4182_v21 = vunpack.i.h.bf16 %v4180_v40  ;;  %v4181_v60 = vunpack.i.l.bf16 %v4180_v40  ;;  %v4496_v29 = vpop.eup %4495  ;;  %v4171_v40 = vunpack.i.l.bf16 %v6064_v13  ;;  %v4192_v20 = vunpack.i.h.bf16 %v6090_v45 }
 0xc57   :  { %v4191_v17 = vunpack.i.l.bf16 %v6090_v45  ;;  %v4498_v12 = vpop.eup %4497 }
 0xc58   :  { %v3289_v10 = vsel %vm3287_vm6, %v3272_v41, %v4182_v21  ;;  %v3288_v44 = vsel %vm3287_vm6, %v3271_v49, %v4181_v60  ;;  %v1340_v60 = vmul.f32 %v4492_v39, %v6436_v34  ;;  %v6437_v49 = vld [vmem:[#allocation23_spill] sm:$0xff]  ;;  %v6438_v41 = vld [vmem:[#allocation22_spill] sm:$0xff]  ;;  %v4500_v15 = vpop.eup %4499 }
 0xc59   :  { %v3304_v9 = vpack.c.bf16 %v3289_v10, %v3288_v44  ;;  %v6098_v52 = vpop.permute.xlu0 %4184  ;;  %v1341_v4 = vmul.f32 %v4494_v3, %v6437_v49  ;;  %v1338_v10 = vmul.f32 %v4490_v6, %v6438_v41  ;;  %v6439_v44 = vld [vmem:[#allocation24_spill] sm:$0xff]  ;;  %v4502_v14 = vpop.eup %4501 }
 0xc5a   :  { %v4187_v58 = vunpack.i.h.bf16 %v6098_v52  ;;  %v3264_v28 = vsel %vm174_vm3, %v1340_v60, %v4171_v40 }
 0xc5b   :  { %4058 = vmatprep.mubr.msk.bf16.mxu0 %vm54_vm0, %v3304_v9  ;;  %v1339_v9 = vmul.f32 %v4496_v29, %v6439_v44  ;;  %v3262_v54 = vsel %vm174_vm3, %v1338_v10, %v4166_v5  ;;  %v3281_v35 = vsel %vm3270_vm5, %v3264_v28, %v4191_v17 }
 0xc5c   :  { %4059 = vmatmul.mubr.msk.bf16.vlgmr.msra.gmra.mxu0 %vm54_vm0, %v3305_v23  ;;  %v4172_v23 = vunpack.i.h.bf16 %v6064_v13  ;;  %v4186_v13 = vunpack.i.l.bf16 %v6098_v52 }
 0xc5d   :  { %v3263_v62 = vsel %vm174_vm3, %v1339_v9, %v4167_v0 }
 0xc5e   :  { %v3265_v7 = vsel %vm174_vm3, %v1341_v4, %v4172_v23  ;;  %v3279_v63 = vsel %vm3270_vm5, %v3262_v54, %v4186_v13  ;;  %v3280_v36 = vsel %vm3270_vm5, %v3263_v62, %v4187_v58  ;;  %v6175_v58 = vld [vmem:[%s6313_s8] ss:$0 sm:$0xff] }
 0xc5f   :  { %v3282_v37 = vsel %vm3270_vm5, %v3265_v7, %v4192_v20  ;;  %v4505_v7 = vld [vmem:[%s6306_s0 + $0x10] sm:$0xff]  ;;  %v4506_v62 = vld [vmem:[%s6306_s0] sm:$0xff] }
 0xc78   :  { %v4195_v18 = vpop.permute.xlu1 %4194 }
 0xc79   :  { %v4197_v48 = vunpack.i.h.bf16 %v4195_v18  ;;  %v4196_v25 = vunpack.i.l.bf16 %v4195_v18  ;;  %v4504_v18 = vpop.eup %4503 }
 0xc7a   :  { %v4200_v61 = vpop.permute.xlu0 %4199 }
 0xc7b   :  { %v3295_v57 = vsel %vm3287_vm6, %v3278_v30, %v4197_v48  ;;  %v3294_v11 = vsel %vm3287_vm6, %v3277_v22, %v4196_v25  ;;  %v4202_v26 = vunpack.i.h.bf16 %v4200_v61  ;;  %v4201_v33 = vunpack.i.l.bf16 %v4200_v61 }
 0xc7c   :  { %v3307_v16 = vpack.c.bf16 %v3295_v57, %v3294_v11  ;;  %v4210_v55 = vpop.permute.xlu1 %4209  ;;  %v6440_v57 = vld [vmem:[#allocation25_spill] sm:$0xff] }
 0xc7d   :  { %v3292_v2 = vsel %vm3287_vm6, %v3275_v8, %v4201_v33  ;;  %v3293_v24 = vsel %vm3287_vm6, %v3276_v47, %v4202_v26  ;;  %v4212_v51 = vunpack.i.h.bf16 %v4210_v55  ;;  %v4211_v50 = vunpack.i.l.bf16 %v4210_v55  ;;  %v6441_v26 = vld [vmem:[#allocation27_spill] sm:$0xff]  ;;  %v6442_v8 = vld [vmem:[#allocation26_spill] sm:$0xff] }
 0xc7e   :  { %v3306_v42 = vpack.c.bf16 %v3293_v24, %v3292_v2  ;;  %v4205_v21 = vpop.permute.xlu0 %4204  ;;  %v1344_v11 = vmul.f32 %v4500_v15, %v6440_v57  ;;  %v1345_v33 = vmul.f32 %v4502_v14, %v6441_v26  ;;  %v1342_v47 = vmul.f32 %v4498_v12, %v6442_v8  ;;  %v4513_v26 = vld [vmem:[%s6306_s0 + $0x50] sm:$0xff] }
 0xc7f   :  { %v4207_v38 = vunpack.i.h.bf16 %v4205_v21  ;;  %v4206_v46 = vunpack.i.l.bf16 %v4205_v21 }
 0xc80   :  { %4062 = vmatprep.mubr.msk.bf16.mxu0 %vm54_vm0, %v3306_v42  ;;  %v3268_v39 = vsel %vm174_vm3, %v1344_v11, %v4211_v50  ;;  %v3269_v3 = vsel %vm174_vm3, %v1345_v33, %v4212_v51 }
 0xc81   :  { %4063 = vmatmul.mubr.msk.bf16.gmra.mxu0 %vm54_vm0, %v3307_v16  ;;  %v6443_v16 = vld [vmem:[#allocation28_spill] sm:$0xff]  ;;  %v3266_v40 = vsel %vm174_vm3, %v1342_v47, %v4206_v46 }
 0xc82   :  { %v1343_v2 = vmul.f32 %v4504_v18, %v6443_v16  ;;  %v4510_v18 = vld [vmem:[%s6306_s0 + $0x20] sm:$0xff] }
 0xc83   :  { %v4514_v16 = vld [vmem:[%s6306_s0 + $0x40] sm:$0xff] }
 0xc84   :  { %v3267_v23 = vsel %vm174_vm3, %v1343_v2, %v4207_v38 }
 0xc8c   :  { %v4215_v1 = vpop.permute.xlu1 %4214 }
 0xc8d   :  { %v4217_v43 = vunpack.i.h.bf16 %v4215_v1  ;;  %v4216_v45 = vunpack.i.l.bf16 %v4215_v1 }
 0xc8e   :  { %v4220_v53 = vpop.permute.xlu0 %4219 }
 0xc8f   :  { %v3298_v52 = vsel %vm3287_vm6, %v3281_v35, %v4216_v45  ;;  %v3299_v56 = vsel %vm3287_vm6, %v3282_v37, %v4217_v43  ;;  %v4222_v32 = vunpack.i.h.bf16 %v4220_v53  ;;  %v4221_v19 = vunpack.i.l.bf16 %v4220_v53  ;;  %v4507_v53 = vld [vmem:[%s6306_s0 + $0x18] sm:$0xff] }
 0xc90   :  { %v3309_v31 = vpack.c.bf16 %v3299_v56, %v3298_v52  ;;  %v4230_v59 = vpop.permute.xlu1 %4229  ;;  %v4508_v56 = vld [vmem:[%s6306_s0 + $0x8] sm:$0xff] }
 0xc91   :  { %v3296_v48 = vsel %vm3287_vm6, %v3279_v63, %v4221_v19  ;;  %v3297_v25 = vsel %vm3287_vm6, %v3280_v36, %v4222_v32  ;;  %v4232_v22 = vunpack.i.h.bf16 %v4230_v59  ;;  %v4231_v30 = vunpack.i.l.bf16 %v4230_v59  ;;  %v4509_v36 = vld [vmem:[%s6306_s0 + $0x30] sm:$0xff] }
 0xc92   :  { %v3308_v27 = vpack.c.bf16 %v3297_v25, %v3296_v48  ;;  %v4225_v61 = vpop.permute.xlu0 %4224  ;;  %v4511_v25 = vld [vmem:[%s6306_s0 + $0x38] sm:$0xff] }
 0xc93   :  { %v4227_v24 = vunpack.i.h.bf16 %v4225_v61  ;;  %v4226_v42 = vunpack.i.l.bf16 %v4225_v61  ;;  %v3285_v0 = vsel %vm3270_vm5, %v3268_v39, %v4231_v30  ;;  %v3286_v5 = vsel %vm3270_vm5, %v3269_v3, %v4232_v22  ;;  %v4512_v22 = vld [vmem:[%s6306_s0 + $0x28] sm:$0xff] }
 0xc94   :  { %v4240_v6 = vpop.permute.xlu1 %4239  ;;  %4066 = vmatprep.mubr.msk.bf16.mxu0 %vm54_vm0, %v3308_v27 }
 0xc95   :  { %v4242_v55 = vunpack.i.h.bf16 %v4240_v6  ;;  %v4241_v29 = vunpack.i.l.bf16 %v4240_v6  ;;  %4067 = vmatmul.mubr.msk.bf16.gmra.mxu0 %vm54_vm0, %v3309_v31  ;;  %v3283_v49 = vsel %vm3270_vm5, %v3266_v40, %v4226_v42  ;;  %v3284_v4 = vsel %vm3270_vm5, %v3267_v23, %v4227_v24  ;;  %v4515_v6 = vld [vmem:[%s6306_s0 + $0x58] sm:$0xff] }
 0xc96   :  { %v4235_v20 = vpop.permute.xlu0 %4234 }
 0xc97   :  { %v3302_v17 = vsel %vm3287_vm6, %v3285_v0, %v4241_v29  ;;  %v3303_v21 = vsel %vm3287_vm6, %v3286_v5, %v4242_v55  ;;  %v4237_v34 = vunpack.i.h.bf16 %v4235_v20  ;;  %v4236_v60 = vunpack.i.l.bf16 %v4235_v20  ;;  %v4516_v29 = vld [vmem:[%s6306_s0 + $0x48] sm:$0xff]  ;;  %v4517_v5 = vld [vmem:[%s6306_s0 + $0x70] sm:$0xff] }
 0xc98   :  { %v3311_v41 = vpack.c.bf16 %v3303_v21, %v3302_v17 }
 0xc99   :  { %v3300_v10 = vsel %vm3287_vm6, %v3283_v49, %v4236_v60  ;;  %v3301_v44 = vsel %vm3287_vm6, %v3284_v4, %v4237_v34  ;;  %v4518_v34 = vld [vmem:[%s6306_s0 + $0x60] sm:$0xff] }
 0xc9a   :  { %v3310_v9 = vpack.c.bf16 %v3301_v44, %v3300_v10 }
 0xc9c   :  { %4070 = vmatprep.mubr.msk.bf16.mxu0 %vm54_vm0, %v3310_v9  ;;  %v4520_v9 = vld [vmem:[%s6306_s0 + $0x68] sm:$0xff] }
 0xc9d   :  { %4071 = vmatmul.mubr.msk.bf16.gmra.mxu0 %vm54_vm0, %v3311_v41  ;;  %v4519_v41 = vld [vmem:[%s6306_s0 + $0x78] sm:$0xff] }
 0xd1c   :  { %v4060_v13 = vpop.f32.mrf.mxu0 }
 0xd1d   :  { %v3402_v1 = vadd.f32 %v4060_v13, %v6175_v58 }
 0xd1e   :  { %v3393_v28 = vpop.f32.mrf.mxu0 }
 0xd1f   :  { %v3458_v43 = vadd.f32 %v4505_v7, %v3402_v1  ;;  %v3394_v45 = vadd.f32 %v6175_v58, %v3393_v28 }
 0xd20   :  { %v4061_v12 = vpop.f32.mrf.mxu0 }
 0xd21   :  { %3474 = vst.msk [vmem:[%s6314_s9 + $0x10] sm:$0xff] %vm54_vm0, %v3458_v43  ;;  %v3456_v54 = vadd.f32 %v4506_v62, %v3394_v45  ;;  %v3405_v35 = vadd.f32 %v4061_v12, %v6175_v58 }
 0xd22   :  { %v3396_v37 = vpop.f32.mrf.mxu0 }
 0xd23   :  { %3472 = vst.msk [vmem:[%s6314_s9] sm:$0xff] %vm54_vm0, %v3456_v54  ;;  %v3459_v15 = vadd.f32 %v4507_v53, %v3405_v35  ;;  %v3397_v52 = vadd.f32 %v6175_v58, %v3396_v37 }
 0xd25   :  { %3475 = vst.msk [vmem:[%s6314_s9 + $0x18] sm:$0xff] %vm54_vm0, %v3459_v15  ;;  %v3457_v32 = vadd.f32 %v4508_v56, %v3397_v52 }
 0xd27   :  { %3473 = vst.msk [vmem:[%s6314_s9 + $0x8] sm:$0xff] %vm54_vm0, %v3457_v32 }
 0xd41   :  { %v4064_v19 = vpop.f32.mrf.mxu0 }
 0xd42   :  { %v3418_v14 = vadd.f32 %v4064_v19, %v6175_v58 }
 0xd43   :  { %v3409_v63 = vpop.f32.mrf.mxu0 }
 0xd44   :  { %v3462_v51 = vadd.f32 %v4509_v36, %v3418_v14  ;;  %v3410_v31 = vadd.f32 %v6175_v58, %v3409_v63 }
 0xd45   :  { %v4065_v59 = vpop.f32.mrf.mxu0 }
 0xd46   :  { %3478 = vst.msk [vmem:[%s6314_s9 + $0x30] sm:$0xff] %vm54_vm0, %v3462_v51  ;;  %v3460_v50 = vadd.f32 %v4510_v18, %v3410_v31  ;;  %v3421_v38 = vadd.f32 %v4065_v59, %v6175_v58 }
 0xd47   :  { %v3412_v48 = vpop.f32.mrf.mxu0 }
 0xd48   :  { %3476 = vst.msk [vmem:[%s6314_s9 + $0x20] sm:$0xff] %vm54_vm0, %v3460_v50  ;;  %v3463_v46 = vadd.f32 %v4511_v25, %v3421_v38  ;;  %v3413_v27 = vadd.f32 %v6175_v58, %v3412_v48 }
 0xd4a   :  { %3479 = vst.msk [vmem:[%s6314_s9 + $0x38] sm:$0xff] %vm54_vm0, %v3463_v46  ;;  %v3461_v30 = vadd.f32 %v4512_v22, %v3413_v27 }
 0xd4c   :  { %3477 = vst.msk [vmem:[%s6314_s9 + $0x28] sm:$0xff] %vm54_vm0, %v3461_v30 }
 0xd55   :  { %v4068_v61 = vpop.f32.mrf.mxu0 }
 0xd56   :  { %v3434_v57 = vadd.f32 %v4068_v61, %v6175_v58 }
 0xd57   :  { %v3425_v11 = vpop.f32.mrf.mxu0 }
 0xd58   :  { %v3466_v33 = vadd.f32 %v4513_v26, %v3434_v57  ;;  %v3426_v8 = vadd.f32 %v6175_v58, %v3425_v11 }
 0xd59   :  { %v4069_v47 = vpop.f32.mrf.mxu0 }
 0xd5a   :  { %3482 = vst.msk [vmem:[%s6314_s9 + $0x50] sm:$0xff] %vm54_vm0, %v3466_v33  ;;  %v3464_v2 = vadd.f32 %v4514_v16, %v3426_v8  ;;  %v3437_v24 = vadd.f32 %v4069_v47, %v6175_v58 }
 0xd5b   :  { %v3428_v42 = vpop.f32.mrf.mxu0 }
 0xd5c   :  { %3480 = vst.msk [vmem:[%s6314_s9 + $0x40] sm:$0xff] %vm54_vm0, %v3464_v2  ;;  %v3467_v39 = vadd.f32 %v4515_v6, %v3437_v24  ;;  %v3429_v3 = vadd.f32 %v6175_v58, %v3428_v42 }
 0xd5d   :  { %v4072_v55 = vpop.f32.mrf.mxu0 }
 0xd5e   :  { %3483 = vst.msk [vmem:[%s6314_s9 + $0x58] sm:$0xff] %vm54_vm0, %v3467_v39  ;;  %v3465_v23 = vadd.f32 %v4516_v29, %v3429_v3  ;;  %v3450_v40 = vadd.f32 %v4072_v55, %v6175_v58 }
 0xd5f   :  { %v3441_v0 = vpop.f32.mrf.mxu0 }
 0xd60   :  { %3481 = vst.msk [vmem:[%s6314_s9 + $0x48] sm:$0xff] %vm54_vm0, %v3465_v23  ;;  %v3470_v20 = vadd.f32 %v4517_v5, %v3450_v40  ;;  %v3442_v17 = vadd.f32 %v6175_v58, %v3441_v0 }
 0xd61   :  { %v4073_v21 = vpop.f32.mrf.mxu0 }
 0xd62   :  { %3486 = vst.msk [vmem:[%s6314_s9 + $0x70] sm:$0xff] %vm54_vm0, %v3470_v20  ;;  %v3468_v60 = vadd.f32 %v4518_v34, %v3442_v17  ;;  %v3453_v49 = vadd.f32 %v4073_v21, %v6175_v58 }
 0xd63   :  { %v3444_v4 = vpop.f32.mrf.mxu0 }
 0xd64   :  { %3484 = vst.msk [vmem:[%s6314_s9 + $0x60] sm:$0xff] %vm54_vm0, %v3468_v60  ;;  %v3471_v10 = vadd.f32 %v4519_v41, %v3453_v49  ;;  %v3445_v44 = vadd.f32 %v6175_v58, %v3444_v4 }
 0xd66   :  { %3487 = vst.msk [vmem:[%s6314_s9 + $0x78] sm:$0xff] %vm54_vm0, %v3471_v10  ;;  %v3469_v13 = vadd.f32 %v4520_v9, %v3445_v44 }
 0xd68   :  { %3485 = vst.msk [vmem:[%s6314_s9 + $0x68] sm:$0xff] %vm54_vm0, %v3469_v13 }

</bundles_post_ra>
